<compile_context>
chip_gen: v7x
topology: tpu7x:2x2x1
jax: 0.10.0
libtpu: 0.0.40
codegen_flags: <defaults>
</compile_context>

<pallas_src>
import math
import functools
import numpy as np

import jax
import jax.numpy as jnp
from jax.experimental import pallas as pl
from jax.experimental.pallas import tpu as pltpu


# ----------------------------- in-kernel helpers -----------------------------

def _norm(x, alpha, beta, eps):
    # torch Norm: alpha * (x - mean) / (std + eps) + bias, std UNBIASED (ddof=1)
    d = x.shape[-1]
    mean = jnp.mean(x, axis=-1, keepdims=True)
    var = jnp.sum((x - mean) ** 2, axis=-1, keepdims=True) * (1.0 / (d - 1))
    return alpha * (x - mean) / (jnp.sqrt(var) + eps) + beta


def _mha(q, k, v, bias, bb, sq, sk, heads):
    """Multi-head attention for one batch block.

    q: (bb*sq, D); k, v: (bb*sk, D); bias broadcastable to (bb, sq, sk).
    1/sqrt(d_k) is pre-folded into the Q projection.  Returns (bb*sq, D).
    """
    D = q.shape[-1]
    dk = D // heads
    q = q.reshape(bb, sq, D)
    k = k.reshape(bb, sk, D)
    v = v.reshape(bb, sk, D)
    bias = jnp.broadcast_to(bias.astype(jnp.float32), (bb, sq, sk))  # hoisted
    outs = []
    for h in range(heads):                      # unrolled; each einsum batched over bb
        sl = slice(h * dk, (h + 1) * dk)
        s = jnp.einsum('bqd,bkd->bqk', q[:, :, sl], k[:, :, sl],
                       preferred_element_type=jnp.float32)
        s = s + bias
        s = s - jnp.max(s, axis=-1, keepdims=True)
        p = jnp.exp(s)
        # approx reciprocal (EUP) — negligible numeric delta vs exact division
        p = p * pl.reciprocal(jnp.sum(p, axis=-1, keepdims=True), approx=True)
        outs.append(jnp.einsum('bqk,bkd->bqd', p, v[:, :, sl],
                               preferred_element_type=jnp.float32))
    return jnp.concatenate(outs, axis=-1).reshape(bb * sq, D)


# ----------------------------- fused decoder-stack kernel -----------------------------

def _decoder_stack_kernel(x0_ref, enc_ref, trgb_ref, srcb_ref, norms_ref,
                          wqkv_ref, bqkv_ref, wo1_ref, bo1_ref,
                          wq2_ref, bq2_ref, wkv2_ref, bkv2_ref,
                          wo2_ref, bo2_ref,
                          w1_ref, b1_ref, w2_ref, b2_ref, fnorm_ref,
                          o_ref, *, bb, sq, sk, heads, eps, n_layers):
    l = pl.program_id(1)                         # layer index (inner grid axis)

    # Seed the resident activation: o_ref doubles as the x carrier and stays in
    # VMEM across the whole layer axis (constant output block index).
    @pl.when(l == 0)
    def _():
        o_ref[...] = x0_ref[...]

    x = o_ref[...]                               # (bb*sq, D)
    D = x.shape[-1]
    norms = norms_ref[0]                         # (6, D): n1_a,n1_b,n2_a,n2_b,n3_a,n3_b

    # Causal (no-peek) additive bias regenerated on the VPU — no HBM mask traffic.
    row = jax.lax.broadcasted_iota(jnp.int32, (sq, sq), 0)
    col = jax.lax.broadcasted_iota(jnp.int32, (sq, sq), 1)
    causal = jnp.where(row >= col, 0.0, -1e9).astype(jnp.float32)

    # ---- sub-layer 1: x = x + self_attn(norm_1(x), trg_mask) ----
    x2 = _norm(x, norms[0:1], norms[1:2], eps)
    qkv = jnp.dot(x2, wqkv_ref[0], preferred_element_type=jnp.float32) + bqkv_ref[0]
    attn = _mha(qkv[:, :D], qkv[:, D:2 * D], qkv[:, 2 * D:],
                causal[None] + trgb_ref[...], bb, sq, sq, heads)
    x = x + jnp.dot(attn, wo1_ref[0], preferred_element_type=jnp.float32) + bo1_ref[0]

    # ---- sub-layer 2: x = x + cross_attn(norm_2(x), e_outputs, src_mask) ----
    x2 = _norm(x, norms[2:3], norms[3:4], eps)
    q = jnp.dot(x2, wq2_ref[0], preferred_element_type=jnp.float32) + bq2_ref[0]
    kv = jnp.dot(enc_ref[...], wkv2_ref[0],
                 preferred_element_type=jnp.float32) + bkv2_ref[0]
    attn = _mha(q, kv[:, :D], kv[:, D:], srcb_ref[...], bb, sq, sk, heads)
    x = x + jnp.dot(attn, wo2_ref[0], preferred_element_type=jnp.float32) + bo2_ref[0]

    # ---- sub-layer 3: x = x + ff(norm_3(x)) ----
    x2 = _norm(x, norms[4:5], norms[5:6], eps)
    h = jnp.maximum(
        jnp.dot(x2, w1_ref[0], preferred_element_type=jnp.float32) + b1_ref[0], 0.0)
    x = x + jnp.dot(h, w2_ref[0], preferred_element_type=jnp.float32) + b2_ref[0]

    o_ref[...] = x

    # Final Norm fused as the epilogue of the last layer step.
    @pl.when(l == n_layers - 1)
    def _():
        fn = fnorm_ref[...]
        o_ref[...] = _norm(x, fn[0:1], fn[1:2], eps)


# ----------------------------- decoder forward -----------------------------

def decoder_forward(params, trg, e_outputs, src_mask, trg_mask, *,
                    heads, batch_blocks=1, eps=1e-6):
    B, Sq = trg.shape
    Sk = e_outputs.shape[1]
    D = params['embed'].shape[1]
    Dff = params['w1'].shape[-1]
    N = params['wqkv'].shape[0]

    assert B % batch_blocks == 0
    bb = B // batch_blocks                       # batch elems per grid block

    # Embedding (sqrt(d_model) pre-folded into the table) + positional encoding:
    # stays in XLA and fuses with the gather (no standalone elementwise kernel).
    x0 = jnp.take(params['embed'], trg, axis=0) + params['pe'][:Sq]    # (B,Sq,D)
    x0 = x0.reshape(B * Sq, D)
    enc = e_outputs.astype(jnp.float32).reshape(B * Sk, D)

    # Padding masks -> additive biases (0 = attend, -1e9 = masked).  The causal
    # part of trg_mask is regenerated in-kernel; only per-key padding travels.
    # TODO(synk): an arbitrary (non pad&causal) trg_mask would need the full
    # (B,Sq,Sq) bias passed instead of this (B,1,Sq) row.
    src_bias = (src_mask.astype(jnp.float32).reshape(B, 1, Sk) - 1.0) * 1e9
    trg_bias = (trg_mask.astype(jnp.float32)[:, Sq - 1:Sq, :].reshape(B, 1, Sq)
                - 1.0) * 1e9

    wmap = lambda i, l: (l, 0, 0)                # per-layer weights stream over l
    xmap = lambda i, l: (i, 0)                   # activations / output: per batch block
    bmap = lambda i, l: (i, 0, 0)
    cmap = lambda i, l: (0, 0)                   # final norm: constant

    kernel = functools.partial(_decoder_stack_kernel, bb=bb, sq=Sq, sk=Sk,
                               heads=heads, eps=eps, n_layers=N)

    out = pl.pallas_call(
        kernel,
        out_shape=jax.ShapeDtypeStruct((B * Sq, D), jnp.float32),
        grid=(batch_blocks, N),
        in_specs=[
            pl.BlockSpec((bb * Sq, D), xmap),            # x0 (embed + PE)
            pl.BlockSpec((bb * Sk, D), xmap),            # encoder outputs
            pl.BlockSpec((bb, 1, Sq), bmap),             # trg padding bias
            pl.BlockSpec((bb, 1, Sk), bmap),             # src padding bias
            pl.BlockSpec((1, 6, D), wmap),               # layer-norm params
            pl.BlockSpec((1, D, 3 * D), wmap),           # wqkv (fused, q pre-scaled)
            pl.BlockSpec((1, 1, 3 * D), wmap),           # bqkv
            pl.BlockSpec((1, D, D), wmap),               # wo1
            pl.BlockSpec((1, 1, D), wmap),               # bo1
            pl.BlockSpec((1, D, D), wmap),               # wq2 (pre-scaled)
            pl.BlockSpec((1, 1, D), wmap),               # bq2
            pl.BlockSpec((1, D, 2 * D), wmap),           # wkv2 (fused)
            pl.BlockSpec((1, 1, 2 * D), wmap),           # bkv2
            pl.BlockSpec((1, D, D), wmap),               # wo2
            pl.BlockSpec((1, 1, D), wmap),               # bo2
            pl.BlockSpec((1, D, Dff), wmap),             # ff w1
            pl.BlockSpec((1, 1, Dff), wmap),             # ff b1
            pl.BlockSpec((1, Dff, D), wmap),             # ff w2
            pl.BlockSpec((1, 1, D), wmap),               # ff b2
            pl.BlockSpec((2, D), cmap),                  # final norm [alpha; bias]
        ],
        out_specs=pl.BlockSpec((bb * Sq, D), xmap),
        compiler_params=pltpu.CompilerParams(
            dimension_semantics=("parallel", "arbitrary"),
            vmem_limit_bytes=48 * 1024 * 1024),          # explicit budget (fits v5e/v6e/v7x)
    )(x0, enc, trg_bias, src_bias, params['norms'],
      params['wqkv'], params['bqkv'], params['wo1'], params['bo1'],
      params['wq2'], params['bq2'], params['wkv2'], params['bkv2'],
      params['wo2'], params['bo2'],
      params['w1'], params['b1'], params['w2'], params['b2'],
      params['fnorm'])

    return out.reshape(B, Sq, D)


# ----------------------------- deterministic init -----------------------------

def _make_pe(max_len, d_model):
    # Exactly reproduces the tutorial PositionalEncoder table construction.
    pe = np.zeros((max_len, d_model), dtype=np.float32)
    for pos in range(max_len):
        for i in range(0, d_model, 2):
            pe[pos, i] = math.sin(pos / (10000 ** ((2 * i) / d_model)))
            pe[pos, i + 1] = math.cos(pos / (10000 ** ((2 * (i + 1)) / d_model)))
    return jnp.asarray(pe)


def init_params(key, vocab_size, d_model, n_layers, heads, d_ff):
    dk = d_model // heads
    q_scale = 1.0 / math.sqrt(dk)       # folded into Q projections (identical math)

    def lin(k, din, dout):
        k1, k2 = jax.random.split(k)
        return (jax.random.normal(k1, (din, dout), jnp.float32) * 0.05,
                jax.random.normal(k2, (1, dout), jnp.float32) * 0.05)

    keys = jax.random.split(key, n_layers + 1)
    params = {
        # sqrt(d_model) from the PositionalEncoder folded into the table.
        'embed': jax.random.normal(keys[0], (vocab_size, d_model),
                                   jnp.float32) * 0.05 * math.sqrt(d_model),
        'pe': _make_pe(200, d_model),
        'fnorm': jnp.concatenate([jnp.ones((1, d_model), jnp.float32),
                                  jnp.zeros((1, d_model), jnp.float32)], axis=0),
    }

    L = {k: [] for k in ('norms', 'wqkv', 'bqkv', 'wo1', 'bo1', 'wq2', 'bq2',
                         'wkv2', 'bkv2', 'wo2', 'bo2', 'w1', 'b1', 'w2', 'b2')}
    ones = jnp.ones((d_model,), jnp.float32)
    zeros = jnp.zeros((d_model,), jnp.float32)
    for li in range(n_layers):
        lk = jax.random.split(keys[1 + li], 10)
        # self-attention (fused QKV, q-scale folded)
        wq, bq = lin(lk[0], d_model, d_model)
        wk, bk = lin(lk[1], d_model, d_model)
        wv, bv = lin(lk[2], d_model, d_model)
        wo, bo = lin(lk[3], d_model, d_model)
        L['wqkv'].append(jnp.concatenate([wq * q_scale, wk, wv], axis=1))
        L['bqkv'].append(jnp.concatenate([bq * q_scale, bk, bv], axis=1))
        L['wo1'].append(wo); L['bo1'].append(bo)
        # cross-attention (fused KV, q-scale folded)
        wq, bq = lin(lk[4], d_model, d_model)
        wk, bk = lin(lk[5], d_model, d_model)
        wv, bv = lin(lk[6], d_model, d_model)
        wo, bo = lin(lk[7], d_model, d_model)
        L['wq2'].append(wq * q_scale); L['bq2'].append(bq * q_scale)
        L['wkv2'].append(jnp.concatenate([wk, wv], axis=1))
        L['bkv2'].append(jnp.concatenate([bk, bv], axis=1))
        L['wo2'].append(wo); L['bo2'].append(bo)
        # feed-forward
        w1, b1 = lin(lk[8], d_model, d_ff)
        w2, b2 = lin(lk[9], d_ff, d_model)
        L['w1'].append(w1); L['b1'].append(b1)
        L['w2'].append(w2); L['b2'].append(b2)
        # norm params: [n1_a, n1_b, n2_a, n2_b, n3_a, n3_b]
        L['norms'].append(jnp.stack([ones, zeros, ones, zeros, ones, zeros]))

    for k, v in L.items():
        params[k] = jnp.stack(v, axis=0)
    return params


# ----------------------------- main -----------------------------

if __name__ == "__main__":
    vocab_size, d_model, n_layers, heads, d_ff = 11, 32, 2, 4, 2048
    B, St, Ss = 2, 8, 8

    key = jax.random.PRNGKey(0)
    k_trg, k_enc, k_par = jax.random.split(key, 3)

    trg = jax.random.randint(k_trg, (B, St), 0, vocab_size, dtype=jnp.int32)
    e_outputs = jax.random.normal(k_enc, (B, Ss, d_model), jnp.float32)

    # trg_mask: causal (no-peek) mask, (B, St, St); src_mask: padding mask (B, 1, Ss)
    trg_mask = jnp.broadcast_to(
        jnp.tril(jnp.ones((St, St), jnp.float32))[None], (B, St, St))
    src_mask = jnp.ones((B, 1, Ss), jnp.float32).at[1, 0, Ss - 2:].set(0.0)

    params = init_params(k_par, vocab_size, d_model, n_layers, heads, d_ff)

    # batch_blocks=1: full batch folded into the matmul M dimension.
    # (On v7x with larger B, set batch_blocks=2 to shard the "parallel" grid
    #  axis across both TensorCores.)
    fwd = jax.jit(functools.partial(decoder_forward, heads=heads, batch_blocks=1))
    out = fwd(params, trg, e_outputs, src_mask, trg_mask)
    out = jax.block_until_ready(out)
    assert out.shape == (B, St, d_model)
    assert bool(jnp.all(jnp.isfinite(out)))
    print("KERNEL_OK")
</pallas_src>

<mosaic_0001>
module attributes {stable_mosaic.version = 11 : i64} {
  func.func @_decoder_stack_kernel(%arg0: i32, %arg1: i32, %arg2: memref<16x32xf32, #tpu.memory_space<vmem>>, %arg3: memref<16x32xf32, #tpu.memory_space<vmem>>, %arg4: memref<2x1x8xf32, #tpu.memory_space<vmem>>, %arg5: memref<2x1x8xf32, #tpu.memory_space<vmem>>, %arg6: memref<1x6x32xf32, #tpu.memory_space<vmem>>, %arg7: memref<1x32x96xf32, #tpu.memory_space<vmem>>, %arg8: memref<1x1x96xf32, #tpu.memory_space<vmem>>, %arg9: memref<1x32x32xf32, #tpu.memory_space<vmem>>, %arg10: memref<1x1x32xf32, #tpu.memory_space<vmem>>, %arg11: memref<1x32x32xf32, #tpu.memory_space<vmem>>, %arg12: memref<1x1x32xf32, #tpu.memory_space<vmem>>, %arg13: memref<1x32x64xf32, #tpu.memory_space<vmem>>, %arg14: memref<1x1x64xf32, #tpu.memory_space<vmem>>, %arg15: memref<1x32x32xf32, #tpu.memory_space<vmem>>, %arg16: memref<1x1x32xf32, #tpu.memory_space<vmem>>, %arg17: memref<1x32x2048xf32, #tpu.memory_space<vmem>>, %arg18: memref<1x1x2048xf32, #tpu.memory_space<vmem>>, %arg19: memref<1x2048x32xf32, #tpu.memory_space<vmem>>, %arg20: memref<1x1x32xf32, #tpu.memory_space<vmem>>, %arg21: memref<2x32xf32, #tpu.memory_space<vmem>>, %arg22: memref<16x32xf32, #tpu.memory_space<vmem>>) attributes {dimension_semantics = [#tpu.dimension_semantics<parallel>, #tpu.dimension_semantics<arbitrary>], iteration_bounds = array<i64: 1, 2>, scalar_prefetch = 0 : i64, scratch_operands = 0 : i64, tpu.core_type = #tpu.core_type<tc>, window_params = [{transform_indices = @transform_0, window_bounds = array<i64: 16, 32>}, {transform_indices = @transform_1, window_bounds = array<i64: 16, 32>}, {transform_indices = @transform_2, window_bounds = array<i64: 2, 1, 8>}, {transform_indices = @transform_3, window_bounds = array<i64: 2, 1, 8>}, {transform_indices = @transform_4, window_bounds = array<i64: 1, 6, 32>}, {transform_indices = @transform_5, window_bounds = array<i64: 1, 32, 96>}, {transform_indices = @transform_6, window_bounds = array<i64: 1, 1, 96>}, {transform_indices = @transform_7, window_bounds = array<i64: 1, 32, 32>}, {transform_indices = @transform_8, window_bounds = array<i64: 1, 1, 32>}, {transform_indices = @transform_9, window_bounds = array<i64: 1, 32, 32>}, {transform_indices = @transform_10, window_bounds = array<i64: 1, 1, 32>}, {transform_indices = @transform_11, window_bounds = array<i64: 1, 32, 64>}, {transform_indices = @transform_12, window_bounds = array<i64: 1, 1, 64>}, {transform_indices = @transform_13, window_bounds = array<i64: 1, 32, 32>}, {transform_indices = @transform_14, window_bounds = array<i64: 1, 1, 32>}, {transform_indices = @transform_15, window_bounds = array<i64: 1, 32, 2048>}, {transform_indices = @transform_16, window_bounds = array<i64: 1, 1, 2048>}, {transform_indices = @transform_17, window_bounds = array<i64: 1, 2048, 32>}, {transform_indices = @transform_18, window_bounds = array<i64: 1, 1, 32>}, {pipeline_mode = #tpu.pipeline_mode<synchronous>, transform_indices = @transform_19, window_bounds = array<i64: 2, 32>}, {transform_indices = @transform_20, window_bounds = array<i64: 16, 32>}]} {
    %c0_i32 = arith.constant 0 : i32
    %0 = arith.cmpi eq, %arg1, %c0_i32 : i32
    %1 = arith.extui %0 : i1 to i32
    %c0_i32_0 = arith.constant 0 : i32
    %2 = arith.cmpi ne, %1, %c0_i32_0 : i32
    scf.if %2 {
      %c0_114 = arith.constant 0 : index
      %c0_115 = arith.constant 0 : index
      %294 = vector.load %arg2[%c0_114, %c0_115] : memref<16x32xf32, #tpu.memory_space<vmem>>, vector<16x32xf32>
      %c0_116 = arith.constant 0 : index
      %c0_117 = arith.constant 0 : index
      %295 = vector.load %arg22[%c0_116, %c0_117] : memref<16x32xf32, #tpu.memory_space<vmem>>, vector<16x32xf32>
      tpu.vector_store %arg22[%c0_116, %c0_117], %294 {strides = array<i32>} : memref<16x32xf32, #tpu.memory_space<vmem>>, vector<16x32xf32>,
    } else {
    }
    %c0 = arith.constant 0 : index
    %c0_1 = arith.constant 0 : index
    %3 = vector.load %arg22[%c0, %c0_1] : memref<16x32xf32, #tpu.memory_space<vmem>>, vector<16x32xf32>
    %c0_2 = arith.constant 0 : index
    %c0_3 = arith.constant 0 : index
    %c0_4 = arith.constant 0 : index
    %4 = vector.load %arg6[%c0_2, %c0_3, %c0_4] : memref<1x6x32xf32, #tpu.memory_space<vmem>>, vector<1x6x32xf32>
    %5 = vector.shape_cast %4 : vector<1x6x32xf32> to vector<6x32xf32>
    %6 = tpu.iota {dimensions = array<i32: 0>} : vector<8x8xi32>
    %7 = tpu.iota {dimensions = array<i32: 1>} : vector<8x8xi32>
    %8 = arith.cmpi sge, %6, %7 : vector<8x8xi32>
    %cst = arith.constant 0.000000e+00 : f32
    %cst_5 = arith.constant -1.000000e+09 : f32
    %9 = vector.broadcast %cst : f32 to vector<8x8xf32>
    %10 = vector.broadcast %cst_5 : f32 to vector<8x8xf32>
    %11 = arith.select %8, %9, %10 : vector<8x8xi1>, vector<8x8xf32>
    %12 = vector.extract_strided_slice %5 {offsets = [0, 0], sizes = [1, 32], strides = [1, 1]} : vector<6x32xf32> to vector<1x32xf32>
    %13 = vector.extract_strided_slice %5 {offsets = [1, 0], sizes = [1, 32], strides = [1, 1]} : vector<6x32xf32> to vector<1x32xf32>
    %cst_6 = arith.constant dense<0.000000e+00> : vector<16xf32>
    %14 = vector.multi_reduction <add>, %3, %cst_6 [1] : vector<16x32xf32> to vector<16xf32>
    %15 = vector.shape_cast %14 : vector<16xf32> to vector<16x1xf32>
    %cst_7 = arith.constant 3.200000e+01 : f32
    %16 = vector.broadcast %cst_7 : f32 to vector<16x1xf32>
    %17 = arith.divf %15, %16 : vector<16x1xf32>
    %18 = vector.broadcast %17 : vector<16x1xf32> to vector<16x32xf32>
    %19 = arith.subf %3, %18 : vector<16x32xf32>
    %20 = arith.mulf %19, %19 : vector<16x32xf32>
    %cst_8 = arith.constant dense<0.000000e+00> : vector<16xf32>
    %21 = vector.multi_reduction <add>, %20, %cst_8 [1] : vector<16x32xf32> to vector<16xf32>
    %22 = vector.shape_cast %21 : vector<16xf32> to vector<16x1xf32>
    %cst_9 = arith.constant 0.0322580636 : f32
    %23 = vector.broadcast %cst_9 : f32 to vector<16x1xf32>
    %24 = arith.mulf %22, %23 : vector<16x1xf32>
    %25 = vector.broadcast %17 : vector<16x1xf32> to vector<16x32xf32>
    %26 = arith.subf %3, %25 : vector<16x32xf32>
    %27 = vector.broadcast %12 : vector<1x32xf32> to vector<16x32xf32>
    %28 = arith.mulf %27, %26 : vector<16x32xf32>
    %29 = math.sqrt %24 : vector<16x1xf32>
    %cst_10 = arith.constant 9.99999997E-7 : f32
    %30 = vector.broadcast %cst_10 : f32 to vector<16x1xf32>
    %31 = arith.addf %29, %30 : vector<16x1xf32>
    %32 = vector.broadcast %31 : vector<16x1xf32> to vector<16x32xf32>
    %33 = arith.divf %28, %32 : vector<16x32xf32>
    %34 = vector.broadcast %13 : vector<1x32xf32> to vector<16x32xf32>
    %35 = arith.addf %33, %34 : vector<16x32xf32>
    %c0_11 = arith.constant 0 : index
    %c0_12 = arith.constant 0 : index
    %c0_13 = arith.constant 0 : index
    %36 = vector.load %arg7[%c0_11, %c0_12, %c0_13] : memref<1x32x96xf32, #tpu.memory_space<vmem>>, vector<1x32x96xf32>
    %37 = vector.shape_cast %36 : vector<1x32x96xf32> to vector<32x96xf32>
    %cst_14 = arith.constant dense<0.000000e+00> : vector<16x96xf32>
    %38 = tpu.matmul %35, %37, %cst_14 {dimension_numbers = #tpu.dot_dimension_numbers<[1], [0], [0], [1], [0, 0, 1, 1], [], []>} : vector<16x32xf32>, vector<32x96xf32>, vector<16x96xf32> -> vector<16x96xf32>
    %c0_15 = arith.constant 0 : index
    %c0_16 = arith.constant 0 : index
    %c0_17 = arith.constant 0 : index
    %39 = vector.load %arg8[%c0_15, %c0_16, %c0_17] : memref<1x1x96xf32, #tpu.memory_space<vmem>>, vector<1x1x96xf32>
    %40 = vector.shape_cast %39 : vector<1x1x96xf32> to vector<1x96xf32>
    %41 = vector.broadcast %40 : vector<1x96xf32> to vector<16x96xf32>
    %42 = arith.addf %38, %41 : vector<16x96xf32>
    %43 = vector.extract_strided_slice %42 {offsets = [0, 0], sizes = [16, 32], strides = [1, 1]} : vector<16x96xf32> to vector<16x32xf32>
    %44 = vector.extract_strided_slice %42 {offsets = [0, 32], sizes = [16, 32], strides = [1, 1]} : vector<16x96xf32> to vector<16x32xf32>
    %45 = vector.extract_strided_slice %42 {offsets = [0, 64], sizes = [16, 32], strides = [1, 1]} : vector<16x96xf32> to vector<16x32xf32>
    %46 = vector.shape_cast %11 : vector<8x8xf32> to vector<1x8x8xf32>
    %c0_18 = arith.constant 0 : index
    %c0_19 = arith.constant 0 : index
    %c0_20 = arith.constant 0 : index
    %47 = vector.load %arg4[%c0_18, %c0_19, %c0_20] : memref<2x1x8xf32, #tpu.memory_space<vmem>>, vector<2x1x8xf32>
    %48 = vector.broadcast %46 : vector<1x8x8xf32> to vector<2x8x8xf32>
    %49 = vector.broadcast %47 : vector<2x1x8xf32> to vector<2x8x8xf32>
    %50 = arith.addf %48, %49 : vector<2x8x8xf32>
    %51 = vector.shape_cast %43 : vector<16x32xf32> to vector<2x8x32xf32>
    %52 = vector.shape_cast %44 : vector<16x32xf32> to vector<2x8x32xf32>
    %53 = vector.shape_cast %45 : vector<16x32xf32> to vector<2x8x32xf32>
    %54 = vector.extract_strided_slice %51 {offsets = [0, 0, 0], sizes = [2, 8, 8], strides = [1, 1, 1]} : vector<2x8x32xf32> to vector<2x8x8xf32>
    %55 = vector.extract_strided_slice %52 {offsets = [0, 0, 0], sizes = [2, 8, 8], strides = [1, 1, 1]} : vector<2x8x32xf32> to vector<2x8x8xf32>
    "tpu.trace_start"() <{level = 10 : i32, message = "bqd,bkd->bqk"}> : () -> ()
    %cst_21 = arith.constant dense<0.000000e+00> : vector<2x8x8xf32>
    %56 = tpu.matmul %54, %55, %cst_21 {dimension_numbers = #tpu.dot_dimension_numbers<[2], [2], [1], [1], [0, 0, 0, 1, 1, 1], [0], [0]>} : vector<2x8x8xf32>, vector<2x8x8xf32>, vector<2x8x8xf32> -> vector<2x8x8xf32>
    "tpu.trace_stop"() : () -> ()
    %57 = arith.addf %56, %50 : vector<2x8x8xf32>
    %cst_22 = arith.constant dense<0xFF800000> : vector<2x8xf32>
    %58 = vector.multi_reduction <maximumf>, %57, %cst_22 [2] : vector<2x8x8xf32> to vector<2x8xf32>
    %59 = vector.shape_cast %58 : vector<2x8xf32> to vector<2x8x1xf32>
    %60 = vector.broadcast %59 : vector<2x8x1xf32> to vector<2x8x8xf32>
    %61 = arith.subf %57, %60 : vector<2x8x8xf32>
    %62 = math.exp %61 : vector<2x8x8xf32>
    %cst_23 = arith.constant dense<0.000000e+00> : vector<2x8xf32>
    %63 = vector.multi_reduction <add>, %62, %cst_23 [2] : vector<2x8x8xf32> to vector<2x8xf32>
    %64 = vector.shape_cast %63 : vector<2x8xf32> to vector<2x8x1xf32>
    %65 = tpu.reciprocal %64 {approx = true} : vector<2x8x1xf32> -> vector<2x8x1xf32>
    %66 = vector.broadcast %65 : vector<2x8x1xf32> to vector<2x8x8xf32>
    %67 = arith.mulf %62, %66 : vector<2x8x8xf32>
    %68 = vector.extract_strided_slice %53 {offsets = [0, 0, 0], sizes = [2, 8, 8], strides = [1, 1, 1]} : vector<2x8x32xf32> to vector<2x8x8xf32>
    "tpu.trace_start"() <{level = 10 : i32, message = "bqk,bkd->bqd"}> : () -> ()
    %cst_24 = arith.constant dense<0.000000e+00> : vector<2x8x8xf32>
    %69 = tpu.matmul %67, %68, %cst_24 {dimension_numbers = #tpu.dot_dimension_numbers<[2], [1], [1], [2], [0, 0, 0, 1, 1, 2], [0], [0]>} : vector<2x8x8xf32>, vector<2x8x8xf32>, vector<2x8x8xf32> -> vector<2x8x8xf32>
    "tpu.trace_stop"() : () -> ()
    %70 = vector.extract_strided_slice %51 {offsets = [0, 0, 8], sizes = [2, 8, 8], strides = [1, 1, 1]} : vector<2x8x32xf32> to vector<2x8x8xf32>
    %71 = vector.extract_strided_slice %52 {offsets = [0, 0, 8], sizes = [2, 8, 8], strides = [1, 1, 1]} : vector<2x8x32xf32> to vector<2x8x8xf32>
    "tpu.trace_start"() <{level = 10 : i32, message = "bqd,bkd->bqk"}> : () -> ()
    %cst_25 = arith.constant dense<0.000000e+00> : vector<2x8x8xf32>
    %72 = tpu.matmul %70, %71, %cst_25 {dimension_numbers = #tpu.dot_dimension_numbers<[2], [2], [1], [1], [0, 0, 0, 1, 1, 1], [0], [0]>} : vector<2x8x8xf32>, vector<2x8x8xf32>, vector<2x8x8xf32> -> vector<2x8x8xf32>
    "tpu.trace_stop"() : () -> ()
    %73 = arith.addf %72, %50 : vector<2x8x8xf32>
    %cst_26 = arith.constant dense<0xFF800000> : vector<2x8xf32>
    %74 = vector.multi_reduction <maximumf>, %73, %cst_26 [2] : vector<2x8x8xf32> to vector<2x8xf32>
    %75 = vector.shape_cast %74 : vector<2x8xf32> to vector<2x8x1xf32>
    %76 = vector.broadcast %75 : vector<2x8x1xf32> to vector<2x8x8xf32>
    %77 = arith.subf %73, %76 : vector<2x8x8xf32>
    %78 = math.exp %77 : vector<2x8x8xf32>
    %cst_27 = arith.constant dense<0.000000e+00> : vector<2x8xf32>
    %79 = vector.multi_reduction <add>, %78, %cst_27 [2] : vector<2x8x8xf32> to vector<2x8xf32>
    %80 = vector.shape_cast %79 : vector<2x8xf32> to vector<2x8x1xf32>
    %81 = tpu.reciprocal %80 {approx = true} : vector<2x8x1xf32> -> vector<2x8x1xf32>
    %82 = vector.broadcast %81 : vector<2x8x1xf32> to vector<2x8x8xf32>
    %83 = arith.mulf %78, %82 : vector<2x8x8xf32>
    %84 = vector.extract_strided_slice %53 {offsets = [0, 0, 8], sizes = [2, 8, 8], strides = [1, 1, 1]} : vector<2x8x32xf32> to vector<2x8x8xf32>
    "tpu.trace_start"() <{level = 10 : i32, message = "bqk,bkd->bqd"}> : () -> ()
    %cst_28 = arith.constant dense<0.000000e+00> : vector<2x8x8xf32>
    %85 = tpu.matmul %83, %84, %cst_28 {dimension_numbers = #tpu.dot_dimension_numbers<[2], [1], [1], [2], [0, 0, 0, 1, 1, 2], [0], [0]>} : vector<2x8x8xf32>, vector<2x8x8xf32>, vector<2x8x8xf32> -> vector<2x8x8xf32>
    "tpu.trace_stop"() : () -> ()
    %86 = vector.extract_strided_slice %51 {offsets = [0, 0, 16], sizes = [2, 8, 8], strides = [1, 1, 1]} : vector<2x8x32xf32> to vector<2x8x8xf32>
    %87 = vector.extract_strided_slice %52 {offsets = [0, 0, 16], sizes = [2, 8, 8], strides = [1, 1, 1]} : vector<2x8x32xf32> to vector<2x8x8xf32>
    "tpu.trace_start"() <{level = 10 : i32, message = "bqd,bkd->bqk"}> : () -> ()
    %cst_29 = arith.constant dense<0.000000e+00> : vector<2x8x8xf32>
    %88 = tpu.matmul %86, %87, %cst_29 {dimension_numbers = #tpu.dot_dimension_numbers<[2], [2], [1], [1], [0, 0, 0, 1, 1, 1], [0], [0]>} : vector<2x8x8xf32>, vector<2x8x8xf32>, vector<2x8x8xf32> -> vector<2x8x8xf32>
    "tpu.trace_stop"() : () -> ()
    %89 = arith.addf %88, %50 : vector<2x8x8xf32>
    %cst_30 = arith.constant dense<0xFF800000> : vector<2x8xf32>
    %90 = vector.multi_reduction <maximumf>, %89, %cst_30 [2] : vector<2x8x8xf32> to vector<2x8xf32>
    %91 = vector.shape_cast %90 : vector<2x8xf32> to vector<2x8x1xf32>
    %92 = vector.broadcast %91 : vector<2x8x1xf32> to vector<2x8x8xf32>
    %93 = arith.subf %89, %92 : vector<2x8x8xf32>
    %94 = math.exp %93 : vector<2x8x8xf32>
    %cst_31 = arith.constant dense<0.000000e+00> : vector<2x8xf32>
    %95 = vector.multi_reduction <add>, %94, %cst_31 [2] : vector<2x8x8xf32> to vector<2x8xf32>
    %96 = vector.shape_cast %95 : vector<2x8xf32> to vector<2x8x1xf32>
    %97 = tpu.reciprocal %96 {approx = true} : vector<2x8x1xf32> -> vector<2x8x1xf32>
    %98 = vector.broadcast %97 : vector<2x8x1xf32> to vector<2x8x8xf32>
    %99 = arith.mulf %94, %98 : vector<2x8x8xf32>
    %100 = vector.extract_strided_slice %53 {offsets = [0, 0, 16], sizes = [2, 8, 8], strides = [1, 1, 1]} : vector<2x8x32xf32> to vector<2x8x8xf32>
    "tpu.trace_start"() <{level = 10 : i32, message = "bqk,bkd->bqd"}> : () -> ()
    %cst_32 = arith.constant dense<0.000000e+00> : vector<2x8x8xf32>
    %101 = tpu.matmul %99, %100, %cst_32 {dimension_numbers = #tpu.dot_dimension_numbers<[2], [1], [1], [2], [0, 0, 0, 1, 1, 2], [0], [0]>} : vector<2x8x8xf32>, vector<2x8x8xf32>, vector<2x8x8xf32> -> vector<2x8x8xf32>
    "tpu.trace_stop"() : () -> ()
    %102 = vector.extract_strided_slice %51 {offsets = [0, 0, 24], sizes = [2, 8, 8], strides = [1, 1, 1]} : vector<2x8x32xf32> to vector<2x8x8xf32>
    %103 = vector.extract_strided_slice %52 {offsets = [0, 0, 24], sizes = [2, 8, 8], strides = [1, 1, 1]} : vector<2x8x32xf32> to vector<2x8x8xf32>
    "tpu.trace_start"() <{level = 10 : i32, message = "bqd,bkd->bqk"}> : () -> ()
    %cst_33 = arith.constant dense<0.000000e+00> : vector<2x8x8xf32>
    %104 = tpu.matmul %102, %103, %cst_33 {dimension_numbers = #tpu.dot_dimension_numbers<[2], [2], [1], [1], [0, 0, 0, 1, 1, 1], [0], [0]>} : vector<2x8x8xf32>, vector<2x8x8xf32>, vector<2x8x8xf32> -> vector<2x8x8xf32>
    "tpu.trace_stop"() : () -> ()
    %105 = arith.addf %104, %50 : vector<2x8x8xf32>
    %cst_34 = arith.constant dense<0xFF800000> : vector<2x8xf32>
    %106 = vector.multi_reduction <maximumf>, %105, %cst_34 [2] : vector<2x8x8xf32> to vector<2x8xf32>
    %107 = vector.shape_cast %106 : vector<2x8xf32> to vector<2x8x1xf32>
    %108 = vector.broadcast %107 : vector<2x8x1xf32> to vector<2x8x8xf32>
    %109 = arith.subf %105, %108 : vector<2x8x8xf32>
    %110 = math.exp %109 : vector<2x8x8xf32>
    %cst_35 = arith.constant dense<0.000000e+00> : vector<2x8xf32>
    %111 = vector.multi_reduction <add>, %110, %cst_35 [2] : vector<2x8x8xf32> to vector<2x8xf32>
    %112 = vector.shape_cast %111 : vector<2x8xf32> to vector<2x8x1xf32>
    %113 = tpu.reciprocal %112 {approx = true} : vector<2x8x1xf32> -> vector<2x8x1xf32>
    %114 = vector.broadcast %113 : vector<2x8x1xf32> to vector<2x8x8xf32>
    %115 = arith.mulf %110, %114 : vector<2x8x8xf32>
    %116 = vector.extract_strided_slice %53 {offsets = [0, 0, 24], sizes = [2, 8, 8], strides = [1, 1, 1]} : vector<2x8x32xf32> to vector<2x8x8xf32>
    "tpu.trace_start"() <{level = 10 : i32, message = "bqk,bkd->bqd"}> : () -> ()
    %cst_36 = arith.constant dense<0.000000e+00> : vector<2x8x8xf32>
    %117 = tpu.matmul %115, %116, %cst_36 {dimension_numbers = #tpu.dot_dimension_numbers<[2], [1], [1], [2], [0, 0, 0, 1, 1, 2], [0], [0]>} : vector<2x8x8xf32>, vector<2x8x8xf32>, vector<2x8x8xf32> -> vector<2x8x8xf32>
    "tpu.trace_stop"() : () -> ()
    %118 = tpu.concatenate %69, %85, %101, %117 in 2 : vector<2x8x8xf32>, vector<2x8x8xf32>, vector<2x8x8xf32>, vector<2x8x8xf32> -> vector<2x8x32xf32>
    %119 = vector.shape_cast %118 : vector<2x8x32xf32> to vector<16x32xf32>
    %c0_37 = arith.constant 0 : index
    %c0_38 = arith.constant 0 : index
    %c0_39 = arith.constant 0 : index
    %120 = vector.load %arg9[%c0_37, %c0_38, %c0_39] : memref<1x32x32xf32, #tpu.memory_space<vmem>>, vector<1x32x32xf32>
    %121 = vector.shape_cast %120 : vector<1x32x32xf32> to vector<32x32xf32>
    %cst_40 = arith.constant dense<0.000000e+00> : vector<16x32xf32>
    %122 = tpu.matmul %119, %121, %cst_40 {dimension_numbers = #tpu.dot_dimension_numbers<[1], [0], [0], [1], [0, 0, 1, 1], [], []>} : vector<16x32xf32>, vector<32x32xf32>, vector<16x32xf32> -> vector<16x32xf32>
    %123 = arith.addf %3, %122 : vector<16x32xf32>
    %c0_41 = arith.constant 0 : index
    %c0_42 = arith.constant 0 : index
    %c0_43 = arith.constant 0 : index
    %124 = vector.load %arg10[%c0_41, %c0_42, %c0_43] : memref<1x1x32xf32, #tpu.memory_space<vmem>>, vector<1x1x32xf32>
    %125 = vector.shape_cast %124 : vector<1x1x32xf32> to vector<1x32xf32>
    %126 = vector.broadcast %125 : vector<1x32xf32> to vector<16x32xf32>
    %127 = arith.addf %123, %126 : vector<16x32xf32>
    %128 = vector.extract_strided_slice %5 {offsets = [2, 0], sizes = [1, 32], strides = [1, 1]} : vector<6x32xf32> to vector<1x32xf32>
    %129 = vector.extract_strided_slice %5 {offsets = [3, 0], sizes = [1, 32], strides = [1, 1]} : vector<6x32xf32> to vector<1x32xf32>
    %cst_44 = arith.constant dense<0.000000e+00> : vector<16xf32>
    %130 = vector.multi_reduction <add>, %127, %cst_44 [1] : vector<16x32xf32> to vector<16xf32>
    %131 = vector.shape_cast %130 : vector<16xf32> to vector<16x1xf32>
    %cst_45 = arith.constant 3.200000e+01 : f32
    %132 = vector.broadcast %cst_45 : f32 to vector<16x1xf32>
    %133 = arith.divf %131, %132 : vector<16x1xf32>
    %134 = vector.broadcast %133 : vector<16x1xf32> to vector<16x32xf32>
    %135 = arith.subf %127, %134 : vector<16x32xf32>
    %136 = arith.mulf %135, %135 : vector<16x32xf32>
    %cst_46 = arith.constant dense<0.000000e+00> : vector<16xf32>
    %137 = vector.multi_reduction <add>, %136, %cst_46 [1] : vector<16x32xf32> to vector<16xf32>
    %138 = vector.shape_cast %137 : vector<16xf32> to vector<16x1xf32>
    %cst_47 = arith.constant 0.0322580636 : f32
    %139 = vector.broadcast %cst_47 : f32 to vector<16x1xf32>
    %140 = arith.mulf %138, %139 : vector<16x1xf32>
    %141 = vector.broadcast %133 : vector<16x1xf32> to vector<16x32xf32>
    %142 = arith.subf %127, %141 : vector<16x32xf32>
    %143 = vector.broadcast %128 : vector<1x32xf32> to vector<16x32xf32>
    %144 = arith.mulf %143, %142 : vector<16x32xf32>
    %145 = math.sqrt %140 : vector<16x1xf32>
    %cst_48 = arith.constant 9.99999997E-7 : f32
    %146 = vector.broadcast %cst_48 : f32 to vector<16x1xf32>
    %147 = arith.addf %145, %146 : vector<16x1xf32>
    %148 = vector.broadcast %147 : vector<16x1xf32> to vector<16x32xf32>
    %149 = arith.divf %144, %148 : vector<16x32xf32>
    %150 = vector.broadcast %129 : vector<1x32xf32> to vector<16x32xf32>
    %151 = arith.addf %149, %150 : vector<16x32xf32>
    %c0_49 = arith.constant 0 : index
    %c0_50 = arith.constant 0 : index
    %c0_51 = arith.constant 0 : index
    %152 = vector.load %arg11[%c0_49, %c0_50, %c0_51] : memref<1x32x32xf32, #tpu.memory_space<vmem>>, vector<1x32x32xf32>
    %153 = vector.shape_cast %152 : vector<1x32x32xf32> to vector<32x32xf32>
    %cst_52 = arith.constant dense<0.000000e+00> : vector<16x32xf32>
    %154 = tpu.matmul %151, %153, %cst_52 {dimension_numbers = #tpu.dot_dimension_numbers<[1], [0], [0], [1], [0, 0, 1, 1], [], []>} : vector<16x32xf32>, vector<32x32xf32>, vector<16x32xf32> -> vector<16x32xf32>
    %c0_53 = arith.constant 0 : index
    %c0_54 = arith.constant 0 : index
    %c0_55 = arith.constant 0 : index
    %155 = vector.load %arg12[%c0_53, %c0_54, %c0_55] : memref<1x1x32xf32, #tpu.memory_space<vmem>>, vector<1x1x32xf32>
    %156 = vector.shape_cast %155 : vector<1x1x32xf32> to vector<1x32xf32>
    %157 = vector.broadcast %156 : vector<1x32xf32> to vector<16x32xf32>
    %158 = arith.addf %154, %157 : vector<16x32xf32>
    %c0_56 = arith.constant 0 : index
    %c0_57 = arith.constant 0 : index
    %159 = vector.load %arg3[%c0_56, %c0_57] : memref<16x32xf32, #tpu.memory_space<vmem>>, vector<16x32xf32>
    %c0_58 = arith.constant 0 : index
    %c0_59 = arith.constant 0 : index
    %c0_60 = arith.constant 0 : index
    %160 = vector.load %arg13[%c0_58, %c0_59, %c0_60] : memref<1x32x64xf32, #tpu.memory_space<vmem>>, vector<1x32x64xf32>
    %161 = vector.shape_cast %160 : vector<1x32x64xf32> to vector<32x64xf32>
    %cst_61 = arith.constant dense<0.000000e+00> : vector<16x64xf32>
    %162 = tpu.matmul %159, %161, %cst_61 {dimension_numbers = #tpu.dot_dimension_numbers<[1], [0], [0], [1], [0, 0, 1, 1], [], []>} : vector<16x32xf32>, vector<32x64xf32>, vector<16x64xf32> -> vector<16x64xf32>
    %c0_62 = arith.constant 0 : index
    %c0_63 = arith.constant 0 : index
    %c0_64 = arith.constant 0 : index
    %163 = vector.load %arg14[%c0_62, %c0_63, %c0_64] : memref<1x1x64xf32, #tpu.memory_space<vmem>>, vector<1x1x64xf32>
    %164 = vector.shape_cast %163 : vector<1x1x64xf32> to vector<1x64xf32>
    %165 = vector.broadcast %164 : vector<1x64xf32> to vector<16x64xf32>
    %166 = arith.addf %162, %165 : vector<16x64xf32>
    %167 = vector.extract_strided_slice %166 {offsets = [0, 0], sizes = [16, 32], strides = [1, 1]} : vector<16x64xf32> to vector<16x32xf32>
    %168 = vector.extract_strided_slice %166 {offsets = [0, 32], sizes = [16, 32], strides = [1, 1]} : vector<16x64xf32> to vector<16x32xf32>
    %c0_65 = arith.constant 0 : index
    %c0_66 = arith.constant 0 : index
    %c0_67 = arith.constant 0 : index
    %169 = vector.load %arg5[%c0_65, %c0_66, %c0_67] : memref<2x1x8xf32, #tpu.memory_space<vmem>>, vector<2x1x8xf32>
    %170 = vector.shape_cast %158 : vector<16x32xf32> to vector<2x8x32xf32>
    %171 = vector.shape_cast %167 : vector<16x32xf32> to vector<2x8x32xf32>
    %172 = vector.shape_cast %168 : vector<16x32xf32> to vector<2x8x32xf32>
    %173 = vector.shape_cast %169 : vector<2x1x8xf32> to vector<2x1x8xf32>
    %174 = vector.broadcast %173 : vector<2x1x8xf32> to vector<2x8x8xf32>
    %175 = vector.extract_strided_slice %170 {offsets = [0, 0, 0], sizes = [2, 8, 8], strides = [1, 1, 1]} : vector<2x8x32xf32> to vector<2x8x8xf32>
    %176 = vector.extract_strided_slice %171 {offsets = [0, 0, 0], sizes = [2, 8, 8], strides = [1, 1, 1]} : vector<2x8x32xf32> to vector<2x8x8xf32>
    "tpu.trace_start"() <{level = 10 : i32, message = "bqd,bkd->bqk"}> : () -> ()
    %cst_68 = arith.constant dense<0.000000e+00> : vector<2x8x8xf32>
    %177 = tpu.matmul %175, %176, %cst_68 {dimension_numbers = #tpu.dot_dimension_numbers<[2], [2], [1], [1], [0, 0, 0, 1, 1, 1], [0], [0]>} : vector<2x8x8xf32>, vector<2x8x8xf32>, vector<2x8x8xf32> -> vector<2x8x8xf32>
    "tpu.trace_stop"() : () -> ()
    %178 = arith.addf %177, %174 : vector<2x8x8xf32>
    %cst_69 = arith.constant dense<0xFF800000> : vector<2x8xf32>
    %179 = vector.multi_reduction <maximumf>, %178, %cst_69 [2] : vector<2x8x8xf32> to vector<2x8xf32>
    %180 = vector.shape_cast %179 : vector<2x8xf32> to vector<2x8x1xf32>
    %181 = vector.broadcast %180 : vector<2x8x1xf32> to vector<2x8x8xf32>
    %182 = arith.subf %178, %181 : vector<2x8x8xf32>
    %183 = math.exp %182 : vector<2x8x8xf32>
    %cst_70 = arith.constant dense<0.000000e+00> : vector<2x8xf32>
    %184 = vector.multi_reduction <add>, %183, %cst_70 [2] : vector<2x8x8xf32> to vector<2x8xf32>
    %185 = vector.shape_cast %184 : vector<2x8xf32> to vector<2x8x1xf32>
    %186 = tpu.reciprocal %185 {approx = true} : vector<2x8x1xf32> -> vector<2x8x1xf32>
    %187 = vector.broadcast %186 : vector<2x8x1xf32> to vector<2x8x8xf32>
    %188 = arith.mulf %183, %187 : vector<2x8x8xf32>
    %189 = vector.extract_strided_slice %172 {offsets = [0, 0, 0], sizes = [2, 8, 8], strides = [1, 1, 1]} : vector<2x8x32xf32> to vector<2x8x8xf32>
    "tpu.trace_start"() <{level = 10 : i32, message = "bqk,bkd->bqd"}> : () -> ()
    %cst_71 = arith.constant dense<0.000000e+00> : vector<2x8x8xf32>
    %190 = tpu.matmul %188, %189, %cst_71 {dimension_numbers = #tpu.dot_dimension_numbers<[2], [1], [1], [2], [0, 0, 0, 1, 1, 2], [0], [0]>} : vector<2x8x8xf32>, vector<2x8x8xf32>, vector<2x8x8xf32> -> vector<2x8x8xf32>
    "tpu.trace_stop"() : () -> ()
    %191 = vector.extract_strided_slice %170 {offsets = [0, 0, 8], sizes = [2, 8, 8], strides = [1, 1, 1]} : vector<2x8x32xf32> to vector<2x8x8xf32>
    %192 = vector.extract_strided_slice %171 {offsets = [0, 0, 8], sizes = [2, 8, 8], strides = [1, 1, 1]} : vector<2x8x32xf32> to vector<2x8x8xf32>
    "tpu.trace_start"() <{level = 10 : i32, message = "bqd,bkd->bqk"}> : () -> ()
    %cst_72 = arith.constant dense<0.000000e+00> : vector<2x8x8xf32>
    %193 = tpu.matmul %191, %192, %cst_72 {dimension_numbers = #tpu.dot_dimension_numbers<[2], [2], [1], [1], [0, 0, 0, 1, 1, 1], [0], [0]>} : vector<2x8x8xf32>, vector<2x8x8xf32>, vector<2x8x8xf32> -> vector<2x8x8xf32>
    "tpu.trace_stop"() : () -> ()
    %194 = arith.addf %193, %174 : vector<2x8x8xf32>
    %cst_73 = arith.constant dense<0xFF800000> : vector<2x8xf32>
    %195 = vector.multi_reduction <maximumf>, %194, %cst_73 [2] : vector<2x8x8xf32> to vector<2x8xf32>
    %196 = vector.shape_cast %195 : vector<2x8xf32> to vector<2x8x1xf32>
    %197 = vector.broadcast %196 : vector<2x8x1xf32> to vector<2x8x8xf32>
    %198 = arith.subf %194, %197 : vector<2x8x8xf32>
    %199 = math.exp %198 : vector<2x8x8xf32>
    %cst_74 = arith.constant dense<0.000000e+00> : vector<2x8xf32>
    %200 = vector.multi_reduction <add>, %199, %cst_74 [2] : vector<2x8x8xf32> to vector<2x8xf32>
    %201 = vector.shape_cast %200 : vector<2x8xf32> to vector<2x8x1xf32>
    %202 = tpu.reciprocal %201 {approx = true} : vector<2x8x1xf32> -> vector<2x8x1xf32>
    %203 = vector.broadcast %202 : vector<2x8x1xf32> to vector<2x8x8xf32>
    %204 = arith.mulf %199, %203 : vector<2x8x8xf32>
    %205 = vector.extract_strided_slice %172 {offsets = [0, 0, 8], sizes = [2, 8, 8], strides = [1, 1, 1]} : vector<2x8x32xf32> to vector<2x8x8xf32>
    "tpu.trace_start"() <{level = 10 : i32, message = "bqk,bkd->bqd"}> : () -> ()
    %cst_75 = arith.constant dense<0.000000e+00> : vector<2x8x8xf32>
    %206 = tpu.matmul %204, %205, %cst_75 {dimension_numbers = #tpu.dot_dimension_numbers<[2], [1], [1], [2], [0, 0, 0, 1, 1, 2], [0], [0]>} : vector<2x8x8xf32>, vector<2x8x8xf32>, vector<2x8x8xf32> -> vector<2x8x8xf32>
    "tpu.trace_stop"() : () -> ()
    %207 = vector.extract_strided_slice %170 {offsets = [0, 0, 16], sizes = [2, 8, 8], strides = [1, 1, 1]} : vector<2x8x32xf32> to vector<2x8x8xf32>
    %208 = vector.extract_strided_slice %171 {offsets = [0, 0, 16], sizes = [2, 8, 8], strides = [1, 1, 1]} : vector<2x8x32xf32> to vector<2x8x8xf32>
    "tpu.trace_start"() <{level = 10 : i32, message = "bqd,bkd->bqk"}> : () -> ()
    %cst_76 = arith.constant dense<0.000000e+00> : vector<2x8x8xf32>
    %209 = tpu.matmul %207, %208, %cst_76 {dimension_numbers = #tpu.dot_dimension_numbers<[2], [2], [1], [1], [0, 0, 0, 1, 1, 1], [0], [0]>} : vector<2x8x8xf32>, vector<2x8x8xf32>, vector<2x8x8xf32> -> vector<2x8x8xf32>
    "tpu.trace_stop"() : () -> ()
    %210 = arith.addf %209, %174 : vector<2x8x8xf32>
    %cst_77 = arith.constant dense<0xFF800000> : vector<2x8xf32>
    %211 = vector.multi_reduction <maximumf>, %210, %cst_77 [2] : vector<2x8x8xf32> to vector<2x8xf32>
    %212 = vector.shape_cast %211 : vector<2x8xf32> to vector<2x8x1xf32>
    %213 = vector.broadcast %212 : vector<2x8x1xf32> to vector<2x8x8xf32>
    %214 = arith.subf %210, %213 : vector<2x8x8xf32>
    %215 = math.exp %214 : vector<2x8x8xf32>
    %cst_78 = arith.constant dense<0.000000e+00> : vector<2x8xf32>
    %216 = vector.multi_reduction <add>, %215, %cst_78 [2] : vector<2x8x8xf32> to vector<2x8xf32>
    %217 = vector.shape_cast %216 : vector<2x8xf32> to vector<2x8x1xf32>
    %218 = tpu.reciprocal %217 {approx = true} : vector<2x8x1xf32> -> vector<2x8x1xf32>
    %219 = vector.broadcast %218 : vector<2x8x1xf32> to vector<2x8x8xf32>
    %220 = arith.mulf %215, %219 : vector<2x8x8xf32>
    %221 = vector.extract_strided_slice %172 {offsets = [0, 0, 16], sizes = [2, 8, 8], strides = [1, 1, 1]} : vector<2x8x32xf32> to vector<2x8x8xf32>
    "tpu.trace_start"() <{level = 10 : i32, message = "bqk,bkd->bqd"}> : () -> ()
    %cst_79 = arith.constant dense<0.000000e+00> : vector<2x8x8xf32>
    %222 = tpu.matmul %220, %221, %cst_79 {dimension_numbers = #tpu.dot_dimension_numbers<[2], [1], [1], [2], [0, 0, 0, 1, 1, 2], [0], [0]>} : vector<2x8x8xf32>, vector<2x8x8xf32>, vector<2x8x8xf32> -> vector<2x8x8xf32>
    "tpu.trace_stop"() : () -> ()
    %223 = vector.extract_strided_slice %170 {offsets = [0, 0, 24], sizes = [2, 8, 8], strides = [1, 1, 1]} : vector<2x8x32xf32> to vector<2x8x8xf32>
    %224 = vector.extract_strided_slice %171 {offsets = [0, 0, 24], sizes = [2, 8, 8], strides = [1, 1, 1]} : vector<2x8x32xf32> to vector<2x8x8xf32>
    "tpu.trace_start"() <{level = 10 : i32, message = "bqd,bkd->bqk"}> : () -> ()
    %cst_80 = arith.constant dense<0.000000e+00> : vector<2x8x8xf32>
    %225 = tpu.matmul %223, %224, %cst_80 {dimension_numbers = #tpu.dot_dimension_numbers<[2], [2], [1], [1], [0, 0, 0, 1, 1, 1], [0], [0]>} : vector<2x8x8xf32>, vector<2x8x8xf32>, vector<2x8x8xf32> -> vector<2x8x8xf32>
    "tpu.trace_stop"() : () -> ()
    %226 = arith.addf %225, %174 : vector<2x8x8xf32>
    %cst_81 = arith.constant dense<0xFF800000> : vector<2x8xf32>
    %227 = vector.multi_reduction <maximumf>, %226, %cst_81 [2] : vector<2x8x8xf32> to vector<2x8xf32>
    %228 = vector.shape_cast %227 : vector<2x8xf32> to vector<2x8x1xf32>
    %229 = vector.broadcast %228 : vector<2x8x1xf32> to vector<2x8x8xf32>
    %230 = arith.subf %226, %229 : vector<2x8x8xf32>
    %231 = math.exp %230 : vector<2x8x8xf32>
    %cst_82 = arith.constant dense<0.000000e+00> : vector<2x8xf32>
    %232 = vector.multi_reduction <add>, %231, %cst_82 [2] : vector<2x8x8xf32> to vector<2x8xf32>
    %233 = vector.shape_cast %232 : vector<2x8xf32> to vector<2x8x1xf32>
    %234 = tpu.reciprocal %233 {approx = true} : vector<2x8x1xf32> -> vector<2x8x1xf32>
    %235 = vector.broadcast %234 : vector<2x8x1xf32> to vector<2x8x8xf32>
    %236 = arith.mulf %231, %235 : vector<2x8x8xf32>
    %237 = vector.extract_strided_slice %172 {offsets = [0, 0, 24], sizes = [2, 8, 8], strides = [1, 1, 1]} : vector<2x8x32xf32> to vector<2x8x8xf32>
    "tpu.trace_start"() <{level = 10 : i32, message = "bqk,bkd->bqd"}> : () -> ()
    %cst_83 = arith.constant dense<0.000000e+00> : vector<2x8x8xf32>
    %238 = tpu.matmul %236, %237, %cst_83 {dimension_numbers = #tpu.dot_dimension_numbers<[2], [1], [1], [2], [0, 0, 0, 1, 1, 2], [0], [0]>} : vector<2x8x8xf32>, vector<2x8x8xf32>, vector<2x8x8xf32> -> vector<2x8x8xf32>
    "tpu.trace_stop"() : () -> ()
    %239 = tpu.concatenate %190, %206, %222, %238 in 2 : vector<2x8x8xf32>, vector<2x8x8xf32>, vector<2x8x8xf32>, vector<2x8x8xf32> -> vector<2x8x32xf32>
    %240 = vector.shape_cast %239 : vector<2x8x32xf32> to vector<16x32xf32>
    %c0_84 = arith.constant 0 : index
    %c0_85 = arith.constant 0 : index
    %c0_86 = arith.constant 0 : index
    %241 = vector.load %arg15[%c0_84, %c0_85, %c0_86] : memref<1x32x32xf32, #tpu.memory_space<vmem>>, vector<1x32x32xf32>
    %242 = vector.shape_cast %241 : vector<1x32x32xf32> to vector<32x32xf32>
    %cst_87 = arith.constant dense<0.000000e+00> : vector<16x32xf32>
    %243 = tpu.matmul %240, %242, %cst_87 {dimension_numbers = #tpu.dot_dimension_numbers<[1], [0], [0], [1], [0, 0, 1, 1], [], []>} : vector<16x32xf32>, vector<32x32xf32>, vector<16x32xf32> -> vector<16x32xf32>
    %244 = arith.addf %127, %243 : vector<16x32xf32>
    %c0_88 = arith.constant 0 : index
    %c0_89 = arith.constant 0 : index
    %c0_90 = arith.constant 0 : index
    %245 = vector.load %arg16[%c0_88, %c0_89, %c0_90] : memref<1x1x32xf32, #tpu.memory_space<vmem>>, vector<1x1x32xf32>
    %246 = vector.shape_cast %245 : vector<1x1x32xf32> to vector<1x32xf32>
    %247 = vector.broadcast %246 : vector<1x32xf32> to vector<16x32xf32>
    %248 = arith.addf %244, %247 : vector<16x32xf32>
    %249 = vector.extract_strided_slice %5 {offsets = [4, 0], sizes = [1, 32], strides = [1, 1]} : vector<6x32xf32> to vector<1x32xf32>
    %250 = vector.extract_strided_slice %5 {offsets = [5, 0], sizes = [1, 32], strides = [1, 1]} : vector<6x32xf32> to vector<1x32xf32>
    %cst_91 = arith.constant dense<0.000000e+00> : vector<16xf32>
    %251 = vector.multi_reduction <add>, %248, %cst_91 [1] : vector<16x32xf32> to vector<16xf32>
    %252 = vector.shape_cast %251 : vector<16xf32> to vector<16x1xf32>
    %cst_92 = arith.constant 3.200000e+01 : f32
    %253 = vector.broadcast %cst_92 : f32 to vector<16x1xf32>
    %254 = arith.divf %252, %253 : vector<16x1xf32>
    %255 = vector.broadcast %254 : vector<16x1xf32> to vector<16x32xf32>
    %256 = arith.subf %248, %255 : vector<16x32xf32>
    %257 = arith.mulf %256, %256 : vector<16x32xf32>
    %cst_93 = arith.constant dense<0.000000e+00> : vector<16xf32>
    %258 = vector.multi_reduction <add>, %257, %cst_93 [1] : vector<16x32xf32> to vector<16xf32>
    %259 = vector.shape_cast %258 : vector<16xf32> to vector<16x1xf32>
    %cst_94 = arith.constant 0.0322580636 : f32
    %260 = vector.broadcast %cst_94 : f32 to vector<16x1xf32>
    %261 = arith.mulf %259, %260 : vector<16x1xf32>
    %262 = vector.broadcast %254 : vector<16x1xf32> to vector<16x32xf32>
    %263 = arith.subf %248, %262 : vector<16x32xf32>
    %264 = vector.broadcast %249 : vector<1x32xf32> to vector<16x32xf32>
    %265 = arith.mulf %264, %263 : vector<16x32xf32>
    %266 = math.sqrt %261 : vector<16x1xf32>
    %cst_95 = arith.constant 9.99999997E-7 : f32
    %267 = vector.broadcast %cst_95 : f32 to vector<16x1xf32>
    %268 = arith.addf %266, %267 : vector<16x1xf32>
    %269 = vector.broadcast %268 : vector<16x1xf32> to vector<16x32xf32>
    %270 = arith.divf %265, %269 : vector<16x32xf32>
    %271 = vector.broadcast %250 : vector<1x32xf32> to vector<16x32xf32>
    %272 = arith.addf %270, %271 : vector<16x32xf32>
    %c0_96 = arith.constant 0 : index
    %c0_97 = arith.constant 0 : index
    %c0_98 = arith.constant 0 : index
    %273 = vector.load %arg17[%c0_96, %c0_97, %c0_98] : memref<1x32x2048xf32, #tpu.memory_space<vmem>>, vector<1x32x2048xf32>
    %274 = vector.shape_cast %273 : vector<1x32x2048xf32> to vector<32x2048xf32>
    %cst_99 = arith.constant dense<0.000000e+00> : vector<16x2048xf32>
    %275 = tpu.matmul %272, %274, %cst_99 {dimension_numbers = #tpu.dot_dimension_numbers<[1], [0], [0], [1], [0, 0, 1, 1], [], []>} : vector<16x32xf32>, vector<32x2048xf32>, vector<16x2048xf32> -> vector<16x2048xf32>
    %c0_100 = arith.constant 0 : index
    %c0_101 = arith.constant 0 : index
    %c0_102 = arith.constant 0 : index
    %276 = vector.load %arg18[%c0_100, %c0_101, %c0_102] : memref<1x1x2048xf32, #tpu.memory_space<vmem>>, vector<1x1x2048xf32>
    %277 = vector.shape_cast %276 : vector<1x1x2048xf32> to vector<1x2048xf32>
    %278 = vector.broadcast %277 : vector<1x2048xf32> to vector<16x2048xf32>
    %279 = arith.addf %275, %278 : vector<16x2048xf32>
    %cst_103 = arith.constant 0.000000e+00 : f32
    %280 = vector.broadcast %cst_103 : f32 to vector<16x2048xf32>
    %281 = arith.maximumf %279, %280 : vector<16x2048xf32>
    %c0_104 = arith.constant 0 : index
    %c0_105 = arith.constant 0 : index
    %c0_106 = arith.constant 0 : index
    %282 = vector.load %arg19[%c0_104, %c0_105, %c0_106] : memref<1x2048x32xf32, #tpu.memory_space<vmem>>, vector<1x2048x32xf32>
    %283 = vector.shape_cast %282 : vector<1x2048x32xf32> to vector<2048x32xf32>
    %cst_107 = arith.constant dense<0.000000e+00> : vector<16x32xf32>
    %284 = tpu.matmul %281, %283, %cst_107 {dimension_numbers = #tpu.dot_dimension_numbers<[1], [0], [0], [1], [0, 0, 1, 1], [], []>} : vector<16x2048xf32>, vector<2048x32xf32>, vector<16x32xf32> -> vector<16x32xf32>
    %285 = arith.addf %248, %284 : vector<16x32xf32>
    %c0_108 = arith.constant 0 : index
    %c0_109 = arith.constant 0 : index
    %c0_110 = arith.constant 0 : index
    %286 = vector.load %arg20[%c0_108, %c0_109, %c0_110] : memref<1x1x32xf32, #tpu.memory_space<vmem>>, vector<1x1x32xf32>
    %287 = vector.shape_cast %286 : vector<1x1x32xf32> to vector<1x32xf32>
    %288 = vector.broadcast %287 : vector<1x32xf32> to vector<16x32xf32>
    %289 = arith.addf %285, %288 : vector<16x32xf32>
    %c0_111 = arith.constant 0 : index
    %c0_112 = arith.constant 0 : index
    %290 = vector.load %arg22[%c0_111, %c0_112] : memref<16x32xf32, #tpu.memory_space<vmem>>, vector<16x32xf32>
    tpu.vector_store %arg22[%c0_111, %c0_112], %289 {strides = array<i32>} : memref<16x32xf32, #tpu.memory_space<vmem>>, vector<16x32xf32>,
    %c1_i32 = arith.constant 1 : i32
    %291 = arith.cmpi eq, %arg1, %c1_i32 : i32
    %292 = arith.extui %291 : i1 to i32
    %c0_i32_113 = arith.constant 0 : i32
    %293 = arith.cmpi ne, %292, %c0_i32_113 : i32
    scf.if %293 {
      %c0_114 = arith.constant 0 : index
      %c0_115 = arith.constant 0 : index
      %294 = vector.load %arg21[%c0_114, %c0_115] : memref<2x32xf32, #tpu.memory_space<vmem>>, vector<2x32xf32>
      %295 = vector.extract_strided_slice %294 {offsets = [0, 0], sizes = [1, 32], strides = [1, 1]} : vector<2x32xf32> to vector<1x32xf32>
      %296 = vector.extract_strided_slice %294 {offsets = [1, 0], sizes = [1, 32], strides = [1, 1]} : vector<2x32xf32> to vector<1x32xf32>
      %cst_116 = arith.constant dense<0.000000e+00> : vector<16xf32>
      %297 = vector.multi_reduction <add>, %289, %cst_116 [1] : vector<16x32xf32> to vector<16xf32>
      %298 = vector.shape_cast %297 : vector<16xf32> to vector<16x1xf32>
      %cst_117 = arith.constant 3.200000e+01 : f32
      %299 = vector.broadcast %cst_117 : f32 to vector<16x1xf32>
      %300 = arith.divf %298, %299 : vector<16x1xf32>
      %301 = vector.broadcast %300 : vector<16x1xf32> to vector<16x32xf32>
      %302 = arith.subf %289, %301 : vector<16x32xf32>
      %303 = arith.mulf %302, %302 : vector<16x32xf32>
      %cst_118 = arith.constant dense<0.000000e+00> : vector<16xf32>
      %304 = vector.multi_reduction <add>, %303, %cst_118 [1] : vector<16x32xf32> to vector<16xf32>
      %305 = vector.shape_cast %304 : vector<16xf32> to vector<16x1xf32>
      %cst_119 = arith.constant 0.0322580636 : f32
      %306 = vector.broadcast %cst_119 : f32 to vector<16x1xf32>
      %307 = arith.mulf %305, %306 : vector<16x1xf32>
      %308 = vector.broadcast %300 : vector<16x1xf32> to vector<16x32xf32>
      %309 = arith.subf %289, %308 : vector<16x32xf32>
      %310 = vector.broadcast %295 : vector<1x32xf32> to vector<16x32xf32>
      %311 = arith.mulf %310, %309 : vector<16x32xf32>
      %312 = math.sqrt %307 : vector<16x1xf32>
      %cst_120 = arith.constant 9.99999997E-7 : f32
      %313 = vector.broadcast %cst_120 : f32 to vector<16x1xf32>
      %314 = arith.addf %312, %313 : vector<16x1xf32>
      %315 = vector.broadcast %314 : vector<16x1xf32> to vector<16x32xf32>
      %316 = arith.divf %311, %315 : vector<16x32xf32>
      %317 = vector.broadcast %296 : vector<1x32xf32> to vector<16x32xf32>
      %318 = arith.addf %316, %317 : vector<16x32xf32>
      %c0_121 = arith.constant 0 : index
      %c0_122 = arith.constant 0 : index
      %319 = vector.load %arg22[%c0_121, %c0_122] : memref<16x32xf32, #tpu.memory_space<vmem>>, vector<16x32xf32>
      tpu.vector_store %arg22[%c0_121, %c0_122], %318 {strides = array<i32>} : memref<16x32xf32, #tpu.memory_space<vmem>>, vector<16x32xf32>,
    } else {
    }
    return
  }
  func.func @transform_0(%arg0: i32, %arg1: i32) -> (i32, i32) {
    %c0_i32 = arith.constant 0 : i32
    %c0_i32_0 = arith.constant 0 : i32
    return %arg0, %c0_i32 : i32, i32
  }
  func.func @transform_1(%arg0: i32, %arg1: i32) -> (i32, i32) {
    %c0_i32 = arith.constant 0 : i32
    %c0_i32_0 = arith.constant 0 : i32
    return %arg0, %c0_i32 : i32, i32
  }
  func.func @transform_2(%arg0: i32, %arg1: i32) -> (i32, i32, i32) {
    %c0_i32 = arith.constant 0 : i32
    %c0_i32_0 = arith.constant 0 : i32
    %c0_i32_1 = arith.constant 0 : i32
    return %arg0, %c0_i32, %c0_i32_0 : i32, i32, i32
  }
  func.func @transform_3(%arg0: i32, %arg1: i32) -> (i32, i32, i32) {
    %c0_i32 = arith.constant 0 : i32
    %c0_i32_0 = arith.constant 0 : i32
    %c0_i32_1 = arith.constant 0 : i32
    return %arg0, %c0_i32, %c0_i32_0 : i32, i32, i32
  }
  func.func @transform_4(%arg0: i32, %arg1: i32) -> (i32, i32, i32) {
    %c0_i32 = arith.constant 0 : i32
    %c0_i32_0 = arith.constant 0 : i32
    %c0_i32_1 = arith.constant 0 : i32
    return %arg1, %c0_i32, %c0_i32_0 : i32, i32, i32
  }
  func.func @transform_5(%arg0: i32, %arg1: i32) -> (i32, i32, i32) {
    %c0_i32 = arith.constant 0 : i32
    %c0_i32_0 = arith.constant 0 : i32
    %c0_i32_1 = arith.constant 0 : i32
    return %arg1, %c0_i32, %c0_i32_0 : i32, i32, i32
  }
  func.func @transform_6(%arg0: i32, %arg1: i32) -> (i32, i32, i32) {
    %c0_i32 = arith.constant 0 : i32
    %c0_i32_0 = arith.constant 0 : i32
    %c0_i32_1 = arith.constant 0 : i32
    return %arg1, %c0_i32, %c0_i32_0 : i32, i32, i32
  }
  func.func @transform_7(%arg0: i32, %arg1: i32) -> (i32, i32, i32) {
    %c0_i32 = arith.constant 0 : i32
    %c0_i32_0 = arith.constant 0 : i32
    %c0_i32_1 = arith.constant 0 : i32
    return %arg1, %c0_i32, %c0_i32_0 : i32, i32, i32
  }
  func.func @transform_8(%arg0: i32, %arg1: i32) -> (i32, i32, i32) {
    %c0_i32 = arith.constant 0 : i32
    %c0_i32_0 = arith.constant 0 : i32
    %c0_i32_1 = arith.constant 0 : i32
    return %arg1, %c0_i32, %c0_i32_0 : i32, i32, i32
  }
  func.func @transform_9(%arg0: i32, %arg1: i32) -> (i32, i32, i32) {
    %c0_i32 = arith.constant 0 : i32
    %c0_i32_0 = arith.constant 0 : i32
    %c0_i32_1 = arith.constant 0 : i32
    return %arg1, %c0_i32, %c0_i32_0 : i32, i32, i32
  }
  func.func @transform_10(%arg0: i32, %arg1: i32) -> (i32, i32, i32) {
    %c0_i32 = arith.constant 0 : i32
    %c0_i32_0 = arith.constant 0 : i32
    %c0_i32_1 = arith.constant 0 : i32
    return %arg1, %c0_i32, %c0_i32_0 : i32, i32, i32
  }
  func.func @transform_11(%arg0: i32, %arg1: i32) -> (i32, i32, i32) {
    %c0_i32 = arith.constant 0 : i32
    %c0_i32_0 = arith.constant 0 : i32
    %c0_i32_1 = arith.constant 0 : i32
    return %arg1, %c0_i32, %c0_i32_0 : i32, i32, i32
  }
  func.func @transform_12(%arg0: i32, %arg1: i32) -> (i32, i32, i32) {
    %c0_i32 = arith.constant 0 : i32
    %c0_i32_0 = arith.constant 0 : i32
    %c0_i32_1 = arith.constant 0 : i32
    return %arg1, %c0_i32, %c0_i32_0 : i32, i32, i32
  }
  func.func @transform_13(%arg0: i32, %arg1: i32) -> (i32, i32, i32) {
    %c0_i32 = arith.constant 0 : i32
    %c0_i32_0 = arith.constant 0 : i32
    %c0_i32_1 = arith.constant 0 : i32
    return %arg1, %c0_i32, %c0_i32_0 : i32, i32, i32
  }
  func.func @transform_14(%arg0: i32, %arg1: i32) -> (i32, i32, i32) {
    %c0_i32 = arith.constant 0 : i32
    %c0_i32_0 = arith.constant 0 : i32
    %c0_i32_1 = arith.constant 0 : i32
    return %arg1, %c0_i32, %c0_i32_0 : i32, i32, i32
  }
  func.func @transform_15(%arg0: i32, %arg1: i32) -> (i32, i32, i32) {
    %c0_i32 = arith.constant 0 : i32
    %c0_i32_0 = arith.constant 0 : i32
    %c0_i32_1 = arith.constant 0 : i32
    return %arg1, %c0_i32, %c0_i32_0 : i32, i32, i32
  }
  func.func @transform_16(%arg0: i32, %arg1: i32) -> (i32, i32, i32) {
    %c0_i32 = arith.constant 0 : i32
    %c0_i32_0 = arith.constant 0 : i32
    %c0_i32_1 = arith.constant 0 : i32
    return %arg1, %c0_i32, %c0_i32_0 : i32, i32, i32
  }
  func.func @transform_17(%arg0: i32, %arg1: i32) -> (i32, i32, i32) {
    %c0_i32 = arith.constant 0 : i32
    %c0_i32_0 = arith.constant 0 : i32
    %c0_i32_1 = arith.constant 0 : i32
    return %arg1, %c0_i32, %c0_i32_0 : i32, i32, i32
  }
  func.func @transform_18(%arg0: i32, %arg1: i32) -> (i32, i32, i32) {
    %c0_i32 = arith.constant 0 : i32
    %c0_i32_0 = arith.constant 0 : i32
    %c0_i32_1 = arith.constant 0 : i32
    return %arg1, %c0_i32, %c0_i32_0 : i32, i32, i32
  }
  func.func @transform_19(%arg0: i32, %arg1: i32) -> (i32, i32) {
    %c0_i32 = arith.constant 0 : i32
    %c0_i32_0 = arith.constant 0 : i32
    %c0_i32_1 = arith.constant 0 : i32
    return %c0_i32, %c0_i32_0 : i32, i32
  }
  func.func @transform_20(%arg0: i32, %arg1: i32) -> (i32, i32) {
    %c0_i32 = arith.constant 0 : i32
    %c0_i32_0 = arith.constant 0 : i32
    return %arg0, %c0_i32 : i32, i32
  }
}

</mosaic_0001>

<bundles_post_ra>
// kernel: decoder_forward.1
= control target key start
LH: loop header
LB: loop body
LE: loop exit
PB: predicated region body
PF: predicated region fallthrough
CT: control target
= control target key end

     0   :  { %s8909_s0 = inlined_call_operand.vmem [shape: f32[16,32], index: 0, kind: input, shape index: {}]   ;;  %s8910_s1 = inlined_call_operand.vmem [shape: f32[16,32], index: 1, kind: input, shape index: {}]   ;;  %s8911_s2 = inlined_call_operand.vmem [shape: f32[2,1,8], index: 2, kind: input, shape index: {}]   ;;  %s8912_s3 = inlined_call_operand.vmem [shape: f32[2,1,8], index: 3, kind: input, shape index: {}]   ;;  %s8913_s4 = inlined_call_operand.vmem [shape: f32[2,6,32], index: 4, kind: input, shape index: {}]   ;;  %s8914_s5 = inlined_call_operand.vmem [shape: f32[2,32,96], index: 5, kind: input, shape index: {}]   ;;  %s8915_s6 = inlined_call_operand.vmem [shape: f32[2,1,96], index: 6, kind: input, shape index: {}]   ;;  %s8916_s7 = inlined_call_operand.vmem [shape: f32[2,32,32], index: 7, kind: input, shape index: {}]   ;;  %s8917_s8 = inlined_call_operand.vmem [shape: f32[2,1,32], index: 8, kind: input, shape index: {}]   ;;  %s8918_s9 = inlined_call_operand.vmem [shape: f32[2,32,32], index: 9, kind: input, shape index: {}]   ;;  %s8919_s10 = inlined_call_operand.vmem [shape: f32[2,1,32], index: 10, kind: input, shape index: {}]   ;;  %s8920_s11 = inlined_call_operand.vmem [shape: f32[2,32,64], index: 11, kind: input, shape index: {}]   ;;  %s8921_s12 = inlined_call_operand.vmem [shape: f32[2,1,64], index: 12, kind: input, shape index: {}]   ;;  %s8922_s13 = inlined_call_operand.vmem [shape: f32[2,32,32], index: 13, kind: input, shape index: {}]   ;;  %s8923_s14 = inlined_call_operand.vmem [shape: f32[2,1,32], index: 14, kind: input, shape index: {}]   ;;  %s8924_s15 = inlined_call_operand.vmem [shape: f32[2,32,2048], index: 15, kind: input, shape index: {}]   ;;  %s8925_s16 = inlined_call_operand.vmem [shape: f32[2,1,2048], index: 16, kind: input, shape index: {}]   ;;  %s8926_s17 = inlined_call_operand.vmem [shape: f32[2,2048,32], index: 17, kind: input, shape index: {}]   ;;  %s8927_s18 = inlined_call_operand.vmem [shape: f32[2,1,32], index: 18, kind: input, shape index: {}]   ;;  %s8928_s19 = inlined_call_operand.vmem [shape: f32[2,32], index: 19, kind: input, shape index: {}]   ;;  %s8929_s20 = inlined_call_operand.hbm [shape: f32[16,32], index: 20, kind: output, shape index: {}]  }
   0x1   :  { %8944 = sst [smem:[#allocation9_spill]] %s8909_s0 }
   0x2   :  { %8945 = sst [smem:[#allocation10_spill]] %s8910_s1 }
   0x3   :  { %8946 = sst [smem:[#allocation11_spill]] %s8911_s2 }
   0x4   :  { %8947 = sst [smem:[#allocation12_spill]] %s8912_s3 }
   0x5   :  { %8948 = sst [smem:[#allocation13_spill]] %s8913_s4 }
   0x6   :  { %8949 = sst [smem:[#allocation14_spill]] %s8914_s5 }
   0x7   :  { %8950 = sst [smem:[#allocation15_spill]] %s8915_s6 }
   0x8   :  { %8951 = sst [smem:[#allocation16_spill]] %s8916_s7 }
   0x9   :  { %8952 = sst [smem:[#allocation17_spill]] %s8918_s9 }
   0xa   :  { %8953 = sst [smem:[#allocation18_spill]] %s8919_s10 }
   0xb   :  { %8954 = sst [smem:[#allocation19_spill]] %s8920_s11 }
   0xc   :  { %8955 = sst [smem:[#allocation20_spill]] %s8928_s19 }
   0xd   :  { %8956 = sst [smem:[#allocation21_spill]] %s8929_s20 }
   0xe   :  { %25 = vsyncpa [#allocation3], 0  ;;  %s7741_s1 = smov 0   ;;  %s7743_s22 = smov 0  }
   0xf   :  { %s7745_s23 = smov 0  }
  0x10 LB: > { %8957 = sst [smem:[#allocation5_spill]] %s7607_s1  ;;  %s40_s2 = sadd.s32 1, %s7611_s22  ;;  %s7615_s23 = sphi %s7745_s23, %s31_s23   ;;  %s7611_s22 = sphi %s7743_s22, %s8993_s22   ;;  %s7607_s1 = sphi %s7741_s1, %s8992_s1  }
  0x11   : > { %8958 = sst [smem:[#allocation6_spill]] %s7611_s22  ;;  %p41_p0 = scmp.ge.s32.totalorder %s40_s2, 2 }
  0x12   : > { %8959 = sst [smem:[#allocation7_spill]] %s7615_s23  ;;  %p6330_p1 = scmp.ge.s32.totalorder %s7615_s23, 1 }
  0x13   : > { %p743_p2 = scmp.lt.s32.totalorder %s7615_s23, 3  ;;  %s8995_s2 = smov (%p41_p0, %s40_s2), 0 }
  0x14   : > { %8960 = sst [smem:[#allocation8_spill]] %s8995_s2 }
  0x15   : > { %p744_p3 = pnand %p6330_p1, %p743_p2 }
  0x16   : > { %p892_p4 = scmp.lt.s32.totalorder (!%p744_p3), %s7607_s1, 1  ;;  %s8961_s4 = sld [smem:[#allocation13_spill]] (!%p744_p3) }
  0x17   : > { %747 = sbr.rel (%p744_p3) target bundleno = 7926 (0x1ef6), region = 100  ;;  %s8962_s5 = sld [smem:[#allocation14_spill]] (!%p744_p3) }
  0x18   : > { %s8964_s7 = sld [smem:[#allocation16_spill]] (!%p744_p3)  ;;  %s8965_s9 = sld [smem:[#allocation17_spill]] (!%p744_p3) }
  0x19   : > { %s8967_s11 = sld [smem:[#allocation19_spill]] (!%p744_p3) }
  0x1e   : > { %s7764_s25 = scalar_select %p892_p4, %s7607_s1, 1 }
  0x20   : > { %s6331_s3 = sshll.u32 %s7764_s25, 3  ;;  %s6437_s26 = sshll.u32 %s7764_s25, 5 }
  0x21   : > { %s7771_s29 = scalar_lea.vmem %s8961_s4, %s6331_s3  ;;  %s7776_s21 = scalar_lea.vmem %s8962_s5, %s6437_s26 }
  0x22   : > { %s7785_s19 = scalar_lea.vmem %s8964_s7, %s6437_s26  ;;  %s7794_s30 = scalar_lea.vmem %s8965_s9, %s6437_s26 }
  0x23   : > { %s7803_s6 = scalar_lea.vmem %s8967_s11, %s6437_s26  ;;  %s7812_s3 = scalar_lea.vmem %s8922_s13, %s6437_s26 }
  0x24   : > { %s6442_s5 = sshll.u32 %s7764_s25, 9  ;;  %s6344_s2 = sshll.u32 %s7764_s25, 4 }
  0x25   : > { %s7822_s22 = scalar_lea.vmem %s8924_s15, %s6442_s5  ;;  %s7828_s20 = scalar_lea.vmem %s8925_s16, %s6344_s2 }
  0x26   : > { %s6443_s23 = sshll.u32 %s7764_s25, 11  ;;  %s8968_s7 = sld [smem:[#allocation5_spill]] }
  0x27   : > { %s7834_s27 = scalar_lea.vmem %s8926_s17, %s6443_s23 }
  0x2c   : > { %p6347_p5 = scmp.ne.s32.totalorder %s8968_s7, 0 }
  0x2d   : > { %s8969_s0 = sld [smem:[#allocation9_spill]] (!%p6347_p5)  ;;  %vm960_vm0 = vcmask (!%p6347_p5), 261120  }
  0x2e   : > { %957 = sbr.rel (%p6347_p5) target bundleno = 53 (0x35), region = 104 }
  0x33   : > { %v958_v0 = vld [vmem:[%s8969_s0] sm:$0xff] (!%p6347_p5)  ;;  %v959_v1 = vld [vmem:[%s8969_s0 + $0x8] sm:$0xff] (!%p6347_p5) }
  0x34   : > { %961 = vst.msk [vmem:[#allocation2] sm:$0xff] (!%p6347_p5), %vm960_vm0, %v958_v0  ;;  %962 = vst.msk [vmem:[#allocation2 + $0x8] sm:$0xff] (!%p6347_p5), %vm960_vm0, %v959_v1 }
  0x35 PF: > { %vm972_vm1 = vcmask 261120   ;;  %v1026_v16 = vld [vmem:[%s7776_s21] sm:$0xff]  ;;  %v1027_v17 = vld [vmem:[%s7776_s21 + $0x8] sm:$0xff]  ;;  %v1028_v18 = vld [vmem:[%s7776_s21 + $0x10] sm:$0xff]  ;;  %v966_v27 = vlaneseq  ;;  %v7617_v53 = vmov 0.0   ;;  %vm7618_vm6 = vmmov 0   ;;  %s8973_s9 = scalar_lea.vmem %s8917_s8, %s7764_s25 }
  0x36   : > { %v7057_v19 = vpack.c.bf16 %v1027_v17, %v1026_v16  ;;  %v1029_v20 = vld [vmem:[%s7776_s21 + $0x18] sm:$0xff]  ;;  %v7869_v40 = vld [vmem:[%s7771_s29] sm:$0x3f]  ;;  %6853 = vmatprep.subr.mxu1 %v7617_v53  ;;  %6855 = vmatprep.mubr.msk.f32.mxu1 %vm7618_vm6, %v7617_v53  ;;  %s8970_s2 = sld [smem:[#allocation15_spill]]  ;;  %s7619_s1 = smov 96   ;;  %vm1137_vm7 = vcmask 64512  }
  0x37   : > { %v7061_v21 = vpack.c.bf16 %v1029_v20, %v1028_v18  ;;  %v7863_v32 = vshrl.u32 %v966_v27, 7  ;;  %v969_v61 = vand.u32 127, %v966_v27  ;;  %v7620_v62 = vmov -1e+09   ;;  %s8972_s4 = sld [smem:[#allocation11_spill]]  ;;  %s7621_s10 = smov 64  }
  0x38   : > { %7058 = vmatprep.subr.bf16.mxu0 %v7057_v19  ;;  %s7622_s11 = smov 88   ;;  %s7623_s7 = smov 120   ;;  %vm2482_vm9 = vcmask 195584   ;;  %vm2479_vm10 = vcmask 130048  }
  0x39   : > { %7060 = vmatpush3.bf16.msra.mxu0 %v7057_v19  ;;  %v7866_v38 = vsub.s32 0, %v7863_v32  ;;  %v7874_v43 = vsub.s32 1, %v7863_v32  ;;  %vm970_vm8 = vcmp.ge.s32.totalorder %v7863_v32, %v969_v61  ;;  %s7624_s21 = smov 56   ;;  %s7627_s26 = smov 48  }
  0x3a   : > { %7062 = vmatprep.subr.bf16.mxu0 %v7061_v21  ;;  %v971_v63 = vsel %vm970_vm8, 0.0, %v7620_v62  ;;  %s7628_s28 = smov 72   ;;  %s7629_s24 = smov 104  }
  0x3b   : > { %v7847_v2 = vld [vmem:[#allocation2] sm:$0xff]  ;;  %v7849_v3 = vld [vmem:[#allocation2 + $0x8] sm:$0xff]  ;;  %v997_v42 = vrot.slane %v7869_v40, %v7866_v38  ;;  %v1023_v45 = vrot.slane %v7869_v40, %v7874_v43  ;;  %s7630_s5 = smov 40  }
  0x3c   : > { %v973_v4 = vsel %vm972_vm1, %v7847_v2, 0.0  ;;  %v976_v5 = vsel %vm972_vm1, %v7849_v3, 0.0  ;;  %s8971_s23 = scalar_lea.vmem %s8970_s2, %s7764_s25  ;;  %s7625_s2 = smov 80  }
  0x3d   : > { %974 = vadd.xlane.f32.xlu0 %v973_v4  ;;  %7064 = vmatpush3.bf16.msra.mxu0 %v7061_v21  ;;  %v6348_v54 = vld [vmem:[%s8971_s23] ss:$0 sm:$0xff]  ;;  %v6352_v4 = vld [vmem:[%s8972_s4 + $0x1] ss:$0 sm:$0xff]  ;;  %s7626_s23 = smov 112  }
  0x3e   : > { %6873 = vmatprep.subr.mxu0 %v7617_v53  ;;  %v6351_v0 = vld [vmem:[%s8972_s4] ss:$0 sm:$0xff] }
  0x3f   : > { %v7915_v1 = vadd.f32 %v6351_v0, %v971_v63 }
  0x41   : > { %977 = vadd.xlane.f32.xlu0 %v976_v5 }
  0xca   : > { %v975_v6 = vpop.xlane.xlu0 %974 }
  0xcb   : > { %v980_v7 = vmul.f32 0.03125, %v975_v6 }
  0xcd   : > { %v982_v8 = vsub.f32 %v7847_v2, %v980_v7 }
  0xce   : > { %v978_v9 = vpop.xlane.xlu0 %977 }
  0xcf   : > { %v981_v10 = vmul.f32 0.03125, %v978_v9  ;;  %v984_v11 = vmul.f32 %v982_v8, %v982_v8  ;;  %v998_v44 = vmul.f32 %v997_v42, %v982_v8  ;;  %v7921_v8 = vadd.f32 %v6352_v4, %v971_v63 }
  0xd1   : > { %v983_v12 = vsub.f32 %v7849_v3, %v981_v10  ;;  %v986_v13 = vsel %vm972_vm1, %v984_v11, 0.0 }
  0xd2   : > { %987 = vadd.xlane.f32.xlu1 %v986_v13 }
  0xd3   : > { %v985_v14 = vmul.f32 %v983_v12, %v983_v12  ;;  %v999_v48 = vmul.f32 %v997_v42, %v983_v12 }
  0xd5   : > { %v989_v15 = vsel %vm972_vm1, %v985_v14, 0.0 }
  0xd6   : > { %990 = vadd.xlane.f32.xlu1 %v989_v15 }
 0x15f   : > { %v988_v22 = vpop.xlane.xlu1 %987 }
 0x160   : > { %v992_v23 = vmul.f32 0.032258064, %v988_v22 }
 0x162   : > { %7466 = vrsqrt.f32 %v992_v23  ;;  %vm1002_vm2 = vcmp.eq.f32.partialorder %v992_v23, inf  ;;  %v1005_v29 = vand.u32 2147483648, %v992_v23  ;;  %vm1004_vm3 = vcmp.eq.f32.partialorder %v992_v23, 0.0 }
 0x163   : > { %v991_v24 = vpop.xlane.xlu1 %990 }
 0x164   : > { %v993_v25 = vmul.f32 0.032258064, %v991_v24 }
 0x166   : > { %7468 = vrsqrt.f32 %v993_v25  ;;  %vm1009_vm4 = vcmp.eq.f32.partialorder %v993_v25, inf  ;;  %v1012_v36 = vand.u32 2147483648, %v993_v25  ;;  %vm1011_vm5 = vcmp.eq.f32.partialorder %v993_v25, 0.0 }
 0x16c   : > { %v7467_v26 = vpop.eup %7466 }
 0x16d   : > { %v1001_v28 = vmul.f32 %v7467_v26, %v992_v23 }
 0x16f   : > { %v1003_v30 = vsel %vm1002_vm2, %v992_v23, %v1001_v28 }
 0x170   : > { %v7469_v31 = vpop.eup %7468  ;;  %v1006_v33 = vsel %vm1004_vm3, %v1005_v29, %v1003_v30 }
 0x171   : > { %v1008_v34 = vmul.f32 %v7469_v31, %v993_v25  ;;  %v1014_v35 = vadd.f32 1e-06, %v1006_v33 }
 0x173   : > { %v1010_v37 = vsel %vm1009_vm4, %v993_v25, %v1008_v34  ;;  %7470 = vrcp.f32 %v1014_v35 }
 0x174   : > { %v1013_v39 = vsel %vm1011_vm5, %v1012_v36, %v1010_v37 }
 0x175   : > { %v1015_v41 = vadd.f32 1e-06, %v1013_v39 }
 0x177   : > { %7472 = vrcp.f32 %v1015_v41 }
 0x17d   : > { %v7471_v46 = vpop.eup %7470 }
 0x17e   : > { %v1017_v47 = vmul.f32 %v7471_v46, %v998_v44 }
 0x180   : > { %v1024_v49 = vadd.f32 %v1023_v45, %v1017_v47 }
 0x181   : > { %v7473_v50 = vpop.eup %7472 }
 0x182   : > { %v1019_v51 = vmul.f32 %v7473_v50, %v999_v48  ;;  %6850 = vmatprep.mubr.msk.f32.mxu0 %vm972_vm1, %v1024_v49 }
 0x184   : > { %v1025_v52 = vadd.f32 %v1023_v45, %v1019_v51 }
 0x186   : > { %6851 = vmatmul.mubr.msk.f32.vlgmr.msra.gmra.mrb[0].mxu0 %vm972_vm1, %v1025_v52 }
 0x187   : > { %6875 = vmatprep.mubr.msk.f32.mxu0 %vm7618_vm6, %v7617_v53 }
 0x259   : > { %v6852_v55 = vpop.f32.mrb[0].mxu0 }
 0x25a   : > { %v7891_v56 = vadd.f32 %v6852_v55, %v6348_v54  ;;  %v1109_v57 = vpop.f32.mrb[1].mxu0 }
 0x25b   : > { %v7893_v58 = vadd.f32 %v6348_v54, %v1109_v57 }
 0x25c   : > { %1213 = vrot.lane.b32.xlu1 %v7891_v56, %s7619_s1 }
 0x25d   : > { %1135 = vrot.lane.b32.xlu0 %v7893_v58, %s7619_s1 }
 0x2ce   : > { %v1214_v60 = vpop.permute.xlu1 %1213 }
 0x2cf   : > { %v1136_v59 = vpop.permute.xlu0 %1135 }
 0x2d0   : > { %6854 = vmatpush3.xpose.msk.msra.mxu1 %vm1137_vm7, %v1136_v59 }
 0x2d1   : > { %6858 = vmatprep.subr.mxu1 %v7617_v53 }
 0x2d3   : > { %6856 = vmatmul.mubr.msk.f32.vlgmr.msra.gmra.mrb[0].mxu1 %vm1137_vm7, %v7893_v58 }
 0x2d4   : > { %6859 = vmatpush3.xpose.msk.msra.mxu1 %vm1137_vm7, %v1214_v60  ;;  %6860 = vmatprep.mubr.msk.f32.mxu1 %vm7618_vm6, %v7617_v53 }
 0x2d5   : > { %6863 = vmatprep.subr.mxu1 %v7617_v53 }
 0x2d7   : > { %6861 = vmatmul.mubr.msk.f32.vlgmr.msra.gmra.mrb[2].mxu1 %vm1137_vm7, %v7891_v56 }
 0x2d8   : > { %6865 = vmatprep.mubr.msk.f32.mxu1 %vm7618_vm6, %v7617_v53 }
 0x3a6   : > { %v1208_v5 = vpop.f32.mrb[0].mxu1 }
 0x3a7   : > { %v1209_v6 = vadd.f32 %v1208_v5, %v7915_v1  ;;  %v6857_v7 = vpop.f32.mrb[1].mxu1 }
 0x3a9   : > { %v1289_v9 = vsel %vm1137_vm7, %v1209_v6, -inf }
 0x3aa   : > { %1290 = vmax.xlane.f32.xlu1 %v1289_v9  ;;  %v1285_v10 = vpop.f32.mrb[2].mxu1 }
 0x3ab   : > { %v1286_v11 = vadd.f32 %v1285_v10, %v7921_v8  ;;  %v6862_v12 = vpop.f32.mrb[3].mxu1 }
 0x3ad   : > { %v1292_v13 = vsel %vm1137_vm7, %v1286_v11, -inf }
 0x3ae   : > { %1293 = vmax.xlane.f32.xlu0 %v1292_v13 }
 0x3bb   : > { %1387 = vrot.lane.b32.xlu1 %v7891_v56, %s7621_s10 }
 0x3bf   : > { %1465 = vrot.lane.b32.xlu1 %v7893_v58, %s7622_s11 }
 0x3c3   : > { %1543 = vrot.lane.b32.xlu1 %v7891_v56, %s7622_s11 }
 0x437   : > { %v1291_v14 = vpop.xlane.xlu1 %1290 }
 0x438   : > { %v1295_v15 = vsub.f32 %v1209_v6, %v1291_v14 }
 0x43a   : > { %v1297_v16 = vmul.f32 1.442695, %v1295_v15 }
 0x43b   : > { %v1388_v17 = vpop.permute.xlu1 %1387  ;;  %v1294_v18 = vpop.xlane.xlu0 %1293 }
 0x43c   : > { %7474 = vpow2.f32 %v1297_v16  ;;  %v1296_v19 = vsub.f32 %v1286_v11, %v1294_v18 }
 0x43e   : > { %v1299_v20 = vmul.f32 1.442695, %v1296_v19 }
 0x43f   : > { %v1466_v21 = vpop.permute.xlu1 %1465 }
 0x440   : > { %7476 = vpow2.f32 %v1299_v20  ;;  %6874 = vmatpush3.xpose.msk.msra.mxu0 %vm1137_vm7, %v1466_v21 }
 0x441   : > { %6883 = vmatprep.subr.mxu0 %v7617_v53 }
 0x443   : > { %v1544_v26 = vpop.permute.xlu1 %1543 }
 0x446   : > { %v7475_v22 = vpop.eup %7474 }
 0x447   : > { %v1301_v23 = vsel %vm1137_vm7, %v7475_v22, 0.0 }
 0x448   : > { %1302 = vadd.xlane.f32.xlu0 %v1301_v23 }
 0x44a   : > { %v7477_v24 = vpop.eup %7476 }
 0x44b   : > { %v1304_v25 = vsel %vm1137_vm7, %v7477_v24, 0.0 }
 0x44c   : > { %1305 = vadd.xlane.f32.xlu1 %v1304_v25 }
 0x45d   : > { %1541 = vrot.lane.b32.xlu1 %v7891_v56, %s7623_s7 }
 0x45e   : > { %1311 = vrot.lane.b32.xlu0 %v7893_v58, %s7621_s10  ;;  %s8942_s10 = smov 8  }
 0x462   : > { %1463 = vrot.lane.b32.xlu0 %v7893_v58, %s7623_s7 }
 0x4d5   : > { %v1303_v27 = vpop.xlane.xlu0 %1302 }
 0x4d6   : > { %7478 = vrcp.f32 %v1303_v27 }
 0x4d9   : > { %v1306_v28 = vpop.xlane.xlu1 %1305  ;;  %v1312_v29 = vpop.permute.xlu0 %1311 }
 0x4da   : > { %7480 = vrcp.f32 %v1306_v28  ;;  %6864 = vmatpush3.msra.mxu1 %v1312_v29 }
 0x4db   : > { %6868 = vmatprep.subr.mxu1 %v7617_v53 }
 0x4dd   : > { %v1464_v30 = vpop.permute.xlu0 %1463  ;;  %v1542_v36 = vpop.permute.xlu1 %1541 }
 0x4de   : > { %6876 = vmatmul.mubr.msk.f32.vlgmr.msra.gmra.mrb[2].mxu0 %vm1137_vm7, %v1464_v30 }
 0x4df   : > { %6885 = vmatprep.mubr.msk.f32.mxu0 %vm7618_vm6, %v7617_v53 }
 0x4e0   : > { %v7479_v31 = vpop.eup %7478 }
 0x4e1   : > { %v1309_v33 = vmul.f32 %v7479_v31, %v7475_v22 }
 0x4e3   : > { %6866 = vmatmul.mubr.msk.f32.vlgmr.msra.gmra.mrb[4].mxu1 %vm1137_vm7, %v1309_v33 }
 0x4e4   : > { %v7481_v34 = vpop.eup %7480  ;;  %6869 = vmatpush3.msra.mxu1 %v1388_v17  ;;  %6870 = vmatprep.mubr.msk.f32.mxu1 %vm7618_vm6, %v7617_v53 }
 0x4e5   : > { %v1310_v35 = vmul.f32 %v7481_v34, %v7477_v24  ;;  %6878 = vmatprep.subr.mxu1 %v7617_v53 }
 0x4e7   : > { %6871 = vmatmul.mubr.msk.f32.vlgmr.msra.gmra.mrb[6].mxu1 %vm1137_vm7, %v1310_v35 }
 0x4e8   : > { %6880 = vmatprep.mubr.msk.f32.mxu1 %vm7618_vm6, %v7617_v53 }
 0x4eb   : > { %6879 = vmatpush3.xpose.msk.msra.mxu1 %vm1137_vm7, %v1544_v26 }
 0x4ec   : > { %6888 = vmatprep.subr.mxu1 %v7617_v53 }
 0x4ee   : > { %6881 = vmatmul.mubr.msk.f32.vlgmr.msra.gmra.mrb[8].mxu1 %vm1137_vm7, %v1542_v36 }
 0x4ef   : > { %6890 = vmatprep.mubr.msk.f32.mxu1 %vm7618_vm6, %v7617_v53 }
 0x5b1   : > { %v1537_v37 = vpop.f32.mrb[2].mxu0 }
 0x5b2   : > { %v1538_v39 = vadd.f32 %v1537_v37, %v7915_v1  ;;  %v6877_v41 = vpop.f32.mrb[3].mxu0 }
 0x5b4   : > { %v1619_v42 = vsel %vm1137_vm7, %v1538_v39, -inf }
 0x5b5   : > { %1620 = vmax.xlane.f32.xlu0 %v1619_v42 }
 0x5b6   : > { %v7958_v44 = vpop.f32.mrb[4].mxu1 }
 0x5b7   : > { %v6867_v45 = vpop.f32.mrb[5].mxu1 }
 0x5ba   : > { %v7960_v46 = vpop.f32.mrb[6].mxu1 }
 0x5bb   : > { %v6872_v47 = vpop.f32.mrb[7].mxu1 }
 0x5c1   : > { %v1615_v48 = vpop.f32.mrb[8].mxu1 }
 0x5c2   : > { %v1616_v49 = vadd.f32 %v1615_v48, %v7921_v8  ;;  %v6882_v50 = vpop.f32.mrb[9].mxu1 }
 0x5c4   : > { %v1622_v51 = vsel %vm1137_vm7, %v1616_v49, -inf }
 0x5c5   : > { %1623 = vmax.xlane.f32.xlu1 %v1622_v51 }
 0x5d6   : > { %1717 = vrot.lane.b32.xlu1 %v7891_v56, %s7624_s21 }
 0x5da   : > { %1795 = vrot.lane.b32.xlu1 %v7893_v58, %s7625_s2 }
 0x5de   : > { %1873 = vrot.lane.b32.xlu1 %v7891_v56, %s7625_s2 }
 0x5e2   : > { %1871 = vrot.lane.b32.xlu1 %v7891_v56, %s7626_s23 }
 0x642   : > { %v1621_v52 = vpop.xlane.xlu0 %1620 }
 0x643   : > { %v1625_v54 = vsub.f32 %v1538_v39, %v1621_v52 }
 0x645   : > { %v1627_v55 = vmul.f32 1.442695, %v1625_v54 }
 0x647   : > { %7482 = vpow2.f32 %v1627_v55 }
 0x651   : > { %v7483_v57 = vpop.eup %7482 }
 0x652   : > { %v1624_v59 = vpop.xlane.xlu1 %1623  ;;  %v1631_v60 = vsel %vm1137_vm7, %v7483_v57, 0.0 }
 0x653   : > { %1632 = vadd.xlane.f32.xlu0 %v1631_v60  ;;  %v1626_v62 = vsub.f32 %v1616_v49, %v1624_v59 }
 0x655   : > { %v1629_v63 = vmul.f32 1.442695, %v1626_v62 }
 0x656   : > { %v1718_v61 = vpop.permute.xlu1 %1717 }
 0x657   : > { %6889 = vmatpush3.msra.mxu1 %v1718_v61  ;;  %7484 = vpow2.f32 %v1629_v63 }
 0x658   : > { %6898 = vmatprep.subr.mxu1 %v7617_v53 }
 0x65a   : > { %v1796_v10 = vpop.permute.xlu1 %1795 }
 0x65e   : > { %v1874_v14 = vpop.permute.xlu1 %1873 }
 0x661   : > { %v7485_v0 = vpop.eup %7484 }
 0x662   : > { %v1634_v4 = vsel %vm1137_vm7, %v7485_v0, 0.0  ;;  %v1872_v16 = vpop.permute.xlu1 %1871 }
 0x669   : > { %1641 = vrot.lane.b32.xlu0 %v7893_v58, %s7624_s21  ;;  %s8940_s21 = smov 16  }
 0x688   : > { %1635 = vadd.xlane.f32.xlu0 %v1634_v4 }
 0x69e   : > { %1793 = vrot.lane.b32.xlu0 %v7893_v58, %s7626_s23 }
 0x6e0   : > { %v1633_v5 = vpop.xlane.xlu0 %1632 }
 0x6e1   : > { %7486 = vrcp.f32 %v1633_v5 }
 0x6e4   : > { %v1642_v6 = vpop.permute.xlu0 %1641 }
 0x6e5   : > { %6884 = vmatpush3.msra.mxu0 %v1642_v6 }
 0x6e6   : > { %6893 = vmatprep.subr.mxu0 %v7617_v53 }
 0x6eb   : > { %v7487_v7 = vpop.eup %7486 }
 0x6ec   : > { %v1639_v9 = vmul.f32 %v7487_v7, %v7483_v57 }
 0x6ee   : > { %6886 = vmatmul.mubr.msk.f32.vlgmr.msra.gmra.mrb[4].mxu0 %vm1137_vm7, %v1639_v9 }
 0x6ef   : > { %6894 = vmatpush3.xpose.msk.msra.mxu0 %vm1137_vm7, %v1796_v10  ;;  %6895 = vmatprep.mubr.msk.f32.mxu0 %vm7618_vm6, %v7617_v53 }
 0x6f0   : > { %6903 = vmatprep.subr.mxu0 %v7617_v53 }
 0x715   : > { %v1636_v11 = vpop.xlane.xlu0 %1635 }
 0x716   : > { %7488 = vrcp.f32 %v1636_v11 }
 0x719   : > { %v1794_v12 = vpop.permute.xlu0 %1793 }
 0x71a   : > { %6896 = vmatmul.mubr.msk.f32.vlgmr.msra.gmra.mrb[6].mxu0 %vm1137_vm7, %v1794_v12 }
 0x71b   : > { %6905 = vmatprep.mubr.msk.f32.mxu0 %vm7618_vm6, %v7617_v53 }
 0x720   : > { %v7489_v13 = vpop.eup %7488 }
 0x721   : > { %v1640_v15 = vmul.f32 %v7489_v13, %v7485_v0 }
 0x723   : > { %6891 = vmatmul.mubr.msk.f32.vlgmr.msra.gmra.mrb[10].mxu1 %vm1137_vm7, %v1640_v15 }
 0x724   : > { %6899 = vmatpush3.xpose.msk.msra.mxu1 %vm1137_vm7, %v1874_v14  ;;  %6900 = vmatprep.mubr.msk.f32.mxu1 %vm7618_vm6, %v7617_v53 }
 0x725   : > { %6908 = vmatprep.subr.mxu1 %v7617_v53 }
 0x727   : > { %6901 = vmatmul.mubr.msk.f32.vlgmr.msra.gmra.mrb[12].mxu1 %vm1137_vm7, %v1872_v16 }
 0x728   : > { %6910 = vmatprep.mubr.msk.f32.mxu1 %vm7618_vm6, %v7617_v53 }
 0x7c1   : > { %v7994_v17 = vpop.f32.mrb[4].mxu0 }
 0x7c2   : > { %v6887_v18 = vpop.f32.mrb[5].mxu0 }
 0x7ed   : > { %v1867_v19 = vpop.f32.mrb[6].mxu0 }
 0x7ee   : > { %v1868_v20 = vadd.f32 %v1867_v19, %v7915_v1  ;;  %v6897_v21 = vpop.f32.mrb[7].mxu0 }
 0x7f0   : > { %v1949_v22 = vsel %vm1137_vm7, %v1868_v20, -inf }
 0x7f1   : > { %1950 = vmax.xlane.f32.xlu0 %v1949_v22 }
 0x7f6   : > { %v7998_v23 = vpop.f32.mrb[10].mxu1 }
 0x7f7   : > { %v6892_v24 = vpop.f32.mrb[11].mxu1 }
 0x7fa   : > { %v1945_v25 = vpop.f32.mrb[12].mxu1 }
 0x7fb   : > { %v1946_v26 = vadd.f32 %v1945_v25, %v7921_v8  ;;  %v6902_v27 = vpop.f32.mrb[13].mxu1 }
 0x7fc   : > { %v2485_v27 = vld [vmem:[%s7785_s19] sm:$0xff] }
 0x7fd   : > { %v1952_v28 = vsel %vm1137_vm7, %v1946_v26, -inf }
 0x7fe   : > { %1953 = vmax.xlane.f32.xlu1 %v1952_v28 }
 0x80f   : > { %2047 = vrot.lane.b32.xlu1 %v7891_v56, %s7627_s26 }
 0x813   : > { %2125 = vrot.lane.b32.xlu1 %v7893_v58, %s7628_s28 }
 0x817   : > { %2203 = vrot.lane.b32.xlu1 %v7891_v56, %s7628_s28 }
 0x81b   : > { %2201 = vrot.lane.b32.xlu1 %v7891_v56, %s7629_s24 }
 0x87e   : > { %v1951_v29 = vpop.xlane.xlu0 %1950 }
 0x87f   : > { %v1955_v30 = vsub.f32 %v1868_v20, %v1951_v29  ;;  %v2487_v29 = vld [vmem:[%s7785_s19 + $0x10] sm:$0xff] }
 0x881   : > { %v1957_v31 = vmul.f32 1.442695, %v1955_v30  ;;  %v2488_v30 = vld [vmem:[%s7785_s19 + $0x18] sm:$0xff] }
 0x883   : > { %7490 = vpow2.f32 %v1957_v31  ;;  %v7069_v31 = vpack.c.bf16 %v2488_v30, %v2487_v29 }
 0x88b   : > { %v1954_v33 = vpop.xlane.xlu1 %1953 }
 0x88c   : > { %v1956_v37 = vsub.f32 %v1946_v26, %v1954_v33 }
 0x88d   : > { %v7491_v34 = vpop.eup %7490 }
 0x88e   : > { %v1961_v35 = vsel %vm1137_vm7, %v7491_v34, 0.0  ;;  %v1959_v39 = vmul.f32 1.442695, %v1956_v37 }
 0x88f   : > { %1962 = vadd.xlane.f32.xlu0 %v1961_v35  ;;  %v2048_v36 = vpop.permute.xlu1 %2047 }
 0x890   : > { %6909 = vmatpush3.msra.mxu1 %v2048_v36  ;;  %7492 = vpow2.f32 %v1959_v39 }
 0x891   : > { %6918 = vmatprep.subr.mxu1 %v7617_v53 }
 0x893   : > { %v2126_v50 = vpop.permute.xlu1 %2125 }
 0x897   : > { %v2204_v55 = vpop.permute.xlu1 %2203 }
 0x89a   : > { %v7493_v41 = vpop.eup %7492 }
 0x89b   : > { %v1964_v42 = vsel %vm1137_vm7, %v7493_v41, 0.0  ;;  %v2202_v59 = vpop.permute.xlu1 %2201 }
 0x8a5   : > { %1971 = vrot.lane.b32.xlu0 %v7893_v58, %s7627_s26  ;;  %s8938_s26 = smov 24  }
 0x8c4   : > { %1965 = vadd.xlane.f32.xlu0 %v1964_v42 }
 0x8da   : > { %2123 = vrot.lane.b32.xlu0 %v7893_v58, %s7629_s24 }
 0x91c   : > { %v1963_v45 = vpop.xlane.xlu0 %1962 }
 0x91d   : > { %7494 = vrcp.f32 %v1963_v45 }
 0x920   : > { %v1972_v47 = vpop.permute.xlu0 %1971 }
 0x921   : > { %6904 = vmatpush3.msra.mxu0 %v1972_v47 }
 0x922   : > { %6913 = vmatprep.subr.mxu0 %v7617_v53 }
 0x927   : > { %v7495_v48 = vpop.eup %7494 }
 0x928   : > { %v1969_v49 = vmul.f32 %v7495_v48, %v7491_v34 }
 0x92a   : > { %6906 = vmatmul.mubr.msk.f32.vlgmr.msra.gmra.mrb[8].mxu0 %vm1137_vm7, %v1969_v49 }
 0x92b   : > { %6914 = vmatpush3.xpose.msk.msra.mxu0 %vm1137_vm7, %v2126_v50  ;;  %6915 = vmatprep.mubr.msk.f32.mxu0 %vm7618_vm6, %v7617_v53 }
 0x92c   : > { %6923 = vmatprep.subr.mxu0 %v7617_v53 }
 0x951   : > { %v1966_v51 = vpop.xlane.xlu0 %1965 }
 0x952   : > { %7496 = vrcp.f32 %v1966_v51 }
 0x955   : > { %v2124_v52 = vpop.permute.xlu0 %2123 }
 0x956   : > { %6916 = vmatmul.mubr.msk.f32.vlgmr.msra.gmra.mrb[10].mxu0 %vm1137_vm7, %v2124_v52 }
 0x957   : > { %6925 = vmatprep.mubr.msk.f32.mxu0 %vm7618_vm6, %v7617_v53 }
 0x95c   : > { %v7497_v54 = vpop.eup %7496 }
 0x95d   : > { %v1970_v57 = vmul.f32 %v7497_v54, %v7493_v41 }
 0x95f   : > { %6911 = vmatmul.mubr.msk.f32.vlgmr.msra.gmra.mrb[14].mxu1 %vm1137_vm7, %v1970_v57 }
 0x960   : > { %6919 = vmatpush3.xpose.msk.msra.mxu1 %vm1137_vm7, %v2204_v55  ;;  %6920 = vmatprep.mubr.msk.f32.mxu1 %vm7618_vm6, %v7617_v53  ;;  %v6379_v55 = vld [vmem:[%s8973_s9] ss:$0 sm:$0xff]  ;;  %s8975_s9 = scalar_lea.vmem %s8921_s12, %s7764_s25 }
 0x961   : > { %6928 = vmatprep.subr.mxu1 %v7617_v53 }
 0x963   : > { %6921 = vmatmul.mubr.msk.f32.vlgmr.msra.gmra.mrb[16].mxu1 %vm1137_vm7, %v2202_v59 }
 0x964   : > { %6930 = vmatprep.mubr.msk.f32.mxu1 %vm7618_vm6, %v7617_v53 }
 0x9fd   : > { %v2043_v60 = vpop.f32.mrb[8].mxu0 }
 0x9fe   : > { %v6907_v61 = vpop.f32.mrb[9].mxu0 }
 0xa29   : > { %v2197_v62 = vpop.f32.mrb[10].mxu0 }
 0xa2a   : > { %v2198_v63 = vadd.f32 %v2197_v62, %v7915_v1  ;;  %v6917_v0 = vpop.f32.mrb[11].mxu0 }
 0xa2c   : > { %v2279_v4 = vsel %vm1137_vm7, %v2198_v63, -inf }
 0xa2d   : > { %2280 = vmax.xlane.f32.xlu0 %v2279_v4 }
 0xa32   : > { %v2119_v5 = vpop.f32.mrb[14].mxu1 }
 0xa33   : > { %v6912_v6 = vpop.f32.mrb[15].mxu1 }
 0xa36   : > { %v2275_v7 = vpop.f32.mrb[16].mxu1 }
 0xa37   : > { %v2276_v9 = vadd.f32 %v2275_v7, %v7921_v8  ;;  %v6922_v10 = vpop.f32.mrb[17].mxu1 }
 0xa39   : > { %v2282_v11 = vsel %vm1137_vm7, %v2276_v9, -inf }
 0xa3a   : > { %2283 = vmax.xlane.f32.xlu1 %v2282_v11 }
 0xa4b   : > { %2377 = vrot.lane.b32.xlu1 %v7891_v56, %s7630_s5 }
 0xa4f   : > { %2455 = vrot.lane.b32.xlu1 %v7994_v17, %s8942_s10 }
 0xa53   : > { %2457 = vrot.lane.b32.xlu1 %v7998_v23, %s8942_s10 }
 0xa57   : > { %2465 = vrot.lane.b32.xlu1 %v2119_v5, %s8940_s21 }
 0xaba   : > { %v2281_v1 = vpop.xlane.xlu0 %2280 }
 0xabb   : > { %v2285_v12 = vsub.f32 %v2198_v63, %v2281_v1  ;;  %v2727_v1 = vld [vmem:[%s7803_s6] sm:$0xff] }
 0xabd   : > { %v2287_v8 = vmul.f32 1.442695, %v2285_v12  ;;  %v2728_v12 = vld [vmem:[%s7803_s6 + $0x8] sm:$0xff] }
 0xabf   : > { %7498 = vpow2.f32 %v2287_v8  ;;  %v2729_v8 = vld [vmem:[%s7803_s6 + $0x10] sm:$0xff] }
 0xac7   : > { %v2284_v13 = vpop.xlane.xlu1 %2283 }
 0xac8   : > { %v2286_v14 = vsub.f32 %v2276_v9, %v2284_v13  ;;  %v7081_v13 = vpack.c.bf16 %v2728_v12, %v2727_v1 }
 0xac9   : > { %v7499_v15 = vpop.eup %7498 }
 0xaca   : > { %v2289_v16 = vmul.f32 1.442695, %v2286_v14  ;;  %v2291_v56 = vsel %vm1137_vm7, %v7499_v15, 0.0  ;;  %v2730_v14 = vld [vmem:[%s7803_s6 + $0x18] sm:$0xff] }
 0xacb   : > { %2292 = vadd.xlane.f32.xlu0 %v2291_v56  ;;  %v2378_v18 = vpop.permute.xlu1 %2377  ;;  %v7085_v56 = vpack.c.bf16 %v2730_v14, %v2729_v8 }
 0xacc   : > { %7500 = vpow2.f32 %v2289_v16  ;;  %6929 = vmatpush3.msra.mxu1 %v2378_v18  ;;  %v2634_v16 = vld [vmem:[%s7794_s30 + $0x8] sm:$0xff] }
 0xacf   : > { %v2456_v37 = vpop.permute.xlu1 %2455 }
 0xad0   : > { %v2477_v42 = vsel %vm1137_vm7, %v7958_v44, %v2456_v37  ;;  %v8108_v37 = vsub.s32 2, %v7863_v32 }
 0xad3   : > { %v2458_v41 = vpop.permute.xlu1 %2457 }
 0xad4   : > { %v2478_v50 = vsel %vm1137_vm7, %v7960_v46, %v2458_v41 }
 0xad6   : > { %v7501_v17 = vpop.eup %7500 }
 0xad7   : > { %v2294_v19 = vsel %vm1137_vm7, %v7501_v17, 0.0  ;;  %v2466_v49 = vpop.permute.xlu1 %2465 }
 0xad8   : > { %2295 = vadd.xlane.f32.xlu0 %v2294_v19  ;;  %v2481_v51 = vsel %vm2479_vm10, %v2478_v50, %v2466_v49  ;;  %v2635_v19 = vld [vmem:[%s7794_s30 + $0x10] sm:$0xff] }
 0xaee   : > { %2301 = vrot.lane.b32.xlu0 %v7893_v58, %s7630_s5  ;;  %v2486_v58 = vld [vmem:[%s7785_s19 + $0x8] sm:$0xff]  ;;  %s8974_s5 = sld [smem:[#allocation10_spill]] }
 0xaef   : > { %v7065_v28 = vpack.c.bf16 %v2486_v58, %v2485_v27 }
 0xaf2   : > { %2463 = vrot.lane.b32.xlu0 %v2043_v60, %s8940_s21  ;;  %s8976_s21 = sld [smem:[#allocation18_spill]] }
 0xaf8   : > { %s8977_s10 = scalar_lea.vmem %s8976_s21, %s7764_s25 }
 0xb58   : > { %v2293_v20 = vpop.xlane.xlu0 %2292 }
 0xb59   : > { %7502 = vrcp.f32 %v2293_v20  ;;  %v2636_v20 = vld [vmem:[%s7794_s30 + $0x18] sm:$0xff] }
 0xb63   : > { %v7503_v22 = vpop.eup %7502 }
 0xb64   : > { %v2299_v23 = vmul.f32 %v7503_v22, %v7499_v15  ;;  %v2633_v15 = vld [vmem:[%s7794_s30] sm:$0xff]  ;;  %v2726_v22 = vld [vmem:[%s8974_s5 + $0x8] sm:$0xff]  ;;  %s8978_s30 = sld [smem:[#allocation12_spill]] }
 0xb65   : > { %v2296_v21 = vpop.xlane.xlu0 %2295  ;;  %v7073_v18 = vpack.c.bf16 %v2634_v16, %v2633_v15 }
 0xb66   : > { %7504 = vrcp.f32 %v2296_v21  ;;  %v7077_v21 = vpack.c.bf16 %v2636_v20, %v2635_v19 }
 0xb67   : > { %7074 = vmatprep.subr.bf16.mxu1 %v7073_v18 }
 0xb69   : > { %v2302_v24 = vpop.permute.xlu0 %2301 }
 0xb6a   : > { %6924 = vmatpush3.msra.mxu0 %v2302_v24 }
 0xb6b   : > { %6926 = vmatmul.mubr.msk.f32.vlgmr.msra.gmra.mrb[12].mxu0 %vm1137_vm7, %v2299_v23  ;;  %7066 = vmatprep.subr.bf16.mxu0 %v7065_v28 }
 0xb6c   : > { %7068 = vmatpush3.bf16.msra.mxu0 %v7065_v28 }
 0xb6d   : > { %7070 = vmatprep.subr.bf16.mxu0 %v7069_v31  ;;  %v2464_v39 = vpop.permute.xlu0 %2463 }
 0xb6e   : > { %v2480_v45 = vsel %vm2479_vm10, %v2477_v42, %v2464_v39  ;;  %v2604_v42 = vrot.slane %v7869_v40, %v8108_v37 }
 0xb70   : > { %v7505_v25 = vpop.eup %7504  ;;  %7072 = vmatpush3.bf16.msra.mxu0 %v7069_v31 }
 0xb71   : > { %v2300_v26 = vmul.f32 %v7505_v25, %v7501_v17  ;;  %v2725_v17 = vld [vmem:[%s8974_s5] sm:$0xff]  ;;  %7082 = vmatprep.subr.bf16.mxu0 %v7081_v13 }
 0xb73   : > { %6931 = vmatmul.mubr.msk.f32.vlgmr.msra.gmra.mrb[18].mxu1 %vm1137_vm7, %v2300_v26 }
 0xb74   : > { %7076 = vmatpush3.bf16.msra.mxu1 %v7073_v18 }
 0xb75   : > { %7078 = vmatprep.subr.bf16.mxu1 %v7077_v21 }
 0xb78   : > { %7080 = vmatpush3.bf16.msra.mxu1 %v7077_v21 }
 0xb79   : > { %6966 = vmatprep.subr.mxu1 %v7617_v53 }
 0xc3e   : > { %v2373_v33 = vpop.f32.mrb[12].mxu0 }
 0xc3f   : > { %2471 = vrot.lane.b32.xlu0 %v2373_v33, %s8938_s26  ;;  %v6927_v34 = vpop.f32.mrb[13].mxu0 }
 0xc46   : > { %v2449_v35 = vpop.f32.mrb[18].mxu1 }
 0xc47   : > { %2473 = vrot.lane.b32.xlu1 %v2449_v35, %s8938_s26  ;;  %v6932_v36 = vpop.f32.mrb[19].mxu1 }
 0xcb1   : > { %v2472_v47 = vpop.permute.xlu0 %2471 }
 0xcb2   : > { %v2483_v48 = vsel %vm2482_vm9, %v2480_v45, %v2472_v47  ;;  %v8113_v45 = vsub.s32 3, %v7863_v32 }
 0xcb3   : > { %6941 = vmatprep.mubr.msk.f32.mxu0 %vm972_vm1, %v2483_v48 }
 0xcb4   : > { %v2630_v48 = vrot.slane %v7869_v40, %v8113_v45  ;;  %v6383_v40 = vld [vmem:[%s8975_s9] ss:$0 sm:$0xff] }
 0xcb9   : > { %v2474_v52 = vpop.permute.xlu1 %2473 }
 0xcba   : > { %v2484_v54 = vsel %vm2482_vm9, %v2481_v51, %v2474_v52 }
 0xcbb   : > { %6942 = vmatmul.mubr.msk.f32.vlgmr.msra.gmra.mrb[14].mxu0 %vm972_vm1, %v2484_v54 }
 0xcbc   : > { %6963 = vmatprep.mubr.msk.f32.mxu0 %vm972_vm1, %v2725_v17  ;;  %7084 = vmatpush3.bf16.msra.mxu0 %v7081_v13 }
 0xcbd   : > { %7086 = vmatprep.subr.bf16.mxu0 %v7085_v56 }
 0xcc0   : > { %7088 = vmatpush3.bf16.msra.mxu0 %v7085_v56 }
 0xcc1   : > { %6976 = vmatprep.subr.mxu0 %v7617_v53 }
 0xcc3   : > { %6964 = vmatmul.mubr.msk.f32.vlgmr.msra.gmra.mrb[16].mxu0 %vm972_vm1, %v2726_v22 }
 0xcc4   : > { %6978 = vmatprep.mubr.msk.f32.mxu0 %vm7618_vm6, %v7617_v53 }
 0xd8e   : > { %v6943_v44 = vpop.f32.mrb[14].mxu0 }
 0xd8f   : > { %v2571_v57 = vadd.f32 %v6943_v44, %v7849_v3  ;;  %v2561_v59 = vpop.f32.mrb[15].mxu0 }
 0xd90   : > { %v2570_v60 = vadd.f32 %v2561_v59, %v7847_v2 }
 0xd91   : > { %v8071_v61 = vadd.f32 %v6379_v55, %v2571_v57 }
 0xd92   : > { %v8073_v46 = vadd.f32 %v6379_v55, %v2570_v60 }
 0xd93   : > { %v2584_v62 = vsel %vm972_vm1, %v8071_v61, 0.0 }
 0xd94   : > { %2585 = vadd.xlane.f32.xlu1 %v2584_v62  ;;  %v2581_v63 = vsel %vm972_vm1, %v8073_v46, 0.0 }
 0xd95   : > { %2582 = vadd.xlane.f32.xlu0 %v2581_v63  ;;  %v6380_v63 = vld [vmem:[%s8977_s10] ss:$0 sm:$0xff] }
 0xd96   : > { %v6965_v57 = vpop.f32.mrb[16].mxu0 }
 0xd97   : > { %v8127_v59 = vadd.f32 %v6965_v57, %v6383_v40  ;;  %v2810_v60 = vpop.f32.mrb[17].mxu0 }
 0xd98   : > { %v8129_v62 = vadd.f32 %v6383_v40, %v2810_v60 }
 0xe21   : > { %v2586_v0 = vpop.xlane.xlu1 %2585 }
 0xe22   : > { %v2588_v3 = vmul.f32 0.03125, %v2586_v0  ;;  %v2583_v2 = vpop.xlane.xlu0 %2582 }
 0xe23   : > { %v2587_v4 = vmul.f32 0.03125, %v2583_v2 }
 0xe24   : > { %v8080_v5 = vsub.f32 %v8071_v61, %v2588_v3 }
 0xe25   : > { %v2589_v6 = vsub.f32 %v8073_v46, %v2587_v4 }
 0xe26   : > { %v2592_v10 = vmul.f32 %v8080_v5, %v8080_v5  ;;  %v2606_v51 = vmul.f32 %v2604_v42, %v8080_v5  ;;  %v8157_v5 = vld [vmem:[%s8978_s30] ss:$0 sm:$0xff] }
 0xe27   : > { %v2591_v7 = vmul.f32 %v2589_v6, %v2589_v6  ;;  %v2605_v47 = vmul.f32 %v2604_v42, %v2589_v6 }
 0xe28   : > { %v2596_v11 = vsel %vm972_vm1, %v2592_v10, 0.0  ;;  %v8163_v10 = vld [vmem:[%s8978_s30 + $0x1] ss:$0 sm:$0xff] }
 0xe29   : > { %v2593_v9 = vsel %vm972_vm1, %v2591_v7, 0.0 }
 0xe2a   : > { %2594 = vadd.xlane.f32.xlu0 %v2593_v9 }
 0xe2e   : > { %2597 = vadd.xlane.f32.xlu0 %v2596_v11 }
 0xeb7   : > { %v2595_v23 = vpop.xlane.xlu0 %2594 }
 0xeb8   : > { %v2599_v24 = vmul.f32 0.032258064, %v2595_v23 }
 0xeba   : > { %7506 = vrsqrt.f32 %v2599_v24  ;;  %vm2609_vm11 = vcmp.eq.f32.partialorder %v2599_v24, inf  ;;  %v2612_v28 = vand.u32 2147483648, %v2599_v24  ;;  %vm2611_vm12 = vcmp.eq.f32.partialorder %v2599_v24, 0.0 }
 0xebb   : > { %v2598_v25 = vpop.xlane.xlu0 %2597 }
 0xebc   : > { %v2600_v26 = vmul.f32 0.032258064, %v2598_v25 }
 0xebe   : > { %7508 = vrsqrt.f32 %v2600_v26  ;;  %vm2616_vm13 = vcmp.eq.f32.partialorder %v2600_v26, inf  ;;  %v2619_v35 = vand.u32 2147483648, %v2600_v26  ;;  %vm2618_vm14 = vcmp.eq.f32.partialorder %v2600_v26, 0.0 }
 0xec4   : > { %v7507_v27 = vpop.eup %7506 }
 0xec5   : > { %v2608_v58 = vmul.f32 %v7507_v27, %v2599_v24 }
 0xec7   : > { %v2610_v29 = vsel %vm2609_vm11, %v2599_v24, %v2608_v58 }
 0xec8   : > { %v7509_v30 = vpop.eup %7508  ;;  %v2613_v31 = vsel %vm2611_vm12, %v2612_v28, %v2610_v29 }
 0xec9   : > { %v2615_v33 = vmul.f32 %v7509_v30, %v2600_v26  ;;  %v2621_v34 = vadd.f32 1e-06, %v2613_v31 }
 0xecb   : > { %v2617_v36 = vsel %vm2616_vm13, %v2600_v26, %v2615_v33  ;;  %7510 = vrcp.f32 %v2621_v34 }
 0xecc   : > { %v2620_v39 = vsel %vm2618_vm14, %v2619_v35, %v2617_v36 }
 0xecd   : > { %v2622_v41 = vadd.f32 1e-06, %v2620_v39 }
 0xecf   : > { %7512 = vrcp.f32 %v2622_v41 }
 0xed5   : > { %v7511_v49 = vpop.eup %7510 }
 0xed6   : > { %v2624_v50 = vmul.f32 %v7511_v49, %v2605_v47 }
 0xed8   : > { %v2631_v52 = vadd.f32 %v2630_v48, %v2624_v50 }
 0xed9   : > { %v7513_v54 = vpop.eup %7512 }
 0xeda   : > { %v2626_v44 = vmul.f32 %v7513_v54, %v2606_v51  ;;  %6952 = vmatprep.mubr.msk.f32.mxu1 %vm972_vm1, %v2631_v52 }
 0xedc   : > { %v2632_v55 = vadd.f32 %v2630_v48, %v2626_v44 }
 0xede   : > { %6953 = vmatmul.mubr.msk.f32.vlgmr.msra.gmra.mrb[20].mxu1 %vm972_vm1, %v2632_v55 }
 0xedf   : > { %6968 = vmatprep.mubr.msk.f32.mxu1 %vm7618_vm6, %v7617_v53  ;;  %6967 = vmatpush3.xpose.msk.msra.mxu1 %vm1137_vm7, %v8129_v62 }
 0xee0   : > { %6971 = vmatprep.subr.mxu1 %v7617_v53 }
 0xfb1   : > { %v6954_v0 = vpop.f32.mrb[20].mxu1 }
 0xfb2   : > { %v2716_v3 = vpop.f32.mrb[21].mxu1  ;;  %v8147_v4 = vadd.f32 %v6954_v0, %v6380_v63 }
 0xfb3   : > { %v8139_v2 = vadd.f32 %v6380_v63, %v2716_v3 }
 0xfb5   : > { %6969 = vmatmul.mubr.msk.f32.vlgmr.msra.gmra.mrb[22].mxu1 %vm1137_vm7, %v8139_v2 }
 0xfb6   : > { %6972 = vmatpush3.xpose.msk.msra.mxu1 %vm1137_vm7, %v8127_v59  ;;  %6973 = vmatprep.mubr.msk.f32.mxu1 %vm7618_vm6, %v7617_v53 }
 0xfb7   : > { %6981 = vmatprep.subr.mxu1 %v7617_v53 }
 0xfb9   : > { %6974 = vmatmul.mubr.msk.f32.vlgmr.msra.gmra.mrb[24].mxu1 %vm1137_vm7, %v8147_v4 }
 0xfba   : > { %6983 = vmatprep.mubr.msk.f32.mxu1 %vm7618_vm6, %v7617_v53 }
0x1088   : > { %v2905_v6 = vpop.f32.mrb[22].mxu1 }
0x1089   : > { %v2906_v7 = vadd.f32 %v8157_v5, %v2905_v6  ;;  %v6970_v9 = vpop.f32.mrb[23].mxu1 }
0x108b   : > { %v2985_v11 = vsel %vm1137_vm7, %v2906_v7, -inf }
0x108c   : > { %2986 = vmax.xlane.f32.xlu0 %v2985_v11  ;;  %v2981_v1 = vpop.f32.mrb[24].mxu1 }
0x108d   : > { %v2982_v12 = vadd.f32 %v8163_v10, %v2981_v1  ;;  %v6975_v8 = vpop.f32.mrb[25].mxu1 }
0x108f   : > { %v2988_v13 = vsel %vm1137_vm7, %v2982_v12, -inf }
0x1090   : > { %2989 = vmax.xlane.f32.xlu1 %v2988_v13 }
0x10a1   : > { %3083 = vrot.lane.b32.xlu1 %v8127_v59, %s7619_s1 }
0x10a2   : > { %3007 = vrot.lane.b32.xlu0 %v8129_v62, %s7619_s1  ;;  %s8979_s1 = smov 8  }
0x10a5   : > { %3161 = vrot.lane.b32.xlu1 %v8129_v62, %s7623_s7 }
0x10a9   : > { %3239 = vrot.lane.b32.xlu1 %v8127_v59, %s7623_s7 }
0x1119   : > { %v2987_v14 = vpop.xlane.xlu0 %2986 }
0x111a   : > { %v2991_v15 = vsub.f32 %v2906_v7, %v2987_v14 }
0x111c   : > { %v2993_v16 = vmul.f32 1.442695, %v2991_v15 }
0x111d   : > { %v3008_v56 = vpop.permute.xlu0 %3007  ;;  %v2990_v18 = vpop.xlane.xlu1 %2989 }
0x111e   : > { %7514 = vpow2.f32 %v2993_v16  ;;  %v2992_v17 = vsub.f32 %v2982_v12, %v2990_v18  ;;  %6977 = vmatpush3.msra.mxu0 %v3008_v56 }
0x111f   : > { %6986 = vmatprep.subr.mxu0 %v7617_v53 }
0x1120   : > { %v2995_v19 = vmul.f32 1.442695, %v2992_v17 }
0x1121   : > { %v3084_v20 = vpop.permute.xlu1 %3083 }
0x1122   : > { %7516 = vpow2.f32 %v2995_v19  ;;  %6982 = vmatpush3.msra.mxu1 %v3084_v20 }
0x1123   : > { %6991 = vmatprep.subr.mxu1 %v7617_v53 }
0x1125   : > { %v3162_v25 = vpop.permute.xlu1 %3161 }
0x1128   : > { %v7515_v21 = vpop.eup %7514 }
0x1129   : > { %v2997_v22 = vsel %vm1137_vm7, %v7515_v21, 0.0  ;;  %v3240_v26 = vpop.permute.xlu1 %3239 }
0x112a   : > { %2998 = vadd.xlane.f32.xlu0 %v2997_v22 }
0x112c   : > { %v7517_v23 = vpop.eup %7516 }
0x112d   : > { %v3000_v24 = vsel %vm1137_vm7, %v7517_v23, 0.0 }
0x112e   : > { %3001 = vadd.xlane.f32.xlu1 %v3000_v24 }
0x113f   : > { %3237 = vrot.lane.b32.xlu1 %v8147_v4, %s7623_s7 }
0x1140   : > { %3159 = vrot.lane.b32.xlu0 %v8139_v2, %s7623_s7  ;;  %s8981_s7 = smov 24  }
0x11b7   : > { %v2999_v27 = vpop.xlane.xlu0 %2998 }
0x11b8   : > { %7518 = vrcp.f32 %v2999_v27 }
0x11bb   : > { %v3002_v58 = vpop.xlane.xlu1 %3001  ;;  %v3160_v33 = vpop.permute.xlu0 %3159 }
0x11bc   : > { %7520 = vrcp.f32 %v3002_v58 }
0x11bf   : > { %v3238_v34 = vpop.permute.xlu1 %3237 }
0x11c2   : > { %v7519_v28 = vpop.eup %7518 }
0x11c3   : > { %v3005_v29 = vmul.f32 %v7519_v28, %v7515_v21 }
0x11c5   : > { %6979 = vmatmul.mubr.msk.f32.vlgmr.msra.gmra.mrb[18].mxu0 %vm1137_vm7, %v3005_v29 }
0x11c6   : > { %v7521_v30 = vpop.eup %7520  ;;  %6987 = vmatpush3.xpose.msk.msra.mxu0 %vm1137_vm7, %v3162_v25  ;;  %6988 = vmatprep.mubr.msk.f32.mxu0 %vm7618_vm6, %v7617_v53 }
0x11c7   : > { %v3006_v31 = vmul.f32 %v7521_v30, %v7517_v23  ;;  %6996 = vmatprep.subr.mxu0 %v7617_v53 }
0x11c9   : > { %6984 = vmatmul.mubr.msk.f32.vlgmr.msra.gmra.mrb[26].mxu1 %vm1137_vm7, %v3006_v31  ;;  %6989 = vmatmul.mubr.msk.f32.vlgmr.msra.gmra.mrb[20].mxu0 %vm1137_vm7, %v3160_v33 }
0x11ca   : > { %6992 = vmatpush3.xpose.msk.msra.mxu1 %vm1137_vm7, %v3240_v26  ;;  %6993 = vmatprep.mubr.msk.f32.mxu1 %vm7618_vm6, %v7617_v53 }
0x11cb   : > { %7001 = vmatprep.subr.mxu1 %v7617_v53  ;;  %6998 = vmatprep.mubr.msk.f32.mxu0 %vm7618_vm6, %v7617_v53 }
0x11cd   : > { %6994 = vmatmul.mubr.msk.f32.vlgmr.msra.gmra.mrb[28].mxu1 %vm1137_vm7, %v3238_v34 }
0x11ce   : > { %7003 = vmatprep.mubr.msk.f32.mxu1 %vm7618_vm6, %v7617_v53 }
0x1298   : > { %v8200_v35 = vpop.f32.mrb[18].mxu0 }
0x1299   : > { %v6980_v36 = vpop.f32.mrb[19].mxu0 }
0x129c   : > { %v8202_v39 = vpop.f32.mrb[26].mxu1  ;;  %v3233_v41 = vpop.f32.mrb[20].mxu0 }
0x129d   : > { %v3234_v42 = vadd.f32 %v8157_v5, %v3233_v41  ;;  %v6985_v47 = vpop.f32.mrb[27].mxu1  ;;  %v6990_v48 = vpop.f32.mrb[21].mxu0 }
0x129f   : > { %v3315_v49 = vsel %vm1137_vm7, %v3234_v42, -inf }
0x12a0   : > { %3316 = vmax.xlane.f32.xlu0 %v3315_v49  ;;  %v3311_v50 = vpop.f32.mrb[28].mxu1 }
0x12a1   : > { %v3312_v51 = vadd.f32 %v8163_v10, %v3311_v50  ;;  %v6995_v52 = vpop.f32.mrb[29].mxu1 }
0x12a3   : > { %v3318_v54 = vsel %vm1137_vm7, %v3312_v51, -inf }
0x12a4   : > { %3319 = vmax.xlane.f32.xlu1 %v3318_v54 }
0x12b5   : > { %3413 = vrot.lane.b32.xlu1 %v8127_v59, %s7622_s11 }
0x12b6   : > { %3337 = vrot.lane.b32.xlu0 %v8129_v62, %s7622_s11  ;;  %s8980_s11 = smov 16  }
0x12b9   : > { %3491 = vrot.lane.b32.xlu1 %v8129_v62, %s7626_s23 }
0x12bd   : > { %3569 = vrot.lane.b32.xlu1 %v8127_v59, %s7626_s23 }
0x12c1   : > { %3567 = vrot.lane.b32.xlu1 %v8147_v4, %s7626_s23 }
0x132d   : > { %v3317_v44 = vpop.xlane.xlu0 %3316 }
0x132e   : > { %v3321_v55 = vsub.f32 %v3234_v42, %v3317_v44 }
0x1330   : > { %v3323_v40 = vmul.f32 1.442695, %v3321_v55 }
0x1331   : > { %v3338_v57 = vpop.permute.xlu0 %3337  ;;  %v3320_v60 = vpop.xlane.xlu1 %3319 }
0x1332   : > { %7522 = vpow2.f32 %v3323_v40  ;;  %v3322_v63 = vsub.f32 %v3312_v51, %v3320_v60  ;;  %6997 = vmatpush3.msra.mxu0 %v3338_v57 }
0x1333   : > { %7006 = vmatprep.subr.mxu0 %v7617_v53 }
0x1334   : > { %v3325_v0 = vmul.f32 1.442695, %v3322_v63 }
0x1335   : > { %v3414_v3 = vpop.permute.xlu1 %3413 }
0x1336   : > { %7524 = vpow2.f32 %v3325_v0  ;;  %7002 = vmatpush3.msra.mxu1 %v3414_v3 }
0x1337   : > { %7011 = vmatprep.subr.mxu1 %v7617_v53 }
0x1339   : > { %v3492_v8 = vpop.permute.xlu1 %3491 }
0x133c   : > { %v7523_v6 = vpop.eup %7522 }
0x133d   : > { %v3327_v7 = vsel %vm1137_vm7, %v7523_v6, 0.0  ;;  %v3570_v16 = vpop.permute.xlu1 %3569 }
0x133e   : > { %3328 = vadd.xlane.f32.xlu0 %v3327_v7 }
0x1340   : > { %v7525_v9 = vpop.eup %7524 }
0x1341   : > { %v3330_v11 = vsel %vm1137_vm7, %v7525_v9, 0.0  ;;  %v3568_v17 = vpop.permute.xlu1 %3567 }
0x1342   : > { %3331 = vadd.xlane.f32.xlu0 %v3330_v11 }
0x1358   : > { %3489 = vrot.lane.b32.xlu0 %v8139_v2, %s7626_s23  ;;  %s8982_s23 = scalar_lea.vmem %s8923_s14, %s7764_s25 }
0x13cb   : > { %v3329_v1 = vpop.xlane.xlu0 %3328 }
0x13cc   : > { %7526 = vrcp.f32 %v3329_v1 }
0x13cf   : > { %v3332_v12 = vpop.xlane.xlu0 %3331 }
0x13d0   : > { %7528 = vrcp.f32 %v3332_v12 }
0x13d3   : > { %v3490_v18 = vpop.permute.xlu0 %3489 }
0x13d6   : > { %v7527_v13 = vpop.eup %7526 }
0x13d7   : > { %v3335_v14 = vmul.f32 %v7527_v13, %v7523_v6 }
0x13d9   : > { %6999 = vmatmul.mubr.msk.f32.vlgmr.msra.gmra.mrb[22].mxu0 %vm1137_vm7, %v3335_v14 }
0x13da   : > { %v7529_v15 = vpop.eup %7528  ;;  %7007 = vmatpush3.xpose.msk.msra.mxu0 %vm1137_vm7, %v3492_v8  ;;  %7008 = vmatprep.mubr.msk.f32.mxu0 %vm7618_vm6, %v7617_v53 }
0x13db   : > { %v3336_v56 = vmul.f32 %v7529_v15, %v7525_v9  ;;  %7016 = vmatprep.subr.mxu0 %v7617_v53 }
0x13dd   : > { %7004 = vmatmul.mubr.msk.f32.vlgmr.msra.gmra.mrb[30].mxu1 %vm1137_vm7, %v3336_v56  ;;  %7009 = vmatmul.mubr.msk.f32.vlgmr.msra.gmra.mrb[24].mxu0 %vm1137_vm7, %v3490_v18 }
0x13de   : > { %7012 = vmatpush3.xpose.msk.msra.mxu1 %vm1137_vm7, %v3570_v16  ;;  %7013 = vmatprep.mubr.msk.f32.mxu1 %vm7618_vm6, %v7617_v53 }
0x13df   : > { %7021 = vmatprep.subr.mxu1 %v7617_v53  ;;  %7018 = vmatprep.mubr.msk.f32.mxu0 %vm7618_vm6, %v7617_v53 }
0x13e1   : > { %7014 = vmatmul.mubr.msk.f32.vlgmr.msra.gmra.mrb[32].mxu1 %vm1137_vm7, %v3568_v17 }
0x13e2   : > { %7023 = vmatprep.mubr.msk.f32.mxu1 %vm7618_vm6, %v7617_v53 }
0x14ac   : > { %v8240_v19 = vpop.f32.mrb[22].mxu0 }
0x14ad   : > { %v7000_v20 = vpop.f32.mrb[23].mxu0 }
0x14b0   : > { %v8242_v21 = vpop.f32.mrb[30].mxu1  ;;  %v3563_v22 = vpop.f32.mrb[24].mxu0 }
0x14b1   : > { %v3564_v23 = vadd.f32 %v8157_v5, %v3563_v22  ;;  %v7005_v24 = vpop.f32.mrb[31].mxu1  ;;  %v7010_v25 = vpop.f32.mrb[25].mxu0 }
0x14b3   : > { %v3645_v26 = vsel %vm1137_vm7, %v3564_v23, -inf }
0x14b4   : > { %3646 = vmax.xlane.f32.xlu0 %v3645_v26  ;;  %v3641_v27 = vpop.f32.mrb[32].mxu1 }
0x14b5   : > { %v3642_v58 = vadd.f32 %v8163_v10, %v3641_v27  ;;  %v7015_v28 = vpop.f32.mrb[33].mxu1 }
0x14b7   : > { %v3648_v29 = vsel %vm1137_vm7, %v3642_v58, -inf }
0x14b8   : > { %3649 = vmax.xlane.f32.xlu1 %v3648_v29  ;;  %v4180_v29 = vld [vmem:[%s7812_s3 + $0x8] sm:$0xff] }
0x14c9   : > { %3743 = vrot.lane.b32.xlu1 %v8127_v59, %s7625_s2 }
0x14ca   : > { %3667 = vrot.lane.b32.xlu0 %v8129_v62, %s7625_s2 }
0x14cd   : > { %3821 = vrot.lane.b32.xlu1 %v8129_v62, %s7629_s24 }
0x14d1   : > { %3899 = vrot.lane.b32.xlu1 %v8127_v59, %s7629_s24 }
0x14d5   : > { %3897 = vrot.lane.b32.xlu1 %v8147_v4, %s7629_s24 }
0x1541   : > { %v3647_v30 = vpop.xlane.xlu0 %3646 }
0x1542   : > { %v3651_v31 = vsub.f32 %v3564_v23, %v3647_v30 }
0x1544   : > { %v3653_v33 = vmul.f32 1.442695, %v3651_v31  ;;  %v4181_v31 = vld [vmem:[%s7812_s3 + $0x10] sm:$0xff] }
0x1545   : > { %v3668_v34 = vpop.permute.xlu0 %3667  ;;  %v3650_v36 = vpop.xlane.xlu1 %3649 }
0x1546   : > { %7530 = vpow2.f32 %v3653_v33  ;;  %v3652_v41 = vsub.f32 %v3642_v58, %v3650_v36  ;;  %7017 = vmatpush3.msra.mxu0 %v3668_v34  ;;  %v4182_v33 = vld [vmem:[%s7812_s3 + $0x18] sm:$0xff] }
0x1547   : > { %7026 = vmatprep.subr.mxu0 %v7617_v53  ;;  %v7093_v34 = vpack.c.bf16 %v4182_v33, %v4181_v31  ;;  %v4361_v33 = vld [vmem:[%s7822_s22 + $0x110] sm:$0xff] }
0x1548   : > { %v3655_v42 = vmul.f32 1.442695, %v3652_v41 }
0x1549   : > { %v3744_v47 = vpop.permute.xlu1 %3743 }
0x154a   : > { %7532 = vpow2.f32 %v3655_v42  ;;  %7022 = vmatpush3.msra.mxu1 %v3744_v47 }
0x154b   : > { %7031 = vmatprep.subr.mxu1 %v7617_v53 }
0x154d   : > { %v3822_v54 = vpop.permute.xlu1 %3821 }
0x1550   : > { %v7531_v48 = vpop.eup %7530 }
0x1551   : > { %v3657_v49 = vsel %vm1137_vm7, %v7531_v48, 0.0  ;;  %v3900_v57 = vpop.permute.xlu1 %3899 }
0x1552   : > { %3658 = vadd.xlane.f32.xlu0 %v3657_v49 }
0x1554   : > { %v7533_v4 = vpop.eup %7532 }
0x1555   : > { %v3660_v50 = vsel %vm1137_vm7, %v7533_v4, 0.0  ;;  %v3898_v63 = vpop.permute.xlu1 %3897 }
0x1556   : > { %3661 = vadd.xlane.f32.xlu0 %v3660_v50 }
0x156c   : > { %3819 = vrot.lane.b32.xlu0 %v8139_v2, %s7629_s24 }
0x15df   : > { %v3659_v51 = vpop.xlane.xlu0 %3658 }
0x15e0   : > { %7534 = vrcp.f32 %v3659_v51 }
0x15e3   : > { %v3662_v52 = vpop.xlane.xlu0 %3661 }
0x15e4   : > { %7536 = vrcp.f32 %v3662_v52 }
0x15e7   : > { %v3820_v2 = vpop.permute.xlu0 %3819 }
0x15ea   : > { %v7535_v44 = vpop.eup %7534 }
0x15eb   : > { %v3665_v55 = vmul.f32 %v7535_v44, %v7531_v48 }
0x15ed   : > { %7019 = vmatmul.mubr.msk.f32.vlgmr.msra.gmra.mrb[26].mxu0 %vm1137_vm7, %v3665_v55 }
0x15ee   : > { %v7537_v40 = vpop.eup %7536  ;;  %7027 = vmatpush3.xpose.msk.msra.mxu0 %vm1137_vm7, %v3822_v54  ;;  %7028 = vmatprep.mubr.msk.f32.mxu0 %vm7618_vm6, %v7617_v53 }
0x15ef   : > { %v3666_v60 = vmul.f32 %v7537_v40, %v7533_v4  ;;  %7036 = vmatprep.subr.mxu0 %v7617_v53 }
0x15f1   : > { %7024 = vmatmul.mubr.msk.f32.vlgmr.msra.gmra.mrb[34].mxu1 %vm1137_vm7, %v3666_v60  ;;  %7029 = vmatmul.mubr.msk.f32.vlgmr.msra.gmra.mrb[28].mxu0 %vm1137_vm7, %v3820_v2  ;;  %v6414_v2 = vld [vmem:[%s8982_s23] ss:$0 sm:$0xff] }
0x15f2   : > { %7032 = vmatpush3.xpose.msk.msra.mxu1 %vm1137_vm7, %v3900_v57  ;;  %7033 = vmatprep.mubr.msk.f32.mxu1 %vm7618_vm6, %v7617_v53 }
0x15f3   : > { %7041 = vmatprep.subr.mxu1 %v7617_v53  ;;  %7038 = vmatprep.mubr.msk.f32.mxu0 %vm7618_vm6, %v7617_v53 }
0x15f5   : > { %7034 = vmatmul.mubr.msk.f32.vlgmr.msra.gmra.mrb[36].mxu1 %vm1137_vm7, %v3898_v63 }
0x15f6   : > { %7043 = vmatprep.mubr.msk.f32.mxu1 %vm7618_vm6, %v7617_v53 }
0x16c0   : > { %v3739_v0 = vpop.f32.mrb[26].mxu0 }
0x16c1   : > { %v7020_v3 = vpop.f32.mrb[27].mxu0 }
0x16c4   : > { %v3815_v6 = vpop.f32.mrb[34].mxu1  ;;  %v3893_v7 = vpop.f32.mrb[28].mxu0 }
0x16c5   : > { %v3894_v9 = vadd.f32 %v8157_v5, %v3893_v7  ;;  %v7025_v11 = vpop.f32.mrb[35].mxu1  ;;  %v7030_v1 = vpop.f32.mrb[29].mxu0 }
0x16c7   : > { %v3975_v12 = vsel %vm1137_vm7, %v3894_v9, -inf }
0x16c8   : > { %3976 = vmax.xlane.f32.xlu0 %v3975_v12  ;;  %v3971_v8 = vpop.f32.mrb[36].mxu1 }
0x16c9   : > { %v3972_v13 = vadd.f32 %v8163_v10, %v3971_v8  ;;  %v7035_v14 = vpop.f32.mrb[37].mxu1 }
0x16cb   : > { %v3978_v15 = vsel %vm1137_vm7, %v3972_v13, -inf }
0x16cc   : > { %3979 = vmax.xlane.f32.xlu1 %v3978_v15 }
0x16dd   : > { %4073 = vrot.lane.b32.xlu1 %v8127_v59, %s7628_s28 }
0x16e1   : > { %4151 = vrot.lane.b32.xlu1 %v8240_v19, %s8979_s1 }
0x16e5   : > { %4153 = vrot.lane.b32.xlu1 %v8242_v21, %s8979_s1 }
0x16e9   : > { %4161 = vrot.lane.b32.xlu1 %v3815_v6, %s8980_s11 }
0x1755   : > { %v3977_v5 = vpop.xlane.xlu0 %3976 }
0x1756   : > { %v3981_v16 = vsub.f32 %v3894_v9, %v3977_v5 }
0x1758   : > { %v3983_v56 = vmul.f32 1.442695, %v3981_v16  ;;  %v4328_v16 = vld [vmem:[%s7822_s22 + $0x8] sm:$0xff] }
0x1759   : > { %v3980_v18 = vpop.xlane.xlu1 %3979 }
0x175a   : > { %7538 = vpow2.f32 %v3983_v56  ;;  %v3982_v10 = vsub.f32 %v3972_v13, %v3980_v18  ;;  %v4344_v56 = vld [vmem:[%s7822_s22 + $0x88] sm:$0xff]  ;;  %v4330_v18 = vld [vmem:[%s7822_s22 + $0x18] sm:$0xff] }
0x175c   : > { %v3985_v17 = vmul.f32 1.442695, %v3982_v10  ;;  %v7097_v10 = vpack.c.bf16 %v4344_v56, %v4328_v16  ;;  %v4333_v16 = vld [vmem:[%s7822_s22 + $0x30] sm:$0xff] }
0x175d   : > { %v4074_v20 = vpop.permute.xlu1 %4073  ;;  %v4349_v56 = vld [vmem:[%s7822_s22 + $0xb0] sm:$0xff] }
0x175e   : > { %7540 = vpow2.f32 %v3985_v17  ;;  %7042 = vmatpush3.msra.mxu1 %v4074_v20  ;;  %v4346_v17 = vld [vmem:[%s7822_s22 + $0x98] sm:$0xff]  ;;  %v4327_v20 = vld [vmem:[%s7822_s22] sm:$0xff] }
0x175f   : > { %7098 = vmatprep.subr.bf16.mxu1 %v7097_v10  ;;  %v4364_v10 = vld [vmem:[%s7822_s22 + $0x128] sm:$0xff] }
0x1761   : > { %v4152_v48 = vpop.permute.xlu1 %4151 }
0x1762   : > { %v4173_v50 = vsel %vm1137_vm7, %v8200_v35, %v4152_v48 }
0x1764   : > { %v7539_v22 = vpop.eup %7538 }
0x1765   : > { %v3987_v59 = vsel %vm1137_vm7, %v7539_v22, 0.0  ;;  %v4154_v49 = vpop.permute.xlu1 %4153 }
0x1766   : > { %3988 = vadd.xlane.f32.xlu0 %v3987_v59  ;;  %v4174_v55 = vsel %vm1137_vm7, %v8202_v39, %v4154_v49  ;;  %v7105_v59 = vpack.c.bf16 %v4346_v17, %v4330_v18  ;;  %v4350_v49 = vld [vmem:[%s7822_s22 + $0xb8] sm:$0xff] }
0x1768   : > { %v7541_v19 = vpop.eup %7540 }
0x1769   : > { %v3990_v23 = vsel %vm1137_vm7, %v7541_v19, 0.0  ;;  %v4162_v51 = vpop.permute.xlu1 %4161 }
0x176a   : > { %3991 = vadd.xlane.f32.xlu0 %v3990_v23  ;;  %v4176_v40 = vsel %vm2479_vm10, %v4174_v55, %v4162_v51  ;;  %v4329_v23 = vld [vmem:[%s7822_s22 + $0x10] sm:$0xff] }
0x1780   : > { %3997 = vrot.lane.b32.xlu0 %v8129_v62, %s7628_s28  ;;  %v4179_v62 = vld [vmem:[%s7812_s3] sm:$0xff] }
0x1781   : > { %v7089_v30 = vpack.c.bf16 %v4180_v29, %v4179_v62  ;;  %v4359_v62 = vld [vmem:[%s7822_s22 + $0x100] sm:$0xff] }
0x1782   : > { %v4375_v29 = vld [vmem:[%s7822_s22 + $0x180] sm:$0xff] }
0x1783   : > { %v7103_v31 = vpack.c.bf16 %v4375_v29, %v4359_v62  ;;  %v4336_v29 = vld [vmem:[%s7822_s22 + $0x48] sm:$0xff] }
0x1784   : > { %4159 = vrot.lane.b32.xlu0 %v3739_v0, %s8980_s11 }
0x17f3   : > { %v3989_v21 = vpop.xlane.xlu0 %3988 }
0x17f4   : > { %7542 = vrcp.f32 %v3989_v21  ;;  %v4345_v21 = vld [vmem:[%s7822_s22 + $0x90] sm:$0xff] }
0x17f7   : > { %v3992_v24 = vpop.xlane.xlu0 %3991 }
0x17f8   : > { %7544 = vrcp.f32 %v3992_v24  ;;  %v7107_v24 = vpack.c.bf16 %v4345_v21, %v4329_v23  ;;  %v7123_v23 = vpack.c.bf16 %v4349_v56, %v4333_v16  ;;  %v4363_v21 = vld [vmem:[%s7822_s22 + $0x120] sm:$0xff]  ;;  %v4357_v16 = vld [vmem:[%s7822_s22 + $0xf0] sm:$0xff] }
0x17fb   : > { %v3998_v25 = vpop.permute.xlu0 %3997 }
0x17fc   : > { %7037 = vmatpush3.msra.mxu0 %v3998_v25  ;;  %v4360_v25 = vld [vmem:[%s7822_s22 + $0x108] sm:$0xff] }
0x17fd   : > { %7090 = vmatprep.subr.bf16.mxu0 %v7089_v30 }
0x17fe   : > { %v7543_v26 = vpop.eup %7542 }
0x17ff   : > { %v3995_v27 = vmul.f32 %v7543_v26, %v7539_v22  ;;  %v4160_v4 = vpop.permute.xlu0 %4159  ;;  %v4343_v22 = vld [vmem:[%s7822_s22 + $0x80] sm:$0xff]  ;;  %v4376_v26 = vld [vmem:[%s7822_s22 + $0x188] sm:$0xff] }
0x1800   : > { %v4175_v52 = vsel %vm2479_vm10, %v4173_v50, %v4160_v4 }
0x1801   : > { %7039 = vmatmul.mubr.msk.f32.vlgmr.msra.gmra.mrb[30].mxu0 %vm1137_vm7, %v3995_v27  ;;  %v4362_v27 = vld [vmem:[%s7822_s22 + $0x118] sm:$0xff] }
0x1802   : > { %v7545_v58 = vpop.eup %7544  ;;  %7092 = vmatpush3.bf16.msra.mxu0 %v7089_v30 }
0x1803   : > { %v3996_v28 = vmul.f32 %v7545_v58, %v7541_v19  ;;  %7094 = vmatprep.subr.bf16.mxu0 %v7093_v34  ;;  %v7099_v19 = vpack.c.bf16 %v4343_v22, %v4327_v20  ;;  %v7101_v58 = vpack.c.bf16 %v4376_v26, %v4360_v25  ;;  %v4380_v20 = vld [vmem:[%s7822_s22 + $0x1a8] sm:$0xff]  ;;  %v4366_v22 = vld [vmem:[%s7822_s22 + $0x138] sm:$0xff]  ;;  %v4379_v25 = vld [vmem:[%s7822_s22 + $0x1a0] sm:$0xff] }
0x1804   : > { %v4365_v26 = vld [vmem:[%s7822_s22 + $0x130] sm:$0xff] }
0x1805   : > { %7044 = vmatmul.mubr.msk.f32.vlgmr.msra.gmra.mrb[38].mxu1 %vm1137_vm7, %v3996_v28  ;;  %v4378_v28 = vld [vmem:[%s7822_s22 + $0x198] sm:$0xff] }
0x1806   : > { %4545 = vmatprep.mubr.f32.mxu1 %v7617_v53  ;;  %7096 = vmatpush3.bf16.msra.mxu0 %v7093_v34  ;;  %v7109_v30 = vpack.c.bf16 %v4378_v28, %v4362_v27  ;;  %v4377_v34 = vld [vmem:[%s7822_s22 + $0x190] sm:$0xff]  ;;  %v7117_v28 = vpack.c.bf16 %v4380_v20, %v4364_v10  ;;  %v4372_v10 = vld [vmem:[%s7822_s22 + $0x168] sm:$0xff]  ;;  %v4374_v20 = vld [vmem:[%s7822_s22 + $0x178] sm:$0xff] }
0x1807   : > { %7106 = vmatprep.subr.bf16.mxu0 %v7105_v59  ;;  %7100 = vmatpush1.bf16.msra.mxu1 %v7099_v19  ;;  %v4382_v59 = vld [vmem:[%s7822_s22 + $0x1b8] sm:$0xff]  ;;  %v4381_v27 = vld [vmem:[%s7822_s22 + $0x1b0] sm:$0xff] }
0x1808   : > { %7102 = vmatprep.subr.bf16.mxu1 %v7101_v58  ;;  %v7125_v62 = vpack.c.bf16 %v4382_v59, %v4366_v22  ;;  %v4390_v22 = vld [vmem:[%s7822_s22 + $0x1f8] sm:$0xff] }
0x180b   : > { %7104 = vmatpush1.bf16.msra.mxu1 %v7103_v31  ;;  %v4338_v31 = vld [vmem:[%s7822_s22 + $0x58] sm:$0xff] }
0x18d4   : > { %v4069_v36 = vpop.f32.mrb[30].mxu0 }
0x18d5   : > { %4167 = vrot.lane.b32.xlu0 %v4069_v36, %s8981_s7  ;;  %v7040_v41 = vpop.f32.mrb[31].mxu0  ;;  %v7111_v36 = vpack.c.bf16 %v4377_v34, %v4361_v33  ;;  %v4354_v33 = vld [vmem:[%s7822_s22 + $0xd8] sm:$0xff]  ;;  %v7119_v34 = vpack.c.bf16 %v4379_v25, %v4363_v21  ;;  %v4387_v21 = vld [vmem:[%s7822_s22 + $0x1e0] sm:$0xff]  ;;  %v4389_v25 = vld [vmem:[%s7822_s22 + $0x1f0] sm:$0xff] }
0x18d6   : > { %v4332_v41 = vld [vmem:[%s7822_s22 + $0x28] sm:$0xff] }
0x18d8   : > { %v4145_v42 = vpop.f32.mrb[38].mxu1 }
0x18d9   : > { %4169 = vrot.lane.b32.xlu1 %v4145_v42, %s8981_s7  ;;  %v7045_v47 = vpop.f32.mrb[39].mxu1  ;;  %v4348_v42 = vld [vmem:[%s7822_s22 + $0xa8] sm:$0xff] }
0x18da   : > { %v4334_v47 = vld [vmem:[%s7822_s22 + $0x38] sm:$0xff]  ;;  %v7113_v48 = vpack.c.bf16 %v4348_v42, %v4332_v41  ;;  %v4335_v41 = vld [vmem:[%s7822_s22 + $0x40] sm:$0xff] }
0x18db   : > { %v7121_v4 = vpack.c.bf16 %v4350_v49, %v4334_v47  ;;  %v4351_v47 = vld [vmem:[%s7822_s22 + $0xc0] sm:$0xff]  ;;  %v4353_v49 = vld [vmem:[%s7822_s22 + $0xd0] sm:$0xff] }
0x18dc   : > { %7114 = vmatprep.subr.bf16.mxu1 %v7113_v48  ;;  %v4337_v48 = vld [vmem:[%s7822_s22 + $0x50] sm:$0xff] }
0x1947   : > { %v4168_v54 = vpop.permute.xlu0 %4167 }
0x1948   : > { %v4177_v44 = vsel %vm2482_vm9, %v4175_v52, %v4168_v54 }
0x1949   : > { %7054 = vmatprep.mubr.msk.f32.mxu0 %vm972_vm1, %v4177_v44 }
0x194b   : > { %v4170_v57 = vpop.permute.xlu1 %4169 }
0x194c   : > { %v4178_v60 = vsel %vm2482_vm9, %v4176_v40, %v4170_v57 }
0x194d   : > { %7055 = vmatmul.mubr.msk.f32.vlgmr.msra.gmra.mrb[32].mxu0 %vm972_vm1, %v4178_v60 }
0x194e   : > { %4622 = vmatprep.mubr.f32.mxu0 %v7617_v53  ;;  %7108 = vmatpush1.bf16.msra.mxu0 %v7107_v24 }
0x194f   : > { %7110 = vmatprep.subr.bf16.mxu0 %v7109_v30 }
0x1952   : > { %7112 = vmatpush1.bf16.msra.mxu0 %v7111_v36  ;;  %v7127_v36 = vpack.c.bf16 %v4381_v27, %v4365_v26  ;;  %v7157_v27 = vpack.c.bf16 %v4390_v22, %v4374_v20 }
0x1953   : > { %7122 = vmatprep.subr.bf16.mxu0 %v7121_v4 }
0x1a20   : > { %v7056_v35 = vpop.f32.mrb[32].mxu0 }
0x1a21   : > { %v4265_v63 = vadd.f32 %v7056_v35, %v8071_v61  ;;  %v4255_v0 = vpop.f32.mrb[33].mxu0 }
0x1a22   : > { %v4264_v39 = vadd.f32 %v4255_v0, %v8073_v46 }
0x1a23   : > { %v8323_v3 = vadd.f32 %v6414_v2, %v4265_v63 }
0x1a24   : > { %v8325_v6 = vadd.f32 %v6414_v2, %v4264_v39 }
0x1a25   : > { %v4278_v7 = vsel %vm972_vm1, %v8323_v3, 0.0 }
0x1a26   : > { %4279 = vadd.xlane.f32.xlu1 %v4278_v7  ;;  %v4275_v9 = vsel %vm972_vm1, %v8325_v6, 0.0  ;;  %v8364_v7 = vsub.s32 4, %v7863_v32 }
0x1a27   : > { %4276 = vadd.xlane.f32.xlu0 %v4275_v9 }
0x1ab3   : > { %v4280_v11 = vpop.xlane.xlu1 %4279 }
0x1ab4   : > { %v4282_v61 = vmul.f32 0.03125, %v4280_v11  ;;  %v4277_v46 = vpop.xlane.xlu0 %4276 }
0x1ab5   : > { %v4281_v1 = vmul.f32 0.03125, %v4277_v46  ;;  %v7554_v46 = vld [vmem:[%s7771_s29] sm:$0x3f] }
0x1ab6   : > { %v8332_v12 = vsub.f32 %v8323_v3, %v4282_v61  ;;  %v8367_v61 = vsub.s32 5, %v7863_v32 }
0x1ab7   : > { %v8335_v8 = vsub.f32 %v8325_v6, %v4281_v1  ;;  %v4298_v1 = vrot.slane %v7554_v46, %v8364_v7 }
0x1ab8   : > { %v4286_v15 = vmul.f32 %v8332_v12, %v8332_v12 }
0x1ab9   : > { %v4285_v13 = vmul.f32 %v8335_v8, %v8335_v8 }
0x1aba   : > { %v4290_v5 = vsel %vm972_vm1, %v4286_v15, 0.0  ;;  %v4299_v15 = vmul.f32 %v4298_v1, %v8335_v8  ;;  %v4300_v8 = vmul.f32 %v4298_v1, %v8332_v12  ;;  %v4352_v12 = vld [vmem:[%s7822_s22 + $0xc8] sm:$0xff] }
0x1abb   : > { %v4287_v14 = vsel %vm972_vm1, %v4285_v13, 0.0  ;;  %v4331_v13 = vld [vmem:[%s7822_s22 + $0x20] sm:$0xff]  ;;  %v7129_v4 = vpack.c.bf16 %v4352_v12, %v4336_v29  ;;  %v5178_v29 = vld [vmem:[%s7834_s27 + $0x188] sm:$0xff] }
0x1abc   : > { %4288 = vadd.xlane.f32.xlu0 %v4287_v14  ;;  %v4324_v14 = vrot.slane %v7554_v46, %v8367_v61  ;;  %v4358_v46 = vld [vmem:[%s7822_s22 + $0xf8] sm:$0xff] }
0x1ac0   : > { %4291 = vadd.xlane.f32.xlu0 %v4290_v5  ;;  %v4347_v5 = vld [vmem:[%s7822_s22 + $0xa0] sm:$0xff] }
0x1ac1   : > { %v7115_v19 = vpack.c.bf16 %v4347_v5, %v4331_v13  ;;  %v4341_v5 = vld [vmem:[%s7822_s22 + $0x70] sm:$0xff] }
0x1b49   : > { %v4289_v50 = vpop.xlane.xlu0 %4288 }
0x1b4a   : > { %v4293_v51 = vmul.f32 0.032258064, %v4289_v50  ;;  %v7137_v50 = vpack.c.bf16 %v4354_v33, %v4338_v31  ;;  %v5129_v31 = vld [vmem:[%s7834_s27] sm:$0xff]  ;;  %v5130_v33 = vld [vmem:[%s7834_s27 + $0x8] sm:$0xff] }
0x1b4c   : > { %7546 = vrsqrt.f32 %v4293_v51  ;;  %vm4303_vm15 = vcmp.eq.f32.partialorder %v4293_v51, inf  ;;  %v4306_v40 = vand.u32 2147483648, %v4293_v51  ;;  %vm4305_vm0 = vcmp.eq.f32.partialorder %v4293_v51, 0.0 }
0x1b4d   : > { %v4292_v52 = vpop.xlane.xlu0 %4291 }
0x1b4e   : > { %v4294_v54 = vmul.f32 0.032258064, %v4292_v52  ;;  %v4384_v52 = vld [vmem:[%s7822_s22 + $0x1c8] sm:$0xff] }
0x1b50   : > { %7548 = vrsqrt.f32 %v4294_v54  ;;  %vm4310_vm2 = vcmp.eq.f32.partialorder %v4294_v54, inf  ;;  %v4313_v0 = vand.u32 2147483648, %v4294_v54  ;;  %vm4312_vm3 = vcmp.eq.f32.partialorder %v4294_v54, 0.0 }
0x1b56   : > { %v7547_v44 = vpop.eup %7546 }
0x1b57   : > { %v4302_v55 = vmul.f32 %v7547_v44, %v4293_v51  ;;  %v4386_v44 = vld [vmem:[%s7822_s22 + $0x1d8] sm:$0xff] }
0x1b59   : > { %v4304_v57 = vsel %vm4303_vm15, %v4293_v51, %v4302_v55  ;;  %v4368_v51 = vld [vmem:[%s7822_s22 + $0x148] sm:$0xff]  ;;  %v7131_v55 = vpack.c.bf16 %v4351_v47, %v4335_v41  ;;  %v5161_v41 = vld [vmem:[%s7834_s27 + $0x100] sm:$0xff] }
0x1b5a   : > { %v7549_v60 = vpop.eup %7548  ;;  %v4307_v35 = vsel %vm4305_vm0, %v4306_v40, %v4304_v57  ;;  %v7139_v40 = vpack.c.bf16 %v4353_v49, %v4337_v48  ;;  %v4367_v57 = vld [vmem:[%s7822_s22 + $0x140] sm:$0xff]  ;;  %v5162_v47 = vld [vmem:[%s7834_s27 + $0x108] sm:$0xff]  ;;  %v5147_v48 = vld [vmem:[%s7834_s27 + $0x90] sm:$0xff] }
0x1b5b   : > { %v4315_v2 = vadd.f32 1e-06, %v4307_v35  ;;  %v4309_v63 = vmul.f32 %v7549_v60, %v4294_v54  ;;  %v4383_v60 = vld [vmem:[%s7822_s22 + $0x1c0] sm:$0xff]  ;;  %v4369_v35 = vld [vmem:[%s7822_s22 + $0x150] sm:$0xff]  ;;  %v5148_v49 = vld [vmem:[%s7834_s27 + $0x98] sm:$0xff] }
0x1b5c   : > { %v7135_v1 = vpack.c.bf16 %v4383_v60, %v4367_v57  ;;  %v5163_v57 = vld [vmem:[%s7834_s27 + $0x110] sm:$0xff]  ;;  %v5164_v60 = vld [vmem:[%s7834_s27 + $0x118] sm:$0xff] }
0x1b5d   : > { %7550 = vrcp.f32 %v4315_v2  ;;  %v4311_v39 = vsel %vm4310_vm2, %v4294_v54, %v4309_v63  ;;  %v4370_v54 = vld [vmem:[%s7822_s22 + $0x158] sm:$0xff]  ;;  %v4385_v2 = vld [vmem:[%s7822_s22 + $0x1d0] sm:$0xff]  ;;  %v7133_v63 = vpack.c.bf16 %v4384_v52, %v4368_v51  ;;  %v7163_v51 = vpack.c.bf16 %v5130_v33, %v5129_v31 }
0x1b5e   : > { %v4314_v9 = vsel %vm4312_vm3, %v4313_v0, %v4311_v39  ;;  %v7141_v0 = vpack.c.bf16 %v4386_v44, %v4370_v54  ;;  %v4340_v39 = vld [vmem:[%s7822_s22 + $0x68] sm:$0xff]  ;;  %v7143_v13 = vpack.c.bf16 %v4385_v2, %v4369_v35  ;;  %v7195_v52 = vpack.c.bf16 %v5162_v47, %v5161_v41  ;;  %v5131_v54 = vld [vmem:[%s7834_s27 + $0x10] sm:$0xff]  ;;  %v5132_v44 = vld [vmem:[%s7834_s27 + $0x18] sm:$0xff] }
0x1b5f   : > { %v4316_v11 = vadd.f32 1e-06, %v4314_v9  ;;  %v4356_v9 = vld [vmem:[%s7822_s22 + $0xe8] sm:$0xff]  ;;  %v5149_v35 = vld [vmem:[%s7834_s27 + $0xa0] sm:$0xff]  ;;  %v5156_v31 = vld [vmem:[%s7834_s27 + $0xd8] sm:$0xff] }
0x1b60   : > { %v7145_v56 = vpack.c.bf16 %v4356_v9, %v4340_v39  ;;  %v5150_v2 = vld [vmem:[%s7834_s27 + $0xa8] sm:$0xff]  ;;  %v7167_v39 = vpack.c.bf16 %v5132_v44, %v5131_v54  ;;  %v7199_v9 = vpack.c.bf16 %v5164_v60, %v5163_v57  ;;  %v5187_v33 = vld [vmem:[%s7834_s27 + $0x1d0] sm:$0xff]  ;;  %v5189_v44 = vld [vmem:[%s7834_s27 + $0x1e0] sm:$0xff] }
0x1b61   : > { %7552 = vrcp.f32 %v4316_v11  ;;  %v4342_v11 = vld [vmem:[%s7822_s22 + $0x78] sm:$0xff]  ;;  %v5139_v47 = vld [vmem:[%s7834_s27 + $0x50] sm:$0xff]  ;;  %v5158_v54 = vld [vmem:[%s7834_s27 + $0xe8] sm:$0xff] }
0x1b62   : > { %v5141_v60 = vld [vmem:[%s7834_s27 + $0x60] sm:$0xff] }
0x1b67   : > { %v7551_v18 = vpop.eup %7550 }
0x1b68   : > { %v4318_v17 = vmul.f32 %v7551_v18, %v4299_v15  ;;  %v4355_v15 = vld [vmem:[%s7822_s22 + $0xe0] sm:$0xff]  ;;  %v7153_v18 = vpack.c.bf16 %v4358_v46, %v4342_v11  ;;  %v5134_v46 = vld [vmem:[%s7834_s27 + $0x28] sm:$0xff] }
0x1b69   : > { %v5133_v11 = vld [vmem:[%s7834_s27 + $0x20] sm:$0xff] }
0x1b6a   : > { %v8383_v24 = vadd.f32 %v4324_v14, %v4318_v17  ;;  %v4388_v17 = vld [vmem:[%s7822_s22 + $0x1e8] sm:$0xff] }
0x1b6b   : > { %v7553_v58 = vpop.eup %7552  ;;  %v7149_v26 = vpack.c.bf16 %v4388_v17, %v4372_v10  ;;  %v5135_v10 = vld [vmem:[%s7834_s27 + $0x30] sm:$0xff]  ;;  %v5136_v17 = vld [vmem:[%s7834_s27 + $0x38] sm:$0xff] }
0x1b6c   : > { %v4320_v30 = vmul.f32 %v7553_v58, %v4300_v8  ;;  %6415 = vmatmul.mubr.msk.f32.vlgmr.msra.gmra.mrb[40].mxu1 %vm972_vm1, %v8383_v24  ;;  %6417 = vmatmul.mubr.msk.f32.vlgmr.msra.gmra.mrb[34].mxu0 %vm972_vm1, %v8383_v24  ;;  %v4373_v8 = vld [vmem:[%s7822_s22 + $0x170] sm:$0xff]  ;;  %v5145_v58 = vld [vmem:[%s7834_s27 + $0x80] sm:$0xff] }
0x1b6d   : > { %7116 = vmatpush1.bf16.msra.mxu1 %v7115_v19  ;;  %7124 = vmatpush1.bf16.msra.mxu0 %v7123_v23  ;;  %v7155_v19 = vpack.c.bf16 %v4357_v16, %v4341_v5  ;;  %v4371_v23 = vld [vmem:[%s7822_s22 + $0x160] sm:$0xff]  ;;  %v7159_v12 = vpack.c.bf16 %v4389_v25, %v4373_v8  ;;  %v5183_v5 = vld [vmem:[%s7834_s27 + $0x1b0] sm:$0xff]  ;;  %v5184_v16 = vld [vmem:[%s7834_s27 + $0x1b8] sm:$0xff]  ;;  %v7175_v25 = vpack.c.bf16 %v5136_v17, %v5135_v10 }
0x1b6e   : > { %4551 = vmatprep.mubr.f32.mxu1 %v7617_v53  ;;  %4628 = vmatprep.mubr.f32.mxu0 %v7617_v53  ;;  %v8399_v42 = vadd.f32 %v4324_v14, %v4320_v30  ;;  %v4339_v14 = vld [vmem:[%s7822_s22 + $0x60] sm:$0xff]  ;;  %v7151_v30 = vpack.c.bf16 %v4387_v21, %v4371_v23  ;;  %v7205_v22 = vpack.c.bf16 %v5184_v16, %v5183_v5  ;;  %v5154_v23 = vld [vmem:[%s7834_s27 + $0xc8] sm:$0xff] }
0x1b6f   : > { %7118 = vmatprep.subr.bf16.mxu1 %v7117_v28  ;;  %7126 = vmatprep.subr.bf16.mxu0 %v7125_v62  ;;  %v7147_v59 = vpack.c.bf16 %v4355_v15, %v4339_v14  ;;  %v5146_v28 = vld [vmem:[%s7834_s27 + $0x88] sm:$0xff]  ;;  %v5177_v62 = vld [vmem:[%s7834_s27 + $0x180] sm:$0xff]  ;;  %v5151_v15 = vld [vmem:[%s7834_s27 + $0xb0] sm:$0xff] }
0x1b70   : > { %6416 = vmatmul.mubr.msk.f32.gmra.mrb[42].mxu1 %vm972_vm1, %v8399_v42  ;;  %6418 = vmatmul.mubr.msk.f32.gmra.mrb[36].mxu0 %vm972_vm1, %v8399_v42  ;;  %v5166_v14 = vld [vmem:[%s7834_s27 + $0x128] sm:$0xff]  ;;  %v5185_v21 = vld [vmem:[%s7834_s27 + $0x1c0] sm:$0xff] }
0x1b71   : > { %7120 = vmatpush1.bf16.msra.mxu1 %v7119_v34  ;;  %7128 = vmatpush1.bf16.msra.mxu0 %v7127_v36  ;;  %v7161_v34 = vpack.c.bf16 %v5146_v28, %v5145_v58  ;;  %v7193_v36 = vpack.c.bf16 %v5178_v29, %v5177_v62  ;;  %v5186_v8 = vld [vmem:[%s7834_s27 + $0x1c8] sm:$0xff]  ;;  %v5169_v29 = vld [vmem:[%s7834_s27 + $0x140] sm:$0xff] }
0x1b72   : > { %4699 = vmatprep.mubr.f32.mxu1 %v7617_v53  ;;  %4776 = vmatprep.mubr.f32.mxu0 %v7617_v53  ;;  %v5138_v58 = vld [vmem:[%s7834_s27 + $0x48] sm:$0xff]  ;;  %v7209_v62 = vpack.c.bf16 %v5186_v8, %v5185_v21  ;;  %v5209_v17 = vld [vmem:[%s7834_s27 + $0x280] sm:$0xff] }
0x1b73   : > { %7130 = vmatprep.subr.bf16.mxu1 %v7129_v4  ;;  %7138 = vmatprep.subr.bf16.mxu0 %v7137_v50  ;;  %v5179_v4 = vld [vmem:[%s7834_s27 + $0x190] sm:$0xff]  ;;  %v5180_v50 = vld [vmem:[%s7834_s27 + $0x198] sm:$0xff] }
0x1b74   : > { %6419 = vmatmul.mubr.msk.f32.vlgmr.msra.gmra.mrb[44].mxu1 %vm972_vm1, %v8383_v24  ;;  %6421 = vmatmul.mubr.msk.f32.vlgmr.msra.gmra.mrb[38].mxu0 %vm972_vm1, %v8383_v24 }
0x1b75   : > { %7132 = vmatpush1.bf16.msra.mxu1 %v7131_v55  ;;  %7140 = vmatpush1.bf16.msra.mxu0 %v7139_v40  ;;  %v7165_v55 = vpack.c.bf16 %v5148_v49, %v5147_v48  ;;  %v7197_v40 = vpack.c.bf16 %v5180_v50, %v5179_v4  ;;  %v5140_v48 = vld [vmem:[%s7834_s27 + $0x58] sm:$0xff]  ;;  %v5171_v50 = vld [vmem:[%s7834_s27 + $0x150] sm:$0xff] }
0x1b76   : > { %4705 = vmatprep.mubr.f32.mxu1 %v7617_v53  ;;  %4782 = vmatprep.mubr.f32.mxu0 %v7617_v53 }
0x1b77   : > { %7134 = vmatprep.subr.bf16.mxu1 %v7133_v63  ;;  %7142 = vmatprep.subr.bf16.mxu0 %v7141_v0  ;;  %v5181_v63 = vld [vmem:[%s7834_s27 + $0x1a0] sm:$0xff]  ;;  %v5182_v0 = vld [vmem:[%s7834_s27 + $0x1a8] sm:$0xff] }
0x1b78   : > { %6420 = vmatmul.mubr.msk.f32.gmra.mrb[46].mxu1 %vm972_vm1, %v8399_v42  ;;  %6422 = vmatmul.mubr.msk.f32.gmra.mrb[40].mxu0 %vm972_vm1, %v8399_v42 }
0x1b79   : > { %7136 = vmatpush1.bf16.msra.mxu1 %v7135_v1  ;;  %7144 = vmatpush1.bf16.msra.mxu0 %v7143_v13  ;;  %v7201_v1 = vpack.c.bf16 %v5182_v0, %v5181_v63  ;;  %v5165_v13 = vld [vmem:[%s7834_s27 + $0x120] sm:$0xff]  ;;  %v5142_v63 = vld [vmem:[%s7834_s27 + $0x68] sm:$0xff] }
0x1b7a   : > { %4853 = vmatprep.mubr.f32.mxu1 %v7617_v53  ;;  %4930 = vmatprep.mubr.f32.mxu0 %v7617_v53  ;;  %v5173_v0 = vld [vmem:[%s7834_s27 + $0x160] sm:$0xff] }
0x1b7b   : > { %7146 = vmatprep.subr.bf16.mxu1 %v7145_v56  ;;  %7154 = vmatprep.subr.bf16.mxu0 %v7153_v18  ;;  %v7171_v56 = vpack.c.bf16 %v5134_v46, %v5133_v11  ;;  %v7203_v18 = vpack.c.bf16 %v5166_v14, %v5165_v13  ;;  %v5159_v46 = vld [vmem:[%s7834_s27 + $0xf0] sm:$0xff]  ;;  %v5192_v14 = vld [vmem:[%s7834_s27 + $0x1f8] sm:$0xff] }
0x1b7c   : > { %6423 = vmatmul.mubr.msk.f32.vlgmr.msra.gmra.mrb[48].mxu1 %vm972_vm1, %v8383_v24  ;;  %6425 = vmatmul.mubr.msk.f32.vlgmr.msra.gmra.mrb[42].mxu0 %vm972_vm1, %v8383_v24 }
0x1b7d   : > { %7148 = vmatpush1.bf16.msra.mxu1 %v7147_v59  ;;  %7156 = vmatpush1.bf16.msra.mxu0 %v7155_v19  ;;  %v5168_v59 = vld [vmem:[%s7834_s27 + $0x138] sm:$0xff]  ;;  %v5153_v19 = vld [vmem:[%s7834_s27 + $0xc0] sm:$0xff] }
0x1b7e   : > { %4859 = vmatprep.mubr.f32.mxu1 %v7617_v53  ;;  %4936 = vmatprep.mubr.f32.mxu0 %v7617_v53  ;;  %v7177_v28 = vpack.c.bf16 %v5154_v23, %v5153_v19  ;;  %v8537_v23 = vld [vmem:[%s7828_s20] sm:$0xff] }
0x1b7f   : > { %7150 = vmatprep.subr.bf16.mxu1 %v7149_v26  ;;  %7158 = vmatprep.subr.bf16.mxu0 %v7157_v27  ;;  %v5137_v27 = vld [vmem:[%s7834_s27 + $0x40] sm:$0xff]  ;;  %v4398_v21 = vrot.slane %v8537_v23, %v7866_v38  ;;  %v4406_v8 = vrot.slane %v8537_v23, %v8108_v37 }
0x1b80   : > { %6424 = vmatmul.mubr.msk.f32.gmra.mrb[50].mxu1 %vm972_vm1, %v8399_v42  ;;  %6426 = vmatmul.mubr.msk.f32.gmra.mrb[44].mxu0 %vm972_vm1, %v8399_v42 }
0x1b81   : > { %7152 = vmatpush1.bf16.msra.mxu1 %v7151_v30  ;;  %7160 = vmatpush1.bf16.msra.mxu0 %v7159_v12  ;;  %v5170_v30 = vld [vmem:[%s7834_s27 + $0x148] sm:$0xff]  ;;  %v5155_v12 = vld [vmem:[%s7834_s27 + $0xd0] sm:$0xff] }
0x1b82   : > { %5007 = vmatprep.mubr.f32.mxu1 %v7617_v53  ;;  %5084 = vmatprep.mubr.f32.mxu0 %v7617_v53  ;;  %v7211_v41 = vpack.c.bf16 %v5170_v30, %v5169_v29  ;;  %v7181_v49 = vpack.c.bf16 %v5156_v31, %v5155_v12  ;;  %v5225_v29 = vld [vmem:[%s7834_s27 + $0x300] sm:$0xff]  ;;  %v5226_v30 = vld [vmem:[%s7834_s27 + $0x308] sm:$0xff]  ;;  %v5211_v12 = vld [vmem:[%s7834_s27 + $0x290] sm:$0xff] }
0x1b83   : > { %7162 = vmatprep.subr.bf16.mxu1 %v7161_v34  ;;  %7194 = vmatprep.subr.bf16.mxu0 %v7193_v36  ;;  %v5188_v34 = vld [vmem:[%s7834_s27 + $0x1d8] sm:$0xff]  ;;  %v7179_v36 = vpack.c.bf16 %v5138_v58, %v5137_v27  ;;  %v5193_v27 = vld [vmem:[%s7834_s27 + $0x200] sm:$0xff]  ;;  %v5194_v58 = vld [vmem:[%s7834_s27 + $0x208] sm:$0xff] }
0x1b84   : > { %6427 = vmatmul.mubr.msk.f32.vlgmr.msra.gmra.mrb[52].mxu1 %vm972_vm1, %v8383_v24  ;;  %6429 = vmatmul.mubr.msk.f32.vlgmr.msra.gmra.mrb[46].mxu0 %vm972_vm1, %v8383_v24  ;;  %v7169_v24 = vpack.c.bf16 %v5150_v2, %v5149_v35  ;;  %v7213_v4 = vpack.c.bf16 %v5188_v34, %v5187_v33 }
0x1b85   : > { %5013 = vmatprep.mubr.f32.mxu1 %v7617_v53  ;;  %5090 = vmatprep.mubr.f32.mxu0 %v7617_v53  ;;  %v5152_v53 = vld [vmem:[%s7834_s27 + $0xb8] sm:$0xff] }
0x1b86   : > { %7164 = vmatpush3.bf16.msra.mxu1 %v7163_v51  ;;  %7196 = vmatpush3.bf16.msra.mxu0 %v7195_v52  ;;  %v7173_v20 = vpack.c.bf16 %v5152_v53, %v5151_v15  ;;  %v5172_v51 = vld [vmem:[%s7834_s27 + $0x158] sm:$0xff]  ;;  %v5157_v52 = vld [vmem:[%s7834_s27 + $0xe0] sm:$0xff]  ;;  %v5143_v15 = vld [vmem:[%s7834_s27 + $0x70] sm:$0xff] }
0x1b87   : > { %7166 = vmatprep.subr.bf16.mxu1 %v7165_v55  ;;  %7198 = vmatprep.subr.bf16.mxu0 %v7197_v40  ;;  %v5190_v55 = vld [vmem:[%s7834_s27 + $0x1e8] sm:$0xff]  ;;  %v7183_v40 = vpack.c.bf16 %v5140_v48, %v5139_v47  ;;  %v7215_v57 = vpack.c.bf16 %v5172_v51, %v5171_v50  ;;  %v7185_v35 = vpack.c.bf16 %v5158_v54, %v5157_v52  ;;  %v5144_v53 = vld [vmem:[%s7834_s27 + $0x78] sm:$0xff]  ;;  %v5243_v47 = vld [vmem:[%s7834_s27 + $0x390] sm:$0xff]  ;;  %v4425_v50 = vsub.s32 7, %v7863_v32 }
0x1b88   : > { %6428 = vmatmul.mubr.msk.f32.gmra.mrb[54].mxu1 %vm972_vm1, %v8399_v42  ;;  %6430 = vmatmul.mubr.msk.f32.gmra.mrb[48].mxu0 %vm972_vm1, %v8399_v42  ;;  %v5167_v42 = vld [vmem:[%s7834_s27 + $0x130] sm:$0xff]  ;;  %v7217_v2 = vpack.c.bf16 %v5190_v55, %v5189_v44  ;;  %v7191_v16 = vpack.c.bf16 %v5144_v53, %v5143_v15  ;;  %v5244_v48 = vld [vmem:[%s7834_s27 + $0x398] sm:$0xff]  ;;  %v7227_v51 = vpack.c.bf16 %v5194_v58, %v5193_v27 }
0x1b89   : > { %v7207_v26 = vpack.c.bf16 %v5168_v59, %v5167_v42  ;;  %v5242_v59 = vld [vmem:[%s7834_s27 + $0x388] sm:$0xff]  ;;  %v7259_v52 = vpack.c.bf16 %v5226_v30, %v5225_v29  ;;  %v8558_v54 = vrot.slane %v8537_v23, %v8367_v61  ;;  %v5195_v44 = vld [vmem:[%s7834_s27 + $0x210] sm:$0xff] }
0x1b8a   : > { %7168 = vmatpush3.bf16.msra.mxu1 %v7167_v39  ;;  %7200 = vmatpush3.bf16.msra.mxu0 %v7199_v9  ;;  %v5174_v39 = vld [vmem:[%s7834_s27 + $0x168] sm:$0xff]  ;;  %v7187_v9 = vpack.c.bf16 %v5142_v63, %v5141_v60  ;;  %v5196_v63 = vld [vmem:[%s7834_s27 + $0x218] sm:$0xff]  ;;  %v5215_v30 = vld [vmem:[%s7834_s27 + $0x2b0] sm:$0xff] }
0x1b8b   : > { %7170 = vmatprep.subr.bf16.mxu1 %v7169_v24  ;;  %7202 = vmatprep.subr.bf16.mxu0 %v7201_v1  ;;  %v7219_v11 = vpack.c.bf16 %v5174_v39, %v5173_v0  ;;  %v5160_v24 = vld [vmem:[%s7834_s27 + $0xf8] sm:$0xff]  ;;  %v5191_v1 = vld [vmem:[%s7834_s27 + $0x1f0] sm:$0xff]  ;;  %v5230_v29 = vld [vmem:[%s7834_s27 + $0x328] sm:$0xff] }
0x1b8c   : > { %v7189_v13 = vpack.c.bf16 %v5160_v24, %v5159_v46  ;;  %v7221_v5 = vpack.c.bf16 %v5192_v14, %v5191_v1  ;;  %v5227_v0 = vld [vmem:[%s7834_s27 + $0x310] sm:$0xff]  ;;  %v5213_v14 = vld [vmem:[%s7834_s27 + $0x2a0] sm:$0xff] }
0x1b8e   : > { %7172 = vmatpush3.bf16.msra.mxu1 %v7171_v56  ;;  %7204 = vmatpush3.bf16.msra.mxu0 %v7203_v18  ;;  %v5175_v56 = vld [vmem:[%s7834_s27 + $0x170] sm:$0xff]  ;;  %v5176_v18 = vld [vmem:[%s7834_s27 + $0x178] sm:$0xff] }
0x1b8f   : > { %7174 = vmatprep.subr.bf16.mxu1 %v7173_v20  ;;  %7206 = vmatprep.subr.bf16.mxu0 %v7205_v22  ;;  %v7223_v10 = vpack.c.bf16 %v5176_v18, %v5175_v56  ;;  %v5210_v20 = vld [vmem:[%s7834_s27 + $0x288] sm:$0xff]  ;;  %v5241_v22 = vld [vmem:[%s7834_s27 + $0x380] sm:$0xff] }
0x1b90   : > { %v7225_v42 = vpack.c.bf16 %v5210_v20, %v5209_v17  ;;  %v7257_v19 = vpack.c.bf16 %v5242_v59, %v5241_v22  ;;  %v5245_v56 = vld [vmem:[%s7834_s27 + $0x3a0] sm:$0xff]  ;;  %v5246_v18 = vld [vmem:[%s7834_s27 + $0x3a8] sm:$0xff]  ;;  %v7231_v59 = vpack.c.bf16 %v5196_v63, %v5195_v44  ;;  %v5200_v44 = vld [vmem:[%s7834_s27 + $0x238] sm:$0xff] }
0x1b91   : > { %v5217_v63 = vld [vmem:[%s7834_s27 + $0x2c0] sm:$0xff] }
0x1b92   : > { %7176 = vmatpush3.bf16.msra.mxu1 %v7175_v25  ;;  %7208 = vmatpush3.bf16.msra.mxu0 %v7207_v26  ;;  %v4402_v25 = vrot.slane %v8537_v23, %v7874_v43  ;;  %v4410_v26 = vrot.slane %v8537_v23, %v8113_v45 }
0x1b93   : > { %7178 = vmatprep.subr.bf16.mxu1 %v7177_v28  ;;  %7210 = vmatprep.subr.bf16.mxu0 %v7209_v62 }
0x1b96   : > { %7180 = vmatpush3.bf16.msra.mxu1 %v7179_v36  ;;  %7212 = vmatpush3.bf16.msra.mxu0 %v7211_v41  ;;  %v5212_v41 = vld [vmem:[%s7834_s27 + $0x298] sm:$0xff] }
0x1b97   : > { %7182 = vmatprep.subr.bf16.mxu1 %v7181_v49  ;;  %7214 = vmatprep.subr.bf16.mxu0 %v7213_v4 }
0x1b9a   : > { %7184 = vmatpush3.bf16.msra.mxu1 %v7183_v40  ;;  %7216 = vmatpush3.bf16.msra.mxu0 %v7215_v57 }
0x1b9b   : > { %7186 = vmatprep.subr.bf16.mxu1 %v7185_v35  ;;  %7218 = vmatprep.subr.bf16.mxu0 %v7217_v2  ;;  %v7229_v35 = vpack.c.bf16 %v5212_v41, %v5211_v12  ;;  %v7261_v2 = vpack.c.bf16 %v5244_v48, %v5243_v47 }
0x1b9e   : > { %7188 = vmatpush3.bf16.msra.mxu1 %v7187_v9  ;;  %7220 = vmatpush3.bf16.msra.mxu0 %v7219_v11 }
0x1b9f   : > { %7190 = vmatprep.subr.bf16.mxu1 %v7189_v13  ;;  %7222 = vmatprep.subr.bf16.mxu0 %v7221_v5  ;;  %v5228_v13 = vld [vmem:[%s7834_s27 + $0x318] sm:$0xff]  ;;  %v8568_v5 = vrot.slane %v8537_v23, %v4425_v50 }
0x1ba2   : > { %7192 = vmatpush3.bf16.msra.mxu1 %v7191_v16  ;;  %7224 = vmatpush3.bf16.msra.mxu0 %v7223_v10  ;;  %v5214_v16 = vld [vmem:[%s7834_s27 + $0x2a8] sm:$0xff]  ;;  %v5197_v10 = vld [vmem:[%s7834_s27 + $0x220] sm:$0xff] }
0x1ba3   : > { %7226 = vmatprep.subr.bf16.mxu1 %v7225_v42  ;;  %7258 = vmatprep.subr.bf16.mxu0 %v7257_v19  ;;  %v7263_v19 = vpack.c.bf16 %v5228_v13, %v5227_v0  ;;  %v5218_v0 = vld [vmem:[%s7834_s27 + $0x2c8] sm:$0xff]  ;;  %v5201_v13 = vld [vmem:[%s7834_s27 + $0x240] sm:$0xff] }
0x1c3f   : > { %v4547_v28 = vpop.f32.mrb[40].mxu1  ;;  %v4624_v62 = vpop.f32.mrb[34].mxu0 }
0x1c40   : > { %v4548_v31 = vadd.f32 %v4547_v28, %v4398_v21  ;;  %v4625_v33 = vadd.f32 %v4624_v62, %v4406_v8  ;;  %v4549_v34 = vpop.f32.mrb[41].mxu1  ;;  %v4626_v36 = vpop.f32.mrb[35].mxu0  ;;  %v7233_v28 = vpack.c.bf16 %v5214_v16, %v5213_v14  ;;  %v7265_v62 = vpack.c.bf16 %v5246_v18, %v5245_v56  ;;  %v5202_v14 = vld [vmem:[%s7834_s27 + $0x248] sm:$0xff]  ;;  %v5233_v18 = vld [vmem:[%s7834_s27 + $0x340] sm:$0xff] }
0x1c41   : > { %v4550_v49 = vadd.f32 %v4549_v34, %v4402_v25  ;;  %v4627_v4 = vadd.f32 %v4626_v36, %v4410_v26  ;;  %v5247_v34 = vld [vmem:[%s7834_s27 + $0x3b0] sm:$0xff]  ;;  %v5248_v36 = vld [vmem:[%s7834_s27 + $0x3b8] sm:$0xff]  ;;  %v7241_v16 = vpack.c.bf16 %v5218_v0, %v5217_v63 }
0x1c42   : > { %v5097_v39 = vmax.f32 %v4548_v31, 0.0  ;;  %v5099_v9 = vmax.f32 %v4625_v33, 0.0  ;;  %v5216_v33 = vld [vmem:[%s7834_s27 + $0x2b8] sm:$0xff] }
0x1c43   : > { %v5098_v55 = vmax.f32 %v4550_v49, 0.0  ;;  %v5100_v40 = vmax.f32 %v4627_v4, 0.0  ;;  %v4553_v57 = vpop.f32.mrb[42].mxu1  ;;  %v4630_v60 = vpop.f32.mrb[36].mxu0 }
0x1c44   : > { %v4554_v11 = vadd.f32 %v4553_v57, %v4398_v21  ;;  %v4631_v46 = vadd.f32 %v4630_v60, %v4406_v8  ;;  %v4555_v24 = vpop.f32.mrb[43].mxu1  ;;  %v4632_v1 = vpop.f32.mrb[37].mxu0  ;;  %v5198_v21 = vld [vmem:[%s7834_s27 + $0x228] sm:$0xff]  ;;  %v5229_v8 = vld [vmem:[%s7834_s27 + $0x320] sm:$0xff]  ;;  %v7237_v57 = vpack.c.bf16 %v5216_v33, %v5215_v30  ;;  %v7269_v60 = vpack.c.bf16 %v5248_v36, %v5247_v34  ;;  %v5235_v34 = vld [vmem:[%s7834_s27 + $0x350] sm:$0xff] }
0x1c45   : > { %v4556_v15 = vadd.f32 %v4555_v24, %v4402_v25  ;;  %v4633_v53 = vadd.f32 %v4632_v1, %v4410_v26  ;;  %5449 = vmatprep.mubr.f32.mxu1 %v5098_v55  ;;  %5524 = vmatprep.mubr.f32.mxu0 %v5100_v40  ;;  %v7235_v4 = vpack.c.bf16 %v5198_v21, %v5197_v10  ;;  %v5234_v10 = vld [vmem:[%s7834_s27 + $0x348] sm:$0xff]  ;;  %v4421_v21 = vsub.s32 6, %v7863_v32  ;;  %v5236_v36 = vld [vmem:[%s7834_s27 + $0x358] sm:$0xff] }
0x1c46   : > { %5450 = vmatmul.mubr.f32.vlgmr.msra.gmra.mrb[56].mxu1 %v5097_v39  ;;  %5525 = vmatmul.mubr.f32.vlgmr.msra.gmra.mrb[50].mxu0 %v5099_v9  ;;  %v5113_v25 = vmax.f32 %v4554_v11, 0.0  ;;  %v5115_v26 = vmax.f32 %v4631_v46, 0.0  ;;  %v5249_v39 = vld [vmem:[%s7834_s27 + $0x3c0] sm:$0xff]  ;;  %v5250_v9 = vld [vmem:[%s7834_s27 + $0x3c8] sm:$0xff] }
0x1c47   : > { %v5114_v17 = vmax.f32 %v4556_v15, 0.0  ;;  %v5116_v20 = vmax.f32 %v4633_v53, 0.0  ;;  %7228 = vmatpush3.bf16.msra.mxu1 %v7227_v51  ;;  %7260 = vmatpush3.bf16.msra.mxu0 %v7259_v52  ;;  %v8574_v22 = vpop.f32.mrb[44].mxu1  ;;  %v8576_v42 = vpop.f32.mrb[38].mxu0  ;;  %v7267_v51 = vpack.c.bf16 %v5230_v29, %v5229_v8  ;;  %v5199_v52 = vld [vmem:[%s7834_s27 + $0x230] sm:$0xff]  ;;  %v7273_v56 = vpack.c.bf16 %v5250_v9, %v5249_v39  ;;  %v8621_v8 = vld [vmem:[%s7828_s20 + $0x8] sm:$0xff]  ;;  %s8983_s20 = scalar_lea.vmem %s8927_s18, %s7764_s25 }
0x1c48   : > { %v4703_v27 = vpop.f32.mrb[45].mxu1  ;;  %v4780_v58 = vpop.f32.mrb[39].mxu0  ;;  %7230 = vmatprep.subr.bf16.mxu1 %v7229_v35  ;;  %7262 = vmatprep.subr.bf16.mxu0 %v7261_v2  ;;  %v5231_v35 = vld [vmem:[%s7834_s27 + $0x330] sm:$0xff]  ;;  %v5232_v2 = vld [vmem:[%s7834_s27 + $0x338] sm:$0xff]  ;;  %v7239_v24 = vpack.c.bf16 %v5200_v44, %v5199_v52  ;;  %v5254_v52 = vld [vmem:[%s7834_s27 + $0x3e8] sm:$0xff] }
0x1c49   : > { %v4704_v12 = vadd.f32 %v4703_v27, %v8558_v54  ;;  %v4781_v31 = vadd.f32 %v4780_v58, %v8568_v5  ;;  %5454 = vmatprep.mubr.f32.mxu1 %v5114_v17  ;;  %5529 = vmatprep.mubr.f32.mxu0 %v5116_v20  ;;  %v7271_v1 = vpack.c.bf16 %v5232_v2, %v5231_v35  ;;  %v5219_v17 = vld [vmem:[%s7834_s27 + $0x2d0] sm:$0xff]  ;;  %v5220_v20 = vld [vmem:[%s7834_s27 + $0x2d8] sm:$0xff]  ;;  %v5205_v2 = vld [vmem:[%s7834_s27 + $0x260] sm:$0xff] }
0x1c4a   : > { %5455 = vmatmul.mubr.f32.gmra.mrb[58].mxu1 %v5113_v25  ;;  %5530 = vmatmul.mubr.f32.gmra.mrb[52].mxu0 %v5115_v26  ;;  %v7243_v27 = vpack.c.bf16 %v5202_v14, %v5201_v13  ;;  %v7275_v58 = vpack.c.bf16 %v5234_v10, %v5233_v18  ;;  %v7279_v35 = vpack.c.bf16 %v5236_v36, %v5235_v34  ;;  %v5206_v32 = vld [vmem:[%s7834_s27 + $0x268] sm:$0xff]  ;;  %v5223_v13 = vld [vmem:[%s7834_s27 + $0x2f0] sm:$0xff]  ;;  %v5256_v18 = vld [vmem:[%s7834_s27 + $0x3f8] sm:$0xff] }
0x1c4b   : > { %v5102_v41 = vmax.f32 %v4704_v12, 0.0  ;;  %v5104_v47 = vmax.f32 %v4781_v31, 0.0  ;;  %7232 = vmatpush3.bf16.msra.mxu1 %v7231_v59  ;;  %7264 = vmatpush3.bf16.msra.mxu0 %v7263_v19  ;;  %v8587_v48 = vpop.f32.mrb[46].mxu1  ;;  %v8589_v49 = vpop.f32.mrb[40].mxu0  ;;  %v5251_v59 = vld [vmem:[%s7834_s27 + $0x3d0] sm:$0xff]  ;;  %v5252_v19 = vld [vmem:[%s7834_s27 + $0x3d8] sm:$0xff]  ;;  %v4454_v12 = vrot.slane %v8621_v8, %v4421_v21  ;;  %v7245_v31 = vpack.c.bf16 %v5220_v20, %v5219_v17 }
0x1c4c   : > { %v8593_v55 = vpop.f32.mrb[47].mxu1  ;;  %v8595_v40 = vpop.f32.mrb[41].mxu0  ;;  %7234 = vmatprep.subr.bf16.mxu1 %v7233_v28  ;;  %7266 = vmatprep.subr.bf16.mxu0 %v7265_v62  ;;  %v5203_v28 = vld [vmem:[%s7834_s27 + $0x250] sm:$0xff]  ;;  %v5204_v62 = vld [vmem:[%s7834_s27 + $0x258] sm:$0xff]  ;;  %v7277_v33 = vpack.c.bf16 %v5252_v19, %v5251_v59  ;;  %v4414_v10 = vrot.slane %v8537_v23, %v8364_v7  ;;  %v4422_v17 = vrot.slane %v8537_v23, %v4421_v21 }
0x1c4d   : > { %5599 = vmatprep.mubr.f32.mxu1 %v5102_v41  ;;  %5674 = vmatprep.mubr.f32.mxu0 %v5104_v47  ;;  %v5221_v41 = vld [vmem:[%s7834_s27 + $0x2e0] sm:$0xff]  ;;  %v4458_v47 = vrot.slane %v8621_v8, %v4425_v50  ;;  %v7251_v19 = vpack.c.bf16 %v5206_v32, %v5205_v2  ;;  %v5240_v36 = vld [vmem:[%s7834_s27 + $0x378] sm:$0xff] }
0x1c4f   : > { %7236 = vmatpush3.bf16.msra.mxu1 %v7235_v4  ;;  %7268 = vmatpush3.bf16.msra.mxu0 %v7267_v51  ;;  %v8603_v11 = vpop.f32.mrb[48].mxu1  ;;  %v8605_v46 = vpop.f32.mrb[42].mxu0  ;;  %v5222_v4 = vld [vmem:[%s7834_s27 + $0x2e8] sm:$0xff]  ;;  %v5253_v51 = vld [vmem:[%s7834_s27 + $0x3e0] sm:$0xff] }
0x1c50   : > { %v8609_v15 = vpop.f32.mrb[49].mxu1  ;;  %v8611_v53 = vpop.f32.mrb[43].mxu0  ;;  %7238 = vmatprep.subr.bf16.mxu1 %v7237_v57  ;;  %7270 = vmatprep.subr.bf16.mxu0 %v7269_v60  ;;  %v7247_v60 = vpack.c.bf16 %v5204_v62, %v5203_v28  ;;  %v7249_v39 = vpack.c.bf16 %v5222_v4, %v5221_v41  ;;  %v7281_v9 = vpack.c.bf16 %v5254_v52, %v5253_v51  ;;  %v5208_v28 = vld [vmem:[%s7834_s27 + $0x278] sm:$0xff]  ;;  %v5239_v62 = vld [vmem:[%s7834_s27 + $0x370] sm:$0xff]  ;;  %v5273_v41 = vld [vmem:[%s7834_s27 + $0x480] sm:$0xff] }
0x1c51   : > { %v5274_v4 = vld [vmem:[%s7834_s27 + $0x488] sm:$0xff]  ;;  %v5305_v52 = vld [vmem:[%s7834_s27 + $0x580] sm:$0xff]  ;;  %v7287_v2 = vpack.c.bf16 %v5240_v36, %v5239_v62  ;;  %v5260_v62 = vld [vmem:[%s7834_s27 + $0x418] sm:$0xff] }
0x1c52   : > { %v7289_v32 = vpack.c.bf16 %v5274_v4, %v5273_v41  ;;  %v5291_v41 = vld [vmem:[%s7834_s27 + $0x510] sm:$0xff]  ;;  %v5292_v4 = vld [vmem:[%s7834_s27 + $0x518] sm:$0xff] }
0x1c53   : > { %7240 = vmatpush3.bf16.msra.mxu1 %v7239_v24  ;;  %7272 = vmatpush3.bf16.msra.mxu0 %v7271_v1  ;;  %v8623_v25 = vpop.f32.mrb[50].mxu1  ;;  %v8625_v26 = vpop.f32.mrb[44].mxu0  ;;  %v5237_v24 = vld [vmem:[%s7834_s27 + $0x360] sm:$0xff]  ;;  %v5238_v1 = vld [vmem:[%s7834_s27 + $0x368] sm:$0xff] }
0x1c54   : > { %v8629_v29 = vpop.f32.mrb[51].mxu1  ;;  %v8631_v30 = vpop.f32.mrb[45].mxu0  ;;  %7242 = vmatprep.subr.bf16.mxu1 %v7241_v16  ;;  %7274 = vmatprep.subr.bf16.mxu0 %v7273_v56  ;;  %v5224_v16 = vld [vmem:[%s7834_s27 + $0x2f8] sm:$0xff]  ;;  %v5255_v56 = vld [vmem:[%s7834_s27 + $0x3f0] sm:$0xff] }
0x1c55   : > { %v7285_v34 = vpack.c.bf16 %v5256_v18, %v5255_v56  ;;  %v5308_v56 = vld [vmem:[%s7834_s27 + $0x598] sm:$0xff]  ;;  %v4710_v18 = vadd.f32 %v8593_v55, %v8558_v54 }
0x1c57   : > { %7244 = vmatpush3.bf16.msra.mxu1 %v7243_v27  ;;  %7276 = vmatpush3.bf16.msra.mxu0 %v7275_v58  ;;  %v8643_v44 = vpop.f32.mrb[52].mxu1  ;;  %v5086_v57 = vpop.f32.mrb[46].mxu0  ;;  %v7283_v27 = vpack.c.bf16 %v5238_v1, %v5237_v24  ;;  %v5207_v58 = vld [vmem:[%s7834_s27 + $0x270] sm:$0xff]  ;;  %v4702_v24 = vadd.f32 %v8574_v22, %v4414_v10  ;;  %v8698_v22 = vrot.slane %v8621_v8, %v8113_v45 }
0x1c58   : > { %v8647_v63 = vadd.f32 %v5086_v57, %v4454_v12  ;;  %v8649_v50 = vpop.f32.mrb[53].mxu1  ;;  %v5088_v0 = vpop.f32.mrb[47].mxu0  ;;  %7246 = vmatprep.subr.bf16.mxu1 %v7245_v31  ;;  %7278 = vmatprep.subr.bf16.mxu0 %v7277_v33  ;;  %v7253_v33 = vpack.c.bf16 %v5224_v16, %v5223_v13  ;;  %v5306_v57 = vld [vmem:[%s7834_s27 + $0x588] sm:$0xff]  ;;  %v5276_v13 = vld [vmem:[%s7834_s27 + $0x498] sm:$0xff]  ;;  %v5307_v16 = vld [vmem:[%s7834_s27 + $0x590] sm:$0xff] }
0x1c59   : > { %v8654_v14 = vadd.f32 %v5088_v0, %v4458_v47  ;;  %v5289_v0 = vld [vmem:[%s7834_s27 + $0x500] sm:$0xff]  ;;  %v7321_v1 = vpack.c.bf16 %v5306_v57, %v5305_v52  ;;  %v7325_v55 = vpack.c.bf16 %v5308_v56, %v5307_v16  ;;  %v5259_v45 = vld [vmem:[%s7834_s27 + $0x410] sm:$0xff]  ;;  %v4935_v36 = vadd.f32 %v8611_v53, %v8698_v22 }
0x1c5a   : > { %v7295_v53 = vpack.c.bf16 %v5260_v62, %v5259_v45  ;;  %v7327_v57 = vpack.c.bf16 %v5292_v4, %v5291_v41  ;;  %v5297_v41 = vld [vmem:[%s7834_s27 + $0x540] sm:$0xff]  ;;  %v5298_v4 = vld [vmem:[%s7834_s27 + $0x548] sm:$0xff] }
0x1c5b   : > { %7248 = vmatpush3.bf16.msra.mxu1 %v7247_v60  ;;  %7280 = vmatpush3.bf16.msra.mxu0 %v7279_v35  ;;  %v8662_v20 = vpop.f32.mrb[54].mxu1  ;;  %v5092_v59 = vpop.f32.mrb[48].mxu0  ;;  %v5258_v60 = vld [vmem:[%s7834_s27 + $0x408] sm:$0xff]  ;;  %v7255_v35 = vpack.c.bf16 %v5208_v28, %v5207_v58  ;;  %v5101_v58 = vmax.f32 %v4702_v24, 0.0  ;;  %v4785_v28 = vadd.f32 %v8589_v49, %v4422_v17  ;;  %v5279_v24 = vld [vmem:[%s7834_s27 + $0x4b0] sm:$0xff] }
0x1c5c   : > { %v8667_v31 = vadd.f32 %v5092_v59, %v4454_v12  ;;  %v8669_v23 = vpop.f32.mrb[55].mxu1  ;;  %v5094_v21 = vpop.f32.mrb[49].mxu0  ;;  %7250 = vmatprep.subr.bf16.mxu1 %v7249_v39  ;;  %7282 = vmatprep.subr.bf16.mxu0 %v7281_v9  ;;  %v5257_v12 = vld [vmem:[%s7834_s27 + $0x400] sm:$0xff]  ;;  %v5290_v39 = vld [vmem:[%s7834_s27 + $0x508] sm:$0xff]  ;;  %v5275_v9 = vld [vmem:[%s7834_s27 + $0x490] sm:$0xff]  ;;  %v4787_v59 = vadd.f32 %v8595_v40, %v8568_v5  ;;  %v4708_v40 = vadd.f32 %v8587_v48, %v4414_v10 }
0x1c5d   : > { %v8674_v51 = vadd.f32 %v5094_v21, %v4458_v47  ;;  %v4779_v47 = vadd.f32 %v8576_v42, %v4422_v17  ;;  %v7291_v42 = vpack.c.bf16 %v5258_v60, %v5257_v12  ;;  %v7293_v54 = vpack.c.bf16 %v5276_v13, %v5275_v9  ;;  %v5277_v48 = vld [vmem:[%s7834_s27 + $0x4a0] sm:$0xff]  ;;  %v5278_v49 = vld [vmem:[%s7834_s27 + $0x4a8] sm:$0xff]  ;;  %v5312_v13 = vld [vmem:[%s7834_s27 + $0x5b8] sm:$0xff] }
0x1c5e   : > { %v5118_v21 = vmax.f32 %v4710_v18, 0.0  ;;  %v5309_v10 = vld [vmem:[%s7834_s27 + $0x5a0] sm:$0xff]  ;;  %v5310_v17 = vld [vmem:[%s7834_s27 + $0x5a8] sm:$0xff]  ;;  %v5117_v52 = vmax.f32 %v4708_v40, 0.0  ;;  %v5263_v18 = vld [vmem:[%s7834_s27 + $0x430] sm:$0xff] }
0x1c5f   : > { %7252 = vmatpush3.bf16.msra.mxu1 %v7251_v19  ;;  %7284 = vmatpush3.bf16.msra.mxu0 %v7283_v27  ;;  %v8694_v19 = vrot.slane %v8621_v8, %v7874_v43  ;;  %v7323_v27 = vpack.c.bf16 %v5290_v39, %v5289_v0  ;;  %v5103_v5 = vmax.f32 %v4779_v47, 0.0  ;;  %v5261_v12 = vld [vmem:[%s7834_s27 + $0x420] sm:$0xff]  ;;  %v5262_v60 = vld [vmem:[%s7834_s27 + $0x428] sm:$0xff]  ;;  %v7329_v0 = vpack.c.bf16 %v5310_v17, %v5309_v10  ;;  %v5280_v47 = vld [vmem:[%s7834_s27 + $0x4b8] sm:$0xff] }
0x1c60   : > { %7254 = vmatprep.subr.bf16.mxu1 %v7253_v33  ;;  %7286 = vmatprep.subr.bf16.mxu0 %v7285_v34  ;;  %v5120_v33 = vmax.f32 %v4787_v59, 0.0  ;;  %v5293_v39 = vld [vmem:[%s7834_s27 + $0x520] sm:$0xff]  ;;  %v5294_v9 = vld [vmem:[%s7834_s27 + $0x528] sm:$0xff]  ;;  %v7299_v16 = vpack.c.bf16 %v5262_v60, %v5261_v12  ;;  %v5264_v59 = vld [vmem:[%s7834_s27 + $0x438] sm:$0xff] }
0x1c61   : > { %v4858_v34 = vadd.f32 %v8609_v15, %v8694_v19  ;;  %v5119_v15 = vmax.f32 %v4785_v28, 0.0  ;;  %v7331_v56 = vpack.c.bf16 %v5294_v9, %v5293_v39  ;;  %v5313_v40 = vld [vmem:[%s7834_s27 + $0x5c0] sm:$0xff]  ;;  %v5314_v28 = vld [vmem:[%s7834_s27 + $0x5c8] sm:$0xff]  ;;  %v7303_v45 = vpack.c.bf16 %v5264_v59, %v5263_v18  ;;  %v5315_v10 = vld [vmem:[%s7834_s27 + $0x5d0] sm:$0xff] }
0x1c62   : > { %v5316_v17 = vld [vmem:[%s7834_s27 + $0x5d8] sm:$0xff]  ;;  %v5317_v39 = vld [vmem:[%s7834_s27 + $0x5e0] sm:$0xff]  ;;  %v5318_v9 = vld [vmem:[%s7834_s27 + $0x5e8] sm:$0xff] }
0x1c63   : > { %7256 = vmatpush3.bf16.msra.mxu1 %v7255_v35  ;;  %7288 = vmatpush3.bf16.msra.mxu0 %v7287_v2  ;;  %v5106_v35 = vmax.f32 %v4858_v34, 0.0  ;;  %v5108_v2 = vmax.f32 %v4935_v36, 0.0  ;;  %v7337_v36 = vpack.c.bf16 %v5314_v28, %v5313_v40  ;;  %v7341_v60 = vpack.c.bf16 %v5316_v17, %v5315_v10  ;;  %v5301_v18 = vld [vmem:[%s7834_s27 + $0x560] sm:$0xff]  ;;  %v5302_v59 = vld [vmem:[%s7834_s27 + $0x568] sm:$0xff]  ;;  %v5271_v28 = vld [vmem:[%s7834_s27 + $0x470] sm:$0xff] }
0x1c64   : > { %7290 = vmatprep.subr.bf16.mxu1 %v7289_v32  ;;  %7322 = vmatprep.subr.bf16.mxu0 %v7321_v1  ;;  %v7297_v32 = vpack.c.bf16 %v5278_v49, %v5277_v48  ;;  %v5311_v1 = vld [vmem:[%s7834_s27 + $0x5b0] sm:$0xff]  ;;  %v5284_v49 = vld [vmem:[%s7834_s27 + $0x4d8] sm:$0xff]  ;;  %v7347_v40 = vpack.c.bf16 %v5302_v59, %v5301_v18 }
0x1c65   : > { %v5283_v48 = vld [vmem:[%s7834_s27 + $0x4d0] sm:$0xff] }
0x1c66   : > { %5600 = vmatmul.mubr.f32.vlgmr.msra.gmra.mrb[60].mxu1 %v5101_v58  ;;  %5675 = vmatmul.mubr.f32.vlgmr.msra.gmra.mrb[54].mxu0 %v5103_v5  ;;  %v5281_v58 = vld [vmem:[%s7834_s27 + $0x4c0] sm:$0xff]  ;;  %v5282_v5 = vld [vmem:[%s7834_s27 + $0x4c8] sm:$0xff]  ;;  %v7309_v12 = vpack.c.bf16 %v5284_v49, %v5283_v48 }
0x1c67   : > { %5604 = vmatprep.mubr.f32.mxu1 %v5118_v21  ;;  %5679 = vmatprep.mubr.f32.mxu0 %v5120_v33  ;;  %v5265_v21 = vld [vmem:[%s7834_s27 + $0x440] sm:$0xff]  ;;  %v5266_v33 = vld [vmem:[%s7834_s27 + $0x448] sm:$0xff]  ;;  %v7305_v34 = vpack.c.bf16 %v5282_v5, %v5281_v58  ;;  %v4430_v58 = vrot.slane %v8621_v8, %v7866_v38 }
0x1c68   : > { %7292 = vmatpush3.bf16.msra.mxu1 %v7291_v42  ;;  %7324 = vmatpush3.bf16.msra.mxu0 %v7323_v27  ;;  %v7301_v42 = vpack.c.bf16 %v5280_v47, %v5279_v24  ;;  %v7333_v27 = vpack.c.bf16 %v5312_v13, %v5311_v1  ;;  %v5269_v1 = vld [vmem:[%s7834_s27 + $0x460] sm:$0xff]  ;;  %v5270_v13 = vld [vmem:[%s7834_s27 + $0x468] sm:$0xff] }
0x1c69   : > { %7294 = vmatprep.subr.bf16.mxu1 %v7293_v54  ;;  %7326 = vmatprep.subr.bf16.mxu0 %v7325_v55  ;;  %v5295_v54 = vld [vmem:[%s7834_s27 + $0x530] sm:$0xff]  ;;  %v5296_v55 = vld [vmem:[%s7834_s27 + $0x538] sm:$0xff]  ;;  %v7315_v5 = vpack.c.bf16 %v5270_v13, %v5269_v1  ;;  %v5369_v48 = vld [vmem:[%s7834_s27 + $0x780] sm:$0xff] }
0x1c6a   : > { %5605 = vmatmul.mubr.f32.gmra.mrb[62].mxu1 %v5117_v52  ;;  %5680 = vmatmul.mubr.f32.gmra.mrb[56].mxu0 %v5119_v15  ;;  %v7335_v62 = vpack.c.bf16 %v5296_v55, %v5295_v54  ;;  %v7307_v52 = vpack.c.bf16 %v5266_v33, %v5265_v21  ;;  %v7339_v15 = vpack.c.bf16 %v5298_v4, %v5297_v41  ;;  %v5319_v54 = vld [vmem:[%s7834_s27 + $0x5f0] sm:$0xff]  ;;  %v5320_v55 = vld [vmem:[%s7834_s27 + $0x5f8] sm:$0xff]  ;;  %v5337_v41 = vld [vmem:[%s7834_s27 + $0x680] sm:$0xff] }
0x1c6b   : > { %5749 = vmatprep.mubr.f32.mxu1 %v5106_v35  ;;  %5824 = vmatprep.mubr.f32.mxu0 %v5108_v2  ;;  %v5299_v35 = vld [vmem:[%s7834_s27 + $0x550] sm:$0xff]  ;;  %v5300_v2 = vld [vmem:[%s7834_s27 + $0x558] sm:$0xff]  ;;  %v4438_v21 = vrot.slane %v8621_v8, %v8108_v37  ;;  %v5338_v4 = vld [vmem:[%s7834_s27 + $0x688] sm:$0xff] }
0x1c6c   : > { %7296 = vmatpush3.bf16.msra.mxu1 %v7295_v53  ;;  %7328 = vmatpush3.bf16.msra.mxu0 %v7327_v57  ;;  %v5267_v53 = vld [vmem:[%s7834_s27 + $0x450] sm:$0xff]  ;;  %v5268_v57 = vld [vmem:[%s7834_s27 + $0x458] sm:$0xff]  ;;  %v7343_v47 = vpack.c.bf16 %v5300_v2, %v5299_v35  ;;  %v5370_v49 = vld [vmem:[%s7834_s27 + $0x788] sm:$0xff]  ;;  %v7353_v37 = vpack.c.bf16 %v5338_v4, %v5337_v41 }
0x1c6d   : > { %7298 = vmatprep.subr.bf16.mxu1 %v7297_v32  ;;  %7330 = vmatprep.subr.bf16.mxu0 %v7329_v0  ;;  %v5285_v32 = vld [vmem:[%s7834_s27 + $0x4e0] sm:$0xff]  ;;  %v5286_v0 = vld [vmem:[%s7834_s27 + $0x4e8] sm:$0xff]  ;;  %v7311_v24 = vpack.c.bf16 %v5268_v57, %v5267_v53  ;;  %v4856_v57 = vadd.f32 %v8603_v11, %v4430_v58  ;;  %v5339_v2 = vld [vmem:[%s7834_s27 + $0x690] sm:$0xff] }
0x1c6e   : > { %v5353_v53 = vld [vmem:[%s7834_s27 + $0x700] sm:$0xff]  ;;  %v5354_v35 = vld [vmem:[%s7834_s27 + $0x708] sm:$0xff]  ;;  %v5371_v11 = vld [vmem:[%s7834_s27 + $0x790] sm:$0xff] }
0x1c6f   : > { %v5324_v13 = vld [vmem:[%s7834_s27 + $0x618] sm:$0xff]  ;;  %v5358_v41 = vld [vmem:[%s7834_s27 + $0x728] sm:$0xff]  ;;  %v5343_v4 = vld [vmem:[%s7834_s27 + $0x6b0] sm:$0xff] }
0x1c70   : > { %7300 = vmatpush3.bf16.msra.mxu1 %v7299_v16  ;;  %7332 = vmatpush3.bf16.msra.mxu0 %v7331_v56  ;;  %v7313_v16 = vpack.c.bf16 %v5286_v0, %v5285_v32  ;;  %v7345_v56 = vpack.c.bf16 %v5318_v9, %v5317_v39  ;;  %v5340_v32 = vld [vmem:[%s7834_s27 + $0x698] sm:$0xff]  ;;  %v4864_v0 = vadd.f32 %v8629_v29, %v8694_v19  ;;  %v5105_v29 = vmax.f32 %v4856_v57, 0.0  ;;  %v5359_v57 = vld [vmem:[%s7834_s27 + $0x730] sm:$0xff] }
0x1c71   : > { %7302 = vmatprep.subr.bf16.mxu1 %v7301_v42  ;;  %7334 = vmatprep.subr.bf16.mxu0 %v7333_v27  ;;  %v5287_v42 = vld [vmem:[%s7834_s27 + $0x4f0] sm:$0xff]  ;;  %v5288_v27 = vld [vmem:[%s7834_s27 + $0x4f8] sm:$0xff]  ;;  %v4941_v39 = vadd.f32 %v8631_v30, %v8698_v22  ;;  %v8780_v9 = vrot.slane %v8621_v8, %v8367_v61  ;;  %v7357_v1 = vpack.c.bf16 %v5340_v32, %v5339_v2  ;;  %v5377_v2 = vld [vmem:[%s7834_s27 + $0x7c0] sm:$0xff] }
0x1c72   : > { %v7317_v33 = vpack.c.bf16 %v5288_v27, %v5287_v42  ;;  %v4862_v30 = vadd.f32 %v8623_v25, %v4430_v58  ;;  %v4939_v22 = vadd.f32 %v8625_v26, %v4438_v21  ;;  %v5323_v61 = vld [vmem:[%s7834_s27 + $0x610] sm:$0xff]  ;;  %v5356_v27 = vld [vmem:[%s7834_s27 + $0x718] sm:$0xff]  ;;  %v5342_v25 = vld [vmem:[%s7834_s27 + $0x6a8] sm:$0xff] }
0x1c73   : > { %v5012_v18 = vadd.f32 %v8649_v50, %v8780_v9  ;;  %v5355_v42 = vld [vmem:[%s7834_s27 + $0x710] sm:$0xff]  ;;  %v5373_v26 = vld [vmem:[%s7834_s27 + $0x7a0] sm:$0xff]  ;;  %v7359_v50 = vpack.c.bf16 %v5324_v13, %v5323_v61  ;;  %v5378_v32 = vld [vmem:[%s7834_s27 + $0x7c8] sm:$0xff] }
0x1c74   : > { %7304 = vmatpush3.bf16.msra.mxu1 %v7303_v45  ;;  %7336 = vmatpush3.bf16.msra.mxu0 %v7335_v62  ;;  %v5272_v45 = vld [vmem:[%s7834_s27 + $0x478] sm:$0xff]  ;;  %v5303_v62 = vld [vmem:[%s7834_s27 + $0x570] sm:$0xff]  ;;  %v5121_v58 = vmax.f32 %v4862_v30, 0.0 }
0x1c75   : > { %7306 = vmatprep.subr.bf16.mxu1 %v7305_v34  ;;  %7338 = vmatprep.subr.bf16.mxu0 %v7337_v36  ;;  %v7349_v34 = vpack.c.bf16 %v5320_v55, %v5319_v54  ;;  %v5304_v36 = vld [vmem:[%s7834_s27 + $0x578] sm:$0xff]  ;;  %v7319_v10 = vpack.c.bf16 %v5272_v45, %v5271_v28  ;;  %v5341_v54 = vld [vmem:[%s7834_s27 + $0x6a0] sm:$0xff]  ;;  %v5374_v55 = vld [vmem:[%s7834_s27 + $0x7a8] sm:$0xff] }
0x1c76   : > { %v7351_v17 = vpack.c.bf16 %v5304_v36, %v5303_v62  ;;  %v5325_v28 = vld [vmem:[%s7834_s27 + $0x620] sm:$0xff]  ;;  %v5326_v45 = vld [vmem:[%s7834_s27 + $0x628] sm:$0xff]  ;;  %v5110_v62 = vmax.f32 %v5012_v18, 0.0  ;;  %v5348_v30 = vld [vmem:[%s7834_s27 + $0x6d8] sm:$0xff] }
0x1c77   : > { %v5357_v36 = vld [vmem:[%s7834_s27 + $0x720] sm:$0xff]  ;;  %v5380_v61 = vld [vmem:[%s7834_s27 + $0x7d8] sm:$0xff] }
0x1c78   : > { %7308 = vmatpush3.bf16.msra.mxu1 %v7307_v52  ;;  %7340 = vmatpush3.bf16.msra.mxu0 %v7339_v15  ;;  %v5321_v52 = vld [vmem:[%s7834_s27 + $0x600] sm:$0xff]  ;;  %v5322_v15 = vld [vmem:[%s7834_s27 + $0x608] sm:$0xff]  ;;  %v5332_v18 = vld [vmem:[%s7834_s27 + $0x658] sm:$0xff] }
0x1c79   : > { %7310 = vmatprep.subr.bf16.mxu1 %v7309_v12  ;;  %7342 = vmatprep.subr.bf16.mxu0 %v7341_v60  ;;  %v4933_v12 = vadd.f32 %v8605_v46, %v4438_v21  ;;  %v7385_v60 = vpack.c.bf16 %v5370_v49, %v5369_v48  ;;  %v5372_v46 = vld [vmem:[%s7834_s27 + $0x798] sm:$0xff]  ;;  %v5112_v21 = vmax.f32 %v8654_v14, 0.0  ;;  %v5375_v49 = vld [vmem:[%s7834_s27 + $0x7b0] sm:$0xff]  ;;  %v7363_v14 = vpack.c.bf16 %v5326_v45, %v5325_v28  ;;  %v5334_v28 = vld [vmem:[%s7834_s27 + $0x668] sm:$0xff] }
0x1c7a   : > { %v7389_v59 = vpack.c.bf16 %v5372_v46, %v5371_v11  ;;  %v5344_v48 = vld [vmem:[%s7834_s27 + $0x6b8] sm:$0xff]  ;;  %v5329_v11 = vld [vmem:[%s7834_s27 + $0x640] sm:$0xff]  ;;  %v5330_v46 = vld [vmem:[%s7834_s27 + $0x648] sm:$0xff] }
0x1c7b   : > { %v5107_v19 = vmax.f32 %v4933_v12, 0.0  ;;  %v5360_v12 = vld [vmem:[%s7834_s27 + $0x738] sm:$0xff]  ;;  %v7371_v13 = vpack.c.bf16 %v5330_v46, %v5329_v11 }
0x1c7c   : > { %7312 = vmatpush3.bf16.msra.mxu1 %v7311_v24  ;;  %7344 = vmatpush3.bf16.msra.mxu0 %v7343_v47  ;;  %v7355_v24 = vpack.c.bf16 %v5322_v15, %v5321_v52  ;;  %v7387_v47 = vpack.c.bf16 %v5354_v35, %v5353_v53  ;;  %v5328_v52 = vld [vmem:[%s7834_s27 + $0x638] sm:$0xff]  ;;  %v7365_v15 = vpack.c.bf16 %v5344_v48, %v5343_v4  ;;  %v5346_v35 = vld [vmem:[%s7834_s27 + $0x6c8] sm:$0xff] }
0x1c7d   : > { %7314 = vmatprep.subr.bf16.mxu1 %v7313_v16  ;;  %7346 = vmatprep.subr.bf16.mxu0 %v7345_v56  ;;  %v5122_v16 = vmax.f32 %v4864_v0, 0.0  ;;  %v5124_v56 = vmax.f32 %v4941_v39, 0.0  ;;  %v7399_v39 = vpack.c.bf16 %v5360_v12, %v5359_v57  ;;  %v5384_v4 = vld [vmem:[%s7834_s27 + $0x7f8] sm:$0xff] }
0x1c80   : > { %7316 = vmatpush3.bf16.msra.mxu1 %v7315_v5  ;;  %7348 = vmatpush3.bf16.msra.mxu0 %v7347_v40  ;;  %v5123_v5 = vmax.f32 %v4939_v22, 0.0  ;;  %v7391_v40 = vpack.c.bf16 %v5356_v27, %v5355_v42  ;;  %v5379_v22 = vld [vmem:[%s7834_s27 + $0x7d0] sm:$0xff] }
0x1c81   : > { %7318 = vmatprep.subr.bf16.mxu1 %v7317_v33  ;;  %7350 = vmatprep.subr.bf16.mxu0 %v7349_v34  ;;  %v7361_v33 = vpack.c.bf16 %v5342_v25, %v5341_v54  ;;  %v7393_v34 = vpack.c.bf16 %v5374_v55, %v5373_v26  ;;  %v7405_v42 = vpack.c.bf16 %v5380_v61, %v5379_v22  ;;  %v5363_v27 = vld [vmem:[%s7834_s27 + $0x750] sm:$0xff]  ;;  %v5364_v54 = vld [vmem:[%s7834_s27 + $0x758] sm:$0xff]  ;;  %v5349_v25 = vld [vmem:[%s7834_s27 + $0x6e0] sm:$0xff] }
0x1c82   : > { %v5350_v26 = vld [vmem:[%s7834_s27 + $0x6e8] sm:$0xff]  ;;  %v5381_v55 = vld [vmem:[%s7834_s27 + $0x7e0] sm:$0xff] }
0x1c83   : > { %v7377_v45 = vpack.c.bf16 %v5350_v26, %v5349_v25 }
0x1c84   : > { %7320 = vmatpush3.bf16.msra.mxu1 %v7319_v10  ;;  %7352 = vmatpush3.bf16.msra.mxu0 %v7351_v17  ;;  %v5376_v10 = vld [vmem:[%s7834_s27 + $0x7b8] sm:$0xff]  ;;  %v7395_v17 = vpack.c.bf16 %v5358_v41, %v5357_v36  ;;  %v5383_v41 = vld [vmem:[%s7834_s27 + $0x7f0] sm:$0xff] }
0x1c85   : > { %7354 = vmatprep.subr.bf16.mxu1 %v7353_v37  ;;  %7386 = vmatprep.subr.bf16.mxu0 %v7385_v60  ;;  %v5327_v37 = vld [vmem:[%s7834_s27 + $0x630] sm:$0xff]  ;;  %v7397_v53 = vpack.c.bf16 %v5376_v10, %v5375_v49  ;;  %v5345_v60 = vld [vmem:[%s7834_s27 + $0x6c0] sm:$0xff]  ;;  %v5352_v36 = vld [vmem:[%s7834_s27 + $0x6f8] sm:$0xff] }
0x1c86   : > { %v7367_v0 = vpack.c.bf16 %v5328_v52, %v5327_v37  ;;  %v5335_v10 = vld [vmem:[%s7834_s27 + $0x670] sm:$0xff]  ;;  %v7413_v37 = vpack.c.bf16 %v5384_v4, %v5383_v41  ;;  %v5336_v52 = vld [vmem:[%s7834_s27 + $0x678] sm:$0xff] }
0x1c87   : > { %5750 = vmatmul.mubr.f32.vlgmr.msra.gmra.mrb[64].mxu1 %v5105_v29  ;;  %5825 = vmatmul.mubr.f32.vlgmr.msra.gmra.mrb[58].mxu0 %v5107_v19  ;;  %v5362_v29 = vld [vmem:[%s7834_s27 + $0x748] sm:$0xff]  ;;  %v5347_v19 = vld [vmem:[%s7834_s27 + $0x6d0] sm:$0xff]  ;;  %v7383_v57 = vpack.c.bf16 %v5336_v52, %v5335_v10 }
0x1c88   : > { %5754 = vmatprep.mubr.f32.mxu1 %v5122_v16  ;;  %5829 = vmatprep.mubr.f32.mxu0 %v5124_v56  ;;  %v5331_v56 = vld [vmem:[%s7834_s27 + $0x650] sm:$0xff] }
0x1c89   : > { %7356 = vmatpush3.bf16.msra.mxu1 %v7355_v24  ;;  %7388 = vmatpush3.bf16.msra.mxu0 %v7387_v47  ;;  %v7369_v24 = vpack.c.bf16 %v5346_v35, %v5345_v60  ;;  %v7401_v47 = vpack.c.bf16 %v5378_v32, %v5377_v2  ;;  %v5018_v35 = vadd.f32 %v8669_v23, %v8780_v9 }
0x1c8a   : > { %7358 = vmatprep.subr.bf16.mxu1 %v7357_v1  ;;  %7390 = vmatprep.subr.bf16.mxu0 %v7389_v59  ;;  %v5361_v1 = vld [vmem:[%s7834_s27 + $0x740] sm:$0xff]  ;;  %v7373_v59 = vpack.c.bf16 %v5348_v30, %v5347_v19 }
0x1c8b   : > { %5755 = vmatmul.mubr.f32.gmra.mrb[66].mxu1 %v5121_v58  ;;  %5830 = vmatmul.mubr.f32.gmra.mrb[60].mxu0 %v5123_v5  ;;  %v7403_v16 = vpack.c.bf16 %v5362_v29, %v5361_v1  ;;  %v5382_v58 = vld [vmem:[%s7834_s27 + $0x7e8] sm:$0xff]  ;;  %v7375_v5 = vpack.c.bf16 %v5332_v18, %v5331_v56  ;;  %v5126_v32 = vmax.f32 %v5018_v35, 0.0 }
0x1c8c   : > { %5899 = vmatprep.mubr.f32.mxu1 %v5110_v62  ;;  %5974 = vmatprep.mubr.f32.mxu0 %v5112_v21  ;;  %v7409_v62 = vpack.c.bf16 %v5382_v58, %v5381_v55  ;;  %v5365_v21 = vld [vmem:[%s7834_s27 + $0x760] sm:$0xff] }
0x1c8d   : > { %7360 = vmatpush3.bf16.msra.mxu1 %v7359_v50  ;;  %7392 = vmatpush3.bf16.msra.mxu0 %v7391_v40  ;;  %v7407_v50 = vpack.c.bf16 %v5364_v54, %v5363_v27  ;;  %v5333_v40 = vld [vmem:[%s7834_s27 + $0x660] sm:$0xff] }
0x1c8e   : > { %7362 = vmatprep.subr.bf16.mxu1 %v7361_v33  ;;  %7394 = vmatprep.subr.bf16.mxu0 %v7393_v34  ;;  %v5366_v33 = vld [vmem:[%s7834_s27 + $0x768] sm:$0xff]  ;;  %v5351_v34 = vld [vmem:[%s7834_s27 + $0x6f0] sm:$0xff]  ;;  %v7379_v48 = vpack.c.bf16 %v5334_v28, %v5333_v40 }
0x1c8f   : > { %v7411_v49 = vpack.c.bf16 %v5366_v33, %v5365_v21 }
0x1c91   : > { %7364 = vmatpush3.bf16.msra.mxu1 %v7363_v14  ;;  %7396 = vmatpush3.bf16.msra.mxu0 %v7395_v17  ;;  %v4446_v14 = vrot.slane %v8621_v8, %v8364_v7  ;;  %v7381_v17 = vpack.c.bf16 %v5352_v36, %v5351_v34  ;;  %v5111_v8 = vmax.f32 %v8647_v63, 0.0 }
0x1c92   : > { %7366 = vmatprep.subr.bf16.mxu1 %v7365_v15  ;;  %7398 = vmatprep.subr.bf16.mxu0 %v7397_v53  ;;  %v5367_v15 = vld [vmem:[%s7834_s27 + $0x770] sm:$0xff]  ;;  %v5368_v53 = vld [vmem:[%s7834_s27 + $0x778] sm:$0xff]  ;;  %s8984_s27 = sld [smem:[#allocation5_spill]] }
0x1c93   : > { %v7415_v12 = vpack.c.bf16 %v5368_v53, %v5367_v15  ;;  %v5010_v60 = vadd.f32 %v8643_v44, %v4446_v14  ;;  %v5016_v2 = vadd.f32 %v8662_v20, %v4446_v14 }
0x1c95   : > { %7368 = vmatpush3.bf16.msra.mxu1 %v7367_v0  ;;  %7400 = vmatpush3.bf16.msra.mxu0 %v7399_v39  ;;  %v5109_v7 = vmax.f32 %v5010_v60, 0.0  ;;  %v5128_v0 = vmax.f32 %v8674_v51, 0.0  ;;  %v5125_v44 = vmax.f32 %v5016_v2, 0.0  ;;  %v5127_v39 = vmax.f32 %v8667_v31, 0.0 }
0x1c96   : > { %7370 = vmatprep.subr.bf16.mxu1 %v7369_v24  ;;  %7402 = vmatprep.subr.bf16.mxu0 %v7401_v47 }
0x1c98   : > { %p6432_p6 = scmp.ne.s32.totalorder %s8984_s27, 1 }
0x1c99   : > { %7372 = vmatpush3.bf16.msra.mxu1 %v7371_v13  ;;  %7404 = vmatpush3.bf16.msra.mxu0 %v7403_v16  ;;  %s8985_s24 = sld [smem:[#allocation20_spill]] (!%p6432_p6) }
0x1c9a   : > { %7374 = vmatprep.subr.bf16.mxu1 %v7373_v59  ;;  %7406 = vmatprep.subr.bf16.mxu0 %v7405_v42 }
0x1c9d   : > { %7376 = vmatpush3.bf16.msra.mxu1 %v7375_v5  ;;  %7408 = vmatpush3.bf16.msra.mxu0 %v7407_v50 }
0x1c9e   : > { %7378 = vmatprep.subr.bf16.mxu1 %v7377_v45  ;;  %7410 = vmatprep.subr.bf16.mxu0 %v7409_v62 }
0x1ca1   : > { %7380 = vmatpush3.bf16.msra.mxu1 %v7379_v48  ;;  %7412 = vmatpush3.bf16.msra.mxu0 %v7411_v49 }
0x1ca2   : > { %7382 = vmatprep.subr.bf16.mxu1 %v7381_v17  ;;  %7414 = vmatprep.subr.bf16.mxu0 %v7413_v37 }
0x1ca5   : > { %7384 = vmatpush3.bf16.msra.mxu1 %v7383_v57  ;;  %7416 = vmatpush3.bf16.msra.mxu0 %v7415_v12 }
0x1ca8   : > { %5900 = vmatmul.mubr.f32.vlgmr.msra.gmra.mrb[68].mxu1 %v5109_v7  ;;  %5975 = vmatmul.mubr.f32.vlgmr.msra.gmra.mrb[62].mxu0 %v5111_v8 }
0x1ca9   : > { %5904 = vmatprep.mubr.f32.mxu1 %v5126_v32  ;;  %5979 = vmatprep.mubr.f32.mxu0 %v5128_v0 }
0x1cac   : > { %5905 = vmatmul.mubr.f32.gmra.mrb[70].mxu1 %v5125_v44  ;;  %5980 = vmatmul.mubr.f32.gmra.mrb[64].mxu0 %v5127_v39 }
0x1d19   : > { %v6570_v23 = vpop.f32.mrb[56].mxu1  ;;  %v6608_v9 = vpop.f32.mrb[50].mxu0 }
0x1d1a   : > { %v6571_v11 = vpop.f32.mrb[57].mxu1  ;;  %v6609_v46 = vpop.f32.mrb[51].mxu0 }
0x1d1b   : > { %v6572_v24 = vadd.f32 %v6571_v11, %v6570_v23  ;;  %v6610_v63 = vadd.f32 %v6609_v46, %v6608_v9  ;;  %v6431_v23 = vld [vmem:[%s8983_s20] ss:$0 sm:$0xff] }
0x1d1d   : > { %v5527_v47 = vadd.f32 %v6610_v63, %v6572_v24  ;;  %v6573_v20 = vpop.f32.mrb[58].mxu1  ;;  %v6611_v1 = vpop.f32.mrb[52].mxu0 }
0x1d1e   : > { %v6574_v29 = vpop.f32.mrb[59].mxu1  ;;  %v6612_v51 = vpop.f32.mrb[53].mxu0 }
0x1d1f   : > { %v6575_v19 = vadd.f32 %v6574_v29, %v6573_v20  ;;  %v6613_v30 = vadd.f32 %v6612_v51, %v6611_v1 }
0x1d21   : > { %v5532_v22 = vadd.f32 %v6613_v30, %v6575_v19 }
0x1d39   : > { %v6646_v61 = vpop.f32.mrb[60].mxu1  ;;  %v6684_v13 = vpop.f32.mrb[54].mxu0 }
0x1d3a   : > { %v6647_v16 = vpop.f32.mrb[61].mxu1  ;;  %v6685_v31 = vpop.f32.mrb[55].mxu0 }
0x1d3b   : > { %v6648_v56 = vadd.f32 %v6647_v16, %v6646_v61  ;;  %v6686_v18 = vadd.f32 %v6685_v31, %v6684_v13 }
0x1d3d   : > { %v5602_v59 = vadd.f32 %v6648_v56, %v5527_v47  ;;  %v6649_v42 = vpop.f32.mrb[62].mxu1  ;;  %v6687_v27 = vpop.f32.mrb[56].mxu0 }
0x1d3e   : > { %v6650_v54 = vpop.f32.mrb[63].mxu1  ;;  %v6688_v25 = vpop.f32.mrb[57].mxu0 }
0x1d3f   : > { %v5677_v26 = vadd.f32 %v6686_v18, %v5602_v59  ;;  %v6651_v55 = vadd.f32 %v6650_v54, %v6649_v42  ;;  %v6689_v58 = vadd.f32 %v6688_v25, %v6687_v27 }
0x1d41   : > { %v5607_v5 = vadd.f32 %v6651_v55, %v5532_v22 }
0x1d43   : > { %v5682_v50 = vadd.f32 %v6689_v58, %v5607_v5 }
0x1d5a   : > { %v6722_v40 = vpop.f32.mrb[64].mxu1  ;;  %v6760_v28 = vpop.f32.mrb[58].mxu0 }
0x1d5b   : > { %v6723_v45 = vpop.f32.mrb[65].mxu1  ;;  %v6761_v62 = vpop.f32.mrb[59].mxu0 }
0x1d5c   : > { %v6724_v21 = vadd.f32 %v6723_v45, %v6722_v40  ;;  %v6762_v33 = vadd.f32 %v6761_v62, %v6760_v28  ;;  %v6002_v45 = vld [vmem:[%s8985_s24] sm:$0x3] (!%p6432_p6) }
0x1d5e   : > { %v5752_v34 = vadd.f32 %v6724_v21, %v5677_v26  ;;  %v6725_v36 = vpop.f32.mrb[66].mxu1  ;;  %v6763_v41 = vpop.f32.mrb[60].mxu0  ;;  %v6026_v21 = vrot.slane (!%p6432_p6), %v6002_v45, %v7866_v38 }
0x1d5f   : > { %v6726_v4 = vpop.f32.mrb[67].mxu1  ;;  %v6764_v48 = vpop.f32.mrb[61].mxu0 }
0x1d60   : > { %v5827_v49 = vadd.f32 %v6762_v33, %v5752_v34  ;;  %v6727_v10 = vadd.f32 %v6726_v4, %v6725_v36  ;;  %v6765_v14 = vadd.f32 %v6764_v48, %v6763_v41  ;;  %v6052_v34 = vrot.slane (!%p6432_p6), %v6002_v45, %v7874_v43 }
0x1d62   : > { %v5757_v17 = vadd.f32 %v6727_v10, %v5682_v50 }
0x1d64   : > { %v5832_v37 = vadd.f32 %v6765_v14, %v5757_v17 }
0x1d7b   : > { %v6798_v52 = vpop.f32.mrb[68].mxu1  ;;  %v6836_v15 = vpop.f32.mrb[62].mxu0 }
0x1d7c   : > { %v6799_v53 = vpop.f32.mrb[69].mxu1  ;;  %v6837_v57 = vpop.f32.mrb[63].mxu0 }
0x1d7d   : > { %v6800_v12 = vadd.f32 %v6799_v53, %v6798_v52  ;;  %v6838_v60 = vadd.f32 %v6837_v57, %v6836_v15 }
0x1d7f   : > { %v5902_v35 = vadd.f32 %v6800_v12, %v5827_v49  ;;  %v6801_v7 = vpop.f32.mrb[70].mxu1  ;;  %v6839_v8 = vpop.f32.mrb[64].mxu0 }
0x1d80   : > { %v6802_v2 = vpop.f32.mrb[71].mxu1  ;;  %v6840_v32 = vpop.f32.mrb[65].mxu0 }
0x1d81   : > { %v5977_v0 = vadd.f32 %v6838_v60, %v5902_v35  ;;  %v6803_v44 = vadd.f32 %v6802_v2, %v6801_v7  ;;  %v6841_v39 = vadd.f32 %v6840_v32, %v6839_v8 }
0x1d83   : > { %v5985_v9 = vadd.f32 %v5977_v0, %v8325_v6  ;;  %v5907_v11 = vadd.f32 %v6803_v44, %v5832_v37 }
0x1d85   : > { %v5994_v46 = vadd.f32 %v6431_v23, %v5985_v9  ;;  %v5982_v24 = vadd.f32 %v6841_v39, %v5907_v11  ;;  %6001 = sbr.rel (%p6432_p6) target bundleno = 7890 (0x1ed2), region = 108 }
0x1d87   : > { %5996 = vst.msk [vmem:[#allocation2] sm:$0xff] %vm972_vm1, %v5994_v46  ;;  %v5986_v63 = vadd.f32 %v5982_v24, %v8323_v3  ;;  %v6003_v20 = vsel (!%p6432_p6), %vm972_vm1, %v5994_v46, 0.0 }
0x1d88   : > { %6004 = vadd.xlane.f32.xlu0 (!%p6432_p6), %v6003_v20 }
0x1d89   : > { %v5995_v47 = vadd.f32 %v6431_v23, %v5986_v63 }
0x1d8b   : > { %5997 = vst.msk [vmem:[#allocation2 + $0x8] sm:$0xff] %vm972_vm1, %v5995_v47  ;;  %v6006_v1 = vsel (!%p6432_p6), %vm972_vm1, %v5995_v47, 0.0 }
0x1d8c   : > { %6007 = vadd.xlane.f32.xlu0 %v6006_v1 }
0x1e15   : > { %v6005_v6 = vpop.xlane.xlu0 %6004 }
0x1e16   : > { %v6009_v29 = vmul.f32 0.03125, %v6005_v6 }
0x1e18   : > { %v6011_v51 = vsub.f32 %v5994_v46, %v6009_v29 }
0x1e19   : > { %v6008_v19 = vpop.xlane.xlu0 %6007 }
0x1e1a   : > { %v6010_v30 = vmul.f32 0.03125, %v6008_v19  ;;  %v6013_v22 = vmul.f32 %v6011_v51, %v6011_v51  ;;  %v6027_v33 = vmul.f32 %v6026_v21, %v6011_v51 }
0x1e1c   : > { %v6012_v61 = vsub.f32 %v5995_v47, %v6010_v30  ;;  %v6015_v3 = vsel %vm972_vm1, %v6013_v22, 0.0 }
0x1e1d   : > { %6016 = vadd.xlane.f32.xlu1 %v6015_v3 }
0x1e1e   : > { %v6014_v13 = vmul.f32 %v6012_v61, %v6012_v61  ;;  %v6028_v4 = vmul.f32 %v6026_v21, %v6012_v61 }
0x1e20   : > { %v6018_v16 = vsel %vm972_vm1, %v6014_v13, 0.0 }
0x1e21   : > { %6019 = vadd.xlane.f32.xlu1 %v6018_v16 }
0x1eaa   : > { %v6017_v31 = vpop.xlane.xlu1 %6016 }
0x1eab   : > { %v6021_v56 = vmul.f32 0.032258064, %v6017_v31 }
0x1ead   : > { %7555 = vrsqrt.f32 %v6021_v56  ;;  %vm6031_vm4 = vcmp.eq.f32.partialorder %v6021_v56, inf  ;;  %v6034_v54 = vand.u32 2147483648, %v6021_v56  ;;  %vm6033_vm5 = vcmp.eq.f32.partialorder %v6021_v56, 0.0 }
0x1eae   : > { %v6020_v18 = vpop.xlane.xlu1 %6019 }
0x1eaf   : > { %v6022_v59 = vmul.f32 0.032258064, %v6020_v18 }
0x1eb1   : > { %7557 = vrsqrt.f32 %v6022_v59  ;;  %vm6038_vm6 = vcmp.eq.f32.partialorder %v6022_v59, inf  ;;  %v6041_v50 = vand.u32 2147483648, %v6022_v59  ;;  %vm6040_vm7 = vcmp.eq.f32.partialorder %v6022_v59, 0.0 }
0x1eb7   : > { %v7556_v42 = vpop.eup %7555 }
0x1eb8   : > { %v6030_v27 = vmul.f32 %v7556_v42, %v6021_v56 }
0x1eba   : > { %v6032_v25 = vsel %vm6031_vm4, %v6021_v56, %v6030_v27 }
0x1ebb   : > { %v7558_v26 = vpop.eup %7557  ;;  %v6035_v55 = vsel %vm6033_vm5, %v6034_v54, %v6032_v25 }
0x1ebc   : > { %v6043_v58 = vadd.f32 1e-06, %v6035_v55  ;;  %v6037_v5 = vmul.f32 %v7558_v26, %v6022_v59 }
0x1ebe   : > { %7559 = vrcp.f32 %v6043_v58  ;;  %v6039_v40 = vsel %vm6038_vm6, %v6022_v59, %v6037_v5 }
0x1ebf   : > { %v6042_v28 = vsel %vm6040_vm7, %v6041_v50, %v6039_v40 }
0x1ec0   : > { %v6044_v62 = vadd.f32 1e-06, %v6042_v28 }
0x1ec2   : > { %7561 = vrcp.f32 %v6044_v62 }
0x1ec8   : > { %v7560_v36 = vpop.eup %7559 }
0x1ec9   : > { %v6046_v41 = vmul.f32 %v7560_v36, %v6027_v33 }
0x1ecb   : > { %v6053_v48 = vadd.f32 %v6052_v34, %v6046_v41 }
0x1ecc   : > { %v7562_v49 = vpop.eup %7561 }
0x1ecd   : > { %6055 = vst.msk [vmem:[#allocation2] sm:$0xff] %vm972_vm1, %v6053_v48  ;;  %v6048_v10 = vmul.f32 %v7562_v49, %v6028_v4 }
0x1ecf   : > { %v6054_v14 = vadd.f32 %v6052_v34, %v6048_v10 }
0x1ed1   : > { %6056 = vst.msk [vmem:[#allocation2 + $0x8] sm:$0xff] %vm972_vm1, %v6054_v14 }
0x1ed2 PF: > { %s8986_s19 = sld [smem:[#allocation7_spill]]  ;;  %s7634_s21 = smov [#allocation2]  }
0x1ed3   : > { %s6066_s26 = sshll.u32 %s7634_s21, 4  ;;  %s6067_s26 = int_to_ptr.vmem [resolvable:$true] %s6066_s26 }
0x1ed4   : > { %s7563_s9 = scalar_lea.vmem %s6067_s26, 256  ;;  %p7570_p11 = scmp.lt.s32.totalorder %s6067_s26, %s6067_s26 }
0x1ed5   : > { %p7564_p8 = scmp.ne.s32.totalorder %s6067_s26, %s7563_s9  ;;  %p7571_p12 = scmp.lt.s32.totalorder %s7563_s9, %s7563_s9 }
0x1ed7   : > { %p7572_p13 = por %p7571_p12, %p7570_p11 }
0x1ed8   : > { %s8987_s6 = sadd.s32 4294967295, %s8986_s19  }
0x1ed9   : > { %p8873_p7 = scmp.eq.s32.totalorder %s8987_s6, 1 }
0x1edb   : > { %p7565_p9 = pnand %p7564_p8, %p8873_p7 }
0x1edd   : > { %p7566_p10 = pneg %p7565_p9 }
0x1edf   : > { %p7573_p0 = pnand %p7572_p13, %p7566_p10 }
0x1ee1   : > { %7576 = shalt.err (!%p7573_p0)
}
0x1ee2   : > { %s8989_s7 = sld [smem:[#allocation21_spill]] }
0x1ee8   : > { %s7577_s3 = scalar_lea.hbm %s8989_s7, 256 }
0x1ee9   : > { %p7578_p1 = scmp.ne.s32.totalorder %s8989_s7, %s7577_s3  ;;  %p7583_p4 = scmp.lt.u32.totalorder %s7577_s3, %s8989_s7 }
0x1eeb   : > { %p7579_p2 = pnand %p7578_p1, %p8873_p7 }
0x1eed   : > { %p7580_p3 = pneg %p7579_p2 }
0x1eef   : > { %p7585_p5 = pnand %p7583_p4, %p7580_p3 }
0x1ef1   : > { %7588 = shalt.err (!%p7585_p5)
}
0x1ef2   : > { %s7635_s20 = smov 128   ;;  %s8990_s27 = smov 8  }
0x1ef3   : > { %7418 = dma.vmem_to_hbm [thread:$0]  (%p8873_p7), %s6067_s26, 256, %s8989_s7, [#allocation3], %s7635_s20, %s7635_s20, %s8990_s27  }
0x1ef4   : > { %7602 = dma.done.wait (%p8873_p7), [#allocation3], 256  }
0x1ef5   : > { %7604 = vsyncadd (%p8873_p7), [#allocation3], 4294967040 }
0x1ef6 PF: > { %s8991_s24 = sld [smem:[#allocation7_spill]]  ;;  %s8992_s1 = sld [smem:[#allocation6_spill]] }
0x1ef7   : > { %s8993_s22 = sld [smem:[#allocation8_spill]] }
0x1efc   : > { %s31_s23 = sadd.s32 1, %s8991_s24  }
0x1efd   : > { %p28_p6 = scmp.ge.s32.totalorder %s31_s23, 4  }
0x1eff   :  { %30 = sbr.rel (!%p28_p6) target bundleno = 16 (0x10), region = 190 }
0x1f06   :  { %6082 = vsyncpa [#allocation3], 1 }
0x1f07   :  { %6084 = vsyncpa [#allocation3 + $0x1], 1 }

</bundles_post_ra>
